<compile_context>
chip_gen: v5e
topology: v5e:2x2
jax: 0.10.0
libtpu: 0.0.40
codegen_flags: <defaults>
</compile_context>

<pallas_src>
import jax
import jax.numpy as jnp
from jax.experimental import pallas as pl
from jax.experimental.pallas import tpu as pltpu

# ----------------------------- configuration (scaled-down CLIP-L) ----------
BATCH = 2
IMG = 16           # image spatial size (orig 224)
C_IN = 3           # RGB
PATCH = 8          # patch size (orig 14)
D_VIS = 32         # vision hidden size (orig 1024)
N_HEADS_VIS = 2    # (orig 16)
N_LAYERS_VIS = 2   # (orig 24)
MAPPER_LAYERS = 3  # Transformer(1, width, 3, 1)
MAPPER_HEADS = 1
OUT_DIM = 24       # proj_out output dim (orig 768)
LN_EPS = 1e-5

NUM_PATCHES = (IMG // PATCH) ** 2
SEQ_VIS = NUM_PATCHES + 1          # + CLS token
HEAD_DIM = D_VIS // N_HEADS_VIS


# ----------------------------- in-kernel helpers ----------------------------

def _ln(x, g, b, eps=LN_EPS):
    """Row-wise LayerNorm in fp32; g, b are (1, D)."""
    mean = jnp.mean(x, axis=-1, keepdims=True)
    var = jnp.mean(jnp.square(x - mean), axis=-1, keepdims=True)
    return (x - mean) * jax.lax.rsqrt(var + eps) * g + b


def _quick_gelu(x):
    # QuickGELU: x * sigmoid(1.702 * x)  (CLIP + GLIDE-xf activation)
    return x * jax.nn.sigmoid(1.702 * x)


def _mm(x, w):
    """bf16 MXU matmul with fp32 accumulation (w is stored bf16)."""
    return jnp.dot(x.astype(jnp.bfloat16), w, preferred_element_type=jnp.float32)


# ----------------------------- kernel 1: whole CLIP vision tower -----------

def _clip_tower_kernel(patches_ref, patch_w_ref, cls_ref, pos_ref,
                       pre_g_ref, pre_b_ref,
                       ln1_g_ref, ln1_b_ref,
                       qw_ref, qb_ref, kw_ref, kb_ref, vw_ref, vb_ref,
                       ow_ref, ob_ref,
                       ln2_g_ref, ln2_b_ref,
                       fc1w_ref, fc1b_ref, fc2w_ref, fc2b_ref,
                       post_g_ref, post_b_ref,
                       pooled_ref):
    B, S, D = BATCH, SEQ_VIS, D_VIS
    NP, nh, dh = NUM_PATCHES, N_HEADS_VIS, HEAD_DIM
    scale = dh ** -0.5

    # --- embeddings: patch conv (as matmul), CLS + positional, pre-LN -------
    pe = _mm(patches_ref[...], patch_w_ref[...])             # (B*NP, D) fp32
    cls = cls_ref[...]                                       # (1, D)
    pos = pos_ref[...]                                       # (S, D)
    rows = []
    for b in range(B):
        rows.append(cls + pos[0:1])
        rows.append(pe[b * NP:(b + 1) * NP] + pos[1:])
    h = jnp.concatenate(rows, axis=0)                        # (B*S, D)
    h = _ln(h, pre_g_ref[...], pre_b_ref[...])

    # --- pre-LN transformer blocks, fully resident in VMEM/vregs ------------
    for l in range(N_LAYERS_VIS):
        # ---- self-attention (CLIP scales q only) ----
        x = _ln(h, ln1_g_ref[l], ln1_b_ref[l])
        q = (_mm(x, qw_ref[l]) + qb_ref[l]) * scale
        k = _mm(x, kw_ref[l]) + kb_ref[l]
        v = _mm(x, vw_ref[l]) + vb_ref[l]
        ow = ow_ref[l]                                       # (D, D) bf16
        ao_rows = []
        for b in range(B):
            r0 = b * S
            ao_b = None
            for hh in range(nh):
                c0 = hh * dh
                qh = q[r0:r0 + S, c0:c0 + dh]
                kh = k[r0:r0 + S, c0:c0 + dh]
                vh = v[r0:r0 + S, c0:c0 + dh]
                s = jax.lax.dot_general(qh, kh, (((1,), (1,)), ((), ())),
                                        preferred_element_type=jnp.float32)
                m = jnp.max(s, axis=-1, keepdims=True)
                p = jnp.exp(s - m)
                inv = pl.reciprocal(jnp.sum(p, axis=-1, keepdims=True),
                                    approx=True)
                oh = jnp.dot(p * inv, vh,
                             preferred_element_type=jnp.float32)  # (S, dh)
                # fold this head's slice of the output projection directly, so
                # heads are combined by summation (no lane-axis concat needed)
                part = _mm(oh, ow[c0:c0 + dh, :])            # (S, D)
                ao_b = part if ao_b is None else ao_b + part
            ao_rows.append(ao_b)
        ao = jnp.concatenate(ao_rows, axis=0) + ob_ref[l]
        h = h + ao

        # ---- MLP (quick_gelu) ----
        x = _ln(h, ln2_g_ref[l], ln2_b_ref[l])
        y = _quick_gelu(_mm(x, fc1w_ref[l]) + fc1b_ref[l])
        y = _mm(y, fc2w_ref[l]) + fc2b_ref[l]
        h = h + y

    # --- pooler_output: post-LayerNorm of the CLS token ----------------------
    pooled = jnp.concatenate([h[b * S:b * S + 1, :] for b in range(B)], axis=0)
    pooled_ref[...] = _ln(pooled, post_g_ref[...], post_b_ref[...])


# ----------------------------- kernel 2: mapper + final_ln + proj_out ------

def _mapper_head_kernel(z_ref,
                        ln1_g_ref, ln1_b_ref, qkvw_ref, qkvb_ref,
                        projw_ref, projb_ref, ln2_g_ref, ln2_b_ref,
                        fcw_ref, fcb_ref, cprojw_ref, cprojb_ref,
                        fin_g_ref, fin_b_ref, poutw_ref, poutb_ref,
                        o_ref):
    W = D_VIS
    z = z_ref[...]                                           # (B, W); S==1 squeezed
    for l in range(MAPPER_LAYERS):
        # attention: n_ctx == 1 and heads == 1, so the softmax over a single
        # key is exactly 1 and attn(x) == c_proj(v).  (Exact, not approximate;
        # the q/k sqrt-sqrt scaling cancels under the single-element softmax.)
        x = _ln(z, ln1_g_ref[l], ln1_b_ref[l])
        qkv = _mm(x, qkvw_ref[l]) + qkvb_ref[l]              # (B, 3W)
        v = qkv[:, 2 * W:]
        z = z + _mm(v, projw_ref[l]) + projb_ref[l]
        # MLP (quick_gelu)
        x = _ln(z, ln2_g_ref[l], ln2_b_ref[l])
        y = _quick_gelu(_mm(x, fcw_ref[l]) + fcb_ref[l])
        z = z + _mm(y, cprojw_ref[l]) + cprojb_ref[l]
    z = _ln(z, fin_g_ref[...], fin_b_ref[...])               # final_ln
    o_ref[...] = _mm(z, poutw_ref[...]) + poutb_ref[...]     # proj_out


# ----------------------------- pallas_call wrappers -------------------------

_VMEM = pl.BlockSpec(memory_space=pltpu.MemorySpace.VMEM)


def clip_vision_pooled(patches, cp):
    args = (patches, cp["patch_w"], cp["class_embedding"], cp["pos_embedding"],
            cp["pre_ln_g"], cp["pre_ln_b"],
            cp["ln1_g"], cp["ln1_b"], cp["q_w"], cp["q_b"], cp["k_w"], cp["k_b"],
            cp["v_w"], cp["v_b"], cp["o_w"], cp["o_b"],
            cp["ln2_g"], cp["ln2_b"], cp["fc1_w"], cp["fc1_b"],
            cp["fc2_w"], cp["fc2_b"], cp["post_ln_g"], cp["post_ln_b"])
    return pl.pallas_call(
        _clip_tower_kernel,
        out_shape=jax.ShapeDtypeStruct((BATCH, D_VIS), jnp.float32),
        in_specs=[_VMEM] * len(args),
        out_specs=_VMEM,
    )(*args)


def mapper_head(pooled, mp):
    args = (pooled, mp["ln1_g"], mp["ln1_b"], mp["qkv_w"], mp["qkv_b"],
            mp["proj_w"], mp["proj_b"], mp["ln2_g"], mp["ln2_b"],
            mp["fc_w"], mp["fc_b"], mp["cproj_w"], mp["cproj_b"],
            mp["final_ln_g"], mp["final_ln_b"], mp["proj_out_w"], mp["proj_out_b"])
    return pl.pallas_call(
        _mapper_head_kernel,
        out_shape=jax.ShapeDtypeStruct((BATCH, OUT_DIM), jnp.float32),
        in_specs=[_VMEM] * len(args),
        out_specs=_VMEM,
    )(*args)


def frozen_clip_image_embedder_only_class(image, params):
    """image: (B, 3, H, W) NCHW  ->  (B, 1, OUT_DIM)"""
    B, C, H, W = image.shape
    Hp, Wp = H // PATCH, W // PATCH
    # stride==kernel patch-embedding conv as patch extraction (pure layout, one XLA op)
    patches = image.reshape(B, C, Hp, PATCH, Wp, PATCH)
    patches = patches.transpose(0, 2, 4, 1, 3, 5).reshape(B * Hp * Wp, C * PATCH * PATCH)
    patches = patches.astype(jnp.bfloat16)

    pooled = clip_vision_pooled(patches, params["clip"])     # (B, D_VIS)
    z = mapper_head(pooled, params["mapper"])                # (B, OUT_DIM)
    return z[:, None, :]                                     # unsqueeze(1)


# ----------------------------- deterministic parameter init -----------------

def init_params(key):
    keys = iter(jax.random.split(key, 64))
    bf = jnp.bfloat16
    f32 = jnp.float32

    def nrm(shape, std=0.02, dtype=f32):
        return (jax.random.normal(next(keys), shape, f32) * std).astype(dtype)

    D, L, ML, W = D_VIS, N_LAYERS_VIS, MAPPER_LAYERS, D_VIS

    clip = dict(
        patch_w=nrm((C_IN * PATCH * PATCH, D), dtype=bf),      # conv bias=False
        class_embedding=nrm((1, D)),
        pos_embedding=nrm((SEQ_VIS, D)),
        pre_ln_g=jnp.ones((1, D), f32), pre_ln_b=jnp.zeros((1, D), f32),
        # per-layer params stacked over the layer axis
        ln1_g=jnp.ones((L, 1, D), f32), ln1_b=jnp.zeros((L, 1, D), f32),
        q_w=nrm((L, D, D), dtype=bf), q_b=jnp.zeros((L, 1, D), f32),
        k_w=nrm((L, D, D), dtype=bf), k_b=jnp.zeros((L, 1, D), f32),
        v_w=nrm((L, D, D), dtype=bf), v_b=jnp.zeros((L, 1, D), f32),
        o_w=nrm((L, D, D), dtype=bf), o_b=jnp.zeros((L, 1, D), f32),
        ln2_g=jnp.ones((L, 1, D), f32), ln2_b=jnp.zeros((L, 1, D), f32),
        fc1_w=nrm((L, D, 4 * D), dtype=bf), fc1_b=jnp.zeros((L, 1, 4 * D), f32),
        fc2_w=nrm((L, 4 * D, D), dtype=bf), fc2_b=jnp.zeros((L, 1, D), f32),
        post_ln_g=jnp.ones((1, D), f32), post_ln_b=jnp.zeros((1, D), f32),
    )

    mapper = dict(
        ln1_g=jnp.ones((ML, 1, W), f32), ln1_b=jnp.zeros((ML, 1, W), f32),
        qkv_w=nrm((ML, W, 3 * W), dtype=bf), qkv_b=jnp.zeros((ML, 1, 3 * W), f32),
        proj_w=nrm((ML, W, W), dtype=bf), proj_b=jnp.zeros((ML, 1, W), f32),
        ln2_g=jnp.ones((ML, 1, W), f32), ln2_b=jnp.zeros((ML, 1, W), f32),
        fc_w=nrm((ML, W, 4 * W), dtype=bf), fc_b=jnp.zeros((ML, 1, 4 * W), f32),
        cproj_w=nrm((ML, 4 * W, W), dtype=bf), cproj_b=jnp.zeros((ML, 1, W), f32),
        final_ln_g=jnp.ones((1, W), f32), final_ln_b=jnp.zeros((1, W), f32),
        proj_out_w=nrm((W, OUT_DIM), dtype=bf), proj_out_b=jnp.zeros((1, OUT_DIM), f32),
    )
    return dict(clip=clip, mapper=mapper)


# ----------------------------- main ------------------------------------------

if __name__ == "__main__":
    key = jax.random.PRNGKey(0)
    k_img, k_par = jax.random.split(key)

    # layout: NCHW input image, matching the PyTorch module.
    image = jax.random.normal(k_img, (BATCH, C_IN, IMG, IMG), jnp.float32)
    params = init_params(k_par)

    fwd = jax.jit(frozen_clip_image_embedder_only_class)
    z = fwd(image, params)
    jax.block_until_ready(z)

    assert z.shape == (BATCH, 1, OUT_DIM), z.shape
    assert bool(jnp.all(jnp.isfinite(z)))
    print("KERNEL_OK")
</pallas_src>

<mosaic_0001>
module attributes {stable_mosaic.version = 11 : i64} {
  func.func @_clip_tower_kernel(%arg0: memref<8x192xbf16, #tpu.memory_space<vmem>>, %arg1: memref<192x32xbf16, #tpu.memory_space<vmem>>, %arg2: memref<1x32xf32, #tpu.memory_space<vmem>>, %arg3: memref<5x32xf32, #tpu.memory_space<vmem>>, %arg4: memref<1x32xf32, #tpu.memory_space<vmem>>, %arg5: memref<1x32xf32, #tpu.memory_space<vmem>>, %arg6: memref<2x1x32xf32, #tpu.memory_space<vmem>>, %arg7: memref<2x1x32xf32, #tpu.memory_space<vmem>>, %arg8: memref<2x32x32xbf16, #tpu.memory_space<vmem>>, %arg9: memref<2x1x32xf32, #tpu.memory_space<vmem>>, %arg10: memref<2x32x32xbf16, #tpu.memory_space<vmem>>, %arg11: memref<2x1x32xf32, #tpu.memory_space<vmem>>, %arg12: memref<2x32x32xbf16, #tpu.memory_space<vmem>>, %arg13: memref<2x1x32xf32, #tpu.memory_space<vmem>>, %arg14: memref<2x32x32xbf16, #tpu.memory_space<vmem>>, %arg15: memref<2x1x32xf32, #tpu.memory_space<vmem>>, %arg16: memref<2x1x32xf32, #tpu.memory_space<vmem>>, %arg17: memref<2x1x32xf32, #tpu.memory_space<vmem>>, %arg18: memref<2x32x128xbf16, #tpu.memory_space<vmem>>, %arg19: memref<2x1x128xf32, #tpu.memory_space<vmem>>, %arg20: memref<2x128x32xbf16, #tpu.memory_space<vmem>>, %arg21: memref<2x1x32xf32, #tpu.memory_space<vmem>>, %arg22: memref<1x32xf32, #tpu.memory_space<vmem>>, %arg23: memref<1x32xf32, #tpu.memory_space<vmem>>, %arg24: memref<2x32xf32, #tpu.memory_space<vmem>>) attributes {dimension_semantics = [], scalar_prefetch = 0 : i64, scratch_operands = 0 : i64, tpu.core_type = #tpu.core_type<tc>} {
    %c0 = arith.constant 0 : index
    %c0_0 = arith.constant 0 : index
    %0 = vector.load %arg0[%c0, %c0_0] : memref<8x192xbf16, #tpu.memory_space<vmem>>, vector<8x192xbf16>
    %c0_1 = arith.constant 0 : index
    %c0_2 = arith.constant 0 : index
    %1 = vector.load %arg1[%c0_1, %c0_2] : memref<192x32xbf16, #tpu.memory_space<vmem>>, vector<192x32xbf16>
    %cst = arith.constant dense<0.000000e+00> : vector<8x32xf32>
    %2 = tpu.matmul %0, %1, %cst {dimension_numbers = #tpu.dot_dimension_numbers<[1], [0], [0], [1], [0, 0, 1, 1], [], []>} : vector<8x192xbf16>, vector<192x32xbf16>, vector<8x32xf32> -> vector<8x32xf32>
    %c0_3 = arith.constant 0 : index
    %c0_4 = arith.constant 0 : index
    %3 = vector.load %arg2[%c0_3, %c0_4] : memref<1x32xf32, #tpu.memory_space<vmem>>, vector<1x32xf32>
    %c0_5 = arith.constant 0 : index
    %c0_6 = arith.constant 0 : index
    %4 = vector.load %arg3[%c0_5, %c0_6] : memref<5x32xf32, #tpu.memory_space<vmem>>, vector<5x32xf32>
    %5 = vector.extract_strided_slice %4 {offsets = [0, 0], sizes = [1, 32], strides = [1, 1]} : vector<5x32xf32> to vector<1x32xf32>
    %6 = arith.addf %3, %5 : vector<1x32xf32>
    %7 = vector.extract_strided_slice %2 {offsets = [0, 0], sizes = [4, 32], strides = [1, 1]} : vector<8x32xf32> to vector<4x32xf32>
    %8 = vector.extract_strided_slice %4 {offsets = [1, 0], sizes = [4, 32], strides = [1, 1]} : vector<5x32xf32> to vector<4x32xf32>
    %9 = arith.addf %7, %8 : vector<4x32xf32>
    %10 = vector.extract_strided_slice %4 {offsets = [0, 0], sizes = [1, 32], strides = [1, 1]} : vector<5x32xf32> to vector<1x32xf32>
    %11 = arith.addf %3, %10 : vector<1x32xf32>
    %12 = vector.extract_strided_slice %2 {offsets = [4, 0], sizes = [4, 32], strides = [1, 1]} : vector<8x32xf32> to vector<4x32xf32>
    %13 = vector.extract_strided_slice %4 {offsets = [1, 0], sizes = [4, 32], strides = [1, 1]} : vector<5x32xf32> to vector<4x32xf32>
    %14 = arith.addf %12, %13 : vector<4x32xf32>
    %15 = tpu.concatenate %6, %9, %11, %14 in 0 : vector<1x32xf32>, vector<4x32xf32>, vector<1x32xf32>, vector<4x32xf32> -> vector<10x32xf32>
    %c0_7 = arith.constant 0 : index
    %c0_8 = arith.constant 0 : index
    %16 = vector.load %arg4[%c0_7, %c0_8] : memref<1x32xf32, #tpu.memory_space<vmem>>, vector<1x32xf32>
    %c0_9 = arith.constant 0 : index
    %c0_10 = arith.constant 0 : index
    %17 = vector.load %arg5[%c0_9, %c0_10] : memref<1x32xf32, #tpu.memory_space<vmem>>, vector<1x32xf32>
    %cst_11 = arith.constant dense<0.000000e+00> : vector<10xf32>
    %18 = vector.multi_reduction <add>, %15, %cst_11 [1] : vector<10x32xf32> to vector<10xf32>
    %19 = vector.shape_cast %18 : vector<10xf32> to vector<10x1xf32>
    %cst_12 = arith.constant 3.200000e+01 : f32
    %20 = vector.broadcast %cst_12 : f32 to vector<10x1xf32>
    %21 = arith.divf %19, %20 : vector<10x1xf32>
    %22 = vector.broadcast %21 : vector<10x1xf32> to vector<10x32xf32>
    %23 = arith.subf %15, %22 : vector<10x32xf32>
    %24 = arith.mulf %23, %23 : vector<10x32xf32>
    %cst_13 = arith.constant dense<0.000000e+00> : vector<10xf32>
    %25 = vector.multi_reduction <add>, %24, %cst_13 [1] : vector<10x32xf32> to vector<10xf32>
    %26 = vector.shape_cast %25 : vector<10xf32> to vector<10x1xf32>
    %cst_14 = arith.constant 3.200000e+01 : f32
    %27 = vector.broadcast %cst_14 : f32 to vector<10x1xf32>
    %28 = arith.divf %26, %27 : vector<10x1xf32>
    %29 = vector.broadcast %21 : vector<10x1xf32> to vector<10x32xf32>
    %30 = arith.subf %15, %29 : vector<10x32xf32>
    %cst_15 = arith.constant 9.99999974E-6 : f32
    %31 = vector.broadcast %cst_15 : f32 to vector<10x1xf32>
    %32 = arith.addf %28, %31 : vector<10x1xf32>
    %33 = math.rsqrt %32 : vector<10x1xf32>
    %34 = vector.broadcast %33 : vector<10x1xf32> to vector<10x32xf32>
    %35 = arith.mulf %30, %34 : vector<10x32xf32>
    %36 = vector.broadcast %16 : vector<1x32xf32> to vector<10x32xf32>
    %37 = arith.mulf %35, %36 : vector<10x32xf32>
    %38 = vector.broadcast %17 : vector<1x32xf32> to vector<10x32xf32>
    %39 = arith.addf %37, %38 : vector<10x32xf32>
    %c0_16 = arith.constant 0 : index
    %c0_17 = arith.constant 0 : index
    %c0_18 = arith.constant 0 : index
    %40 = vector.load %arg6[%c0_16, %c0_17, %c0_18] : memref<2x1x32xf32, #tpu.memory_space<vmem>>, vector<1x1x32xf32>
    %41 = vector.shape_cast %40 : vector<1x1x32xf32> to vector<1x32xf32>
    %c0_19 = arith.constant 0 : index
    %c0_20 = arith.constant 0 : index
    %c0_21 = arith.constant 0 : index
    %42 = vector.load %arg7[%c0_19, %c0_20, %c0_21] : memref<2x1x32xf32, #tpu.memory_space<vmem>>, vector<1x1x32xf32>
    %43 = vector.shape_cast %42 : vector<1x1x32xf32> to vector<1x32xf32>
    %cst_22 = arith.constant dense<0.000000e+00> : vector<10xf32>
    %44 = vector.multi_reduction <add>, %39, %cst_22 [1] : vector<10x32xf32> to vector<10xf32>
    %45 = vector.shape_cast %44 : vector<10xf32> to vector<10x1xf32>
    %cst_23 = arith.constant 3.200000e+01 : f32
    %46 = vector.broadcast %cst_23 : f32 to vector<10x1xf32>
    %47 = arith.divf %45, %46 : vector<10x1xf32>
    %48 = vector.broadcast %47 : vector<10x1xf32> to vector<10x32xf32>
    %49 = arith.subf %39, %48 : vector<10x32xf32>
    %50 = arith.mulf %49, %49 : vector<10x32xf32>
    %cst_24 = arith.constant dense<0.000000e+00> : vector<10xf32>
    %51 = vector.multi_reduction <add>, %50, %cst_24 [1] : vector<10x32xf32> to vector<10xf32>
    %52 = vector.shape_cast %51 : vector<10xf32> to vector<10x1xf32>
    %cst_25 = arith.constant 3.200000e+01 : f32
    %53 = vector.broadcast %cst_25 : f32 to vector<10x1xf32>
    %54 = arith.divf %52, %53 : vector<10x1xf32>
    %55 = vector.broadcast %47 : vector<10x1xf32> to vector<10x32xf32>
    %56 = arith.subf %39, %55 : vector<10x32xf32>
    %cst_26 = arith.constant 9.99999974E-6 : f32
    %57 = vector.broadcast %cst_26 : f32 to vector<10x1xf32>
    %58 = arith.addf %54, %57 : vector<10x1xf32>
    %59 = math.rsqrt %58 : vector<10x1xf32>
    %60 = vector.broadcast %59 : vector<10x1xf32> to vector<10x32xf32>
    %61 = arith.mulf %56, %60 : vector<10x32xf32>
    %62 = vector.broadcast %41 : vector<1x32xf32> to vector<10x32xf32>
    %63 = arith.mulf %61, %62 : vector<10x32xf32>
    %64 = vector.broadcast %43 : vector<1x32xf32> to vector<10x32xf32>
    %65 = arith.addf %63, %64 : vector<10x32xf32>
    %c0_27 = arith.constant 0 : index
    %c0_28 = arith.constant 0 : index
    %c0_29 = arith.constant 0 : index
    %66 = vector.load %arg8[%c0_27, %c0_28, %c0_29] : memref<2x32x32xbf16, #tpu.memory_space<vmem>>, vector<1x32x32xbf16>
    %67 = vector.shape_cast %66 : vector<1x32x32xbf16> to vector<32x32xbf16>
    %68 = arith.truncf %65 : vector<10x32xf32> to vector<10x32xbf16>
    %cst_30 = arith.constant dense<0.000000e+00> : vector<10x32xf32>
    %69 = tpu.matmul %68, %67, %cst_30 {dimension_numbers = #tpu.dot_dimension_numbers<[1], [0], [0], [1], [0, 0, 1, 1], [], []>} : vector<10x32xbf16>, vector<32x32xbf16>, vector<10x32xf32> -> vector<10x32xf32>
    %c0_31 = arith.constant 0 : index
    %c0_32 = arith.constant 0 : index
    %c0_33 = arith.constant 0 : index
    %70 = vector.load %arg9[%c0_31, %c0_32, %c0_33] : memref<2x1x32xf32, #tpu.memory_space<vmem>>, vector<1x1x32xf32>
    %71 = vector.shape_cast %70 : vector<1x1x32xf32> to vector<1x32xf32>
    %72 = vector.broadcast %71 : vector<1x32xf32> to vector<10x32xf32>
    %73 = arith.addf %69, %72 : vector<10x32xf32>
    %cst_34 = arith.constant 2.500000e-01 : f32
    %74 = vector.broadcast %cst_34 : f32 to vector<10x32xf32>
    %75 = arith.mulf %73, %74 : vector<10x32xf32>
    %c0_35 = arith.constant 0 : index
    %c0_36 = arith.constant 0 : index
    %c0_37 = arith.constant 0 : index
    %76 = vector.load %arg10[%c0_35, %c0_36, %c0_37] : memref<2x32x32xbf16, #tpu.memory_space<vmem>>, vector<1x32x32xbf16>
    %77 = vector.shape_cast %76 : vector<1x32x32xbf16> to vector<32x32xbf16>
    %78 = arith.truncf %65 : vector<10x32xf32> to vector<10x32xbf16>
    %cst_38 = arith.constant dense<0.000000e+00> : vector<10x32xf32>
    %79 = tpu.matmul %78, %77, %cst_38 {dimension_numbers = #tpu.dot_dimension_numbers<[1], [0], [0], [1], [0, 0, 1, 1], [], []>} : vector<10x32xbf16>, vector<32x32xbf16>, vector<10x32xf32> -> vector<10x32xf32>
    %c0_39 = arith.constant 0 : index
    %c0_40 = arith.constant 0 : index
    %c0_41 = arith.constant 0 : index
    %80 = vector.load %arg11[%c0_39, %c0_40, %c0_41] : memref<2x1x32xf32, #tpu.memory_space<vmem>>, vector<1x1x32xf32>
    %81 = vector.shape_cast %80 : vector<1x1x32xf32> to vector<1x32xf32>
    %82 = vector.broadcast %81 : vector<1x32xf32> to vector<10x32xf32>
    %83 = arith.addf %79, %82 : vector<10x32xf32>
    %c0_42 = arith.constant 0 : index
    %c0_43 = arith.constant 0 : index
    %c0_44 = arith.constant 0 : index
    %84 = vector.load %arg12[%c0_42, %c0_43, %c0_44] : memref<2x32x32xbf16, #tpu.memory_space<vmem>>, vector<1x32x32xbf16>
    %85 = vector.shape_cast %84 : vector<1x32x32xbf16> to vector<32x32xbf16>
    %86 = arith.truncf %65 : vector<10x32xf32> to vector<10x32xbf16>
    %cst_45 = arith.constant dense<0.000000e+00> : vector<10x32xf32>
    %87 = tpu.matmul %86, %85, %cst_45 {dimension_numbers = #tpu.dot_dimension_numbers<[1], [0], [0], [1], [0, 0, 1, 1], [], []>} : vector<10x32xbf16>, vector<32x32xbf16>, vector<10x32xf32> -> vector<10x32xf32>
    %c0_46 = arith.constant 0 : index
    %c0_47 = arith.constant 0 : index
    %c0_48 = arith.constant 0 : index
    %88 = vector.load %arg13[%c0_46, %c0_47, %c0_48] : memref<2x1x32xf32, #tpu.memory_space<vmem>>, vector<1x1x32xf32>
    %89 = vector.shape_cast %88 : vector<1x1x32xf32> to vector<1x32xf32>
    %90 = vector.broadcast %89 : vector<1x32xf32> to vector<10x32xf32>
    %91 = arith.addf %87, %90 : vector<10x32xf32>
    %c0_49 = arith.constant 0 : index
    %c0_50 = arith.constant 0 : index
    %c0_51 = arith.constant 0 : index
    %92 = vector.load %arg14[%c0_49, %c0_50, %c0_51] : memref<2x32x32xbf16, #tpu.memory_space<vmem>>, vector<1x32x32xbf16>
    %93 = vector.shape_cast %92 : vector<1x32x32xbf16> to vector<32x32xbf16>
    %94 = vector.extract_strided_slice %75 {offsets = [0, 0], sizes = [5, 16], strides = [1, 1]} : vector<10x32xf32> to vector<5x16xf32>
    %95 = vector.extract_strided_slice %83 {offsets = [0, 0], sizes = [5, 16], strides = [1, 1]} : vector<10x32xf32> to vector<5x16xf32>
    %96 = vector.extract_strided_slice %91 {offsets = [0, 0], sizes = [5, 16], strides = [1, 1]} : vector<10x32xf32> to vector<5x16xf32>
    %cst_52 = arith.constant dense<0.000000e+00> : vector<5x5xf32>
    %97 = tpu.matmul %94, %95, %cst_52 {dimension_numbers = #tpu.dot_dimension_numbers<[1], [1], [0], [0], [0, 0, 1, 0], [], []>} : vector<5x16xf32>, vector<5x16xf32>, vector<5x5xf32> -> vector<5x5xf32>
    %cst_53 = arith.constant dense<0xFF800000> : vector<5xf32>
    %98 = vector.multi_reduction <maximumf>, %97, %cst_53 [1] : vector<5x5xf32> to vector<5xf32>
    %99 = vector.shape_cast %98 : vector<5xf32> to vector<5x1xf32>
    %100 = vector.broadcast %99 : vector<5x1xf32> to vector<5x5xf32>
    %101 = arith.subf %97, %100 : vector<5x5xf32>
    %102 = math.exp %101 : vector<5x5xf32>
    %cst_54 = arith.constant dense<0.000000e+00> : vector<5xf32>
    %103 = vector.multi_reduction <add>, %102, %cst_54 [1] : vector<5x5xf32> to vector<5xf32>
    %104 = vector.shape_cast %103 : vector<5xf32> to vector<5x1xf32>
    %105 = tpu.reciprocal %104 {approx = true} : vector<5x1xf32> -> vector<5x1xf32>
    %106 = vector.broadcast %105 : vector<5x1xf32> to vector<5x5xf32>
    %107 = arith.mulf %102, %106 : vector<5x5xf32>
    %cst_55 = arith.constant dense<0.000000e+00> : vector<5x16xf32>
    %108 = tpu.matmul %107, %96, %cst_55 {dimension_numbers = #tpu.dot_dimension_numbers<[1], [0], [0], [1], [0, 0, 1, 1], [], []>} : vector<5x5xf32>, vector<5x16xf32>, vector<5x16xf32> -> vector<5x16xf32>
    %109 = vector.extract_strided_slice %93 {offsets = [0, 0], sizes = [16, 32], strides = [1, 1]} : vector<32x32xbf16> to vector<16x32xbf16>
    %110 = arith.truncf %108 : vector<5x16xf32> to vector<5x16xbf16>
    %cst_56 = arith.constant dense<0.000000e+00> : vector<5x32xf32>
    %111 = tpu.matmul %110, %109, %cst_56 {dimension_numbers = #tpu.dot_dimension_numbers<[1], [0], [0], [1], [0, 0, 1, 1], [], []>} : vector<5x16xbf16>, vector<16x32xbf16>, vector<5x32xf32> -> vector<5x32xf32>
    %112 = vector.extract_strided_slice %75 {offsets = [0, 16], sizes = [5, 16], strides = [1, 1]} : vector<10x32xf32> to vector<5x16xf32>
    %113 = vector.extract_strided_slice %83 {offsets = [0, 16], sizes = [5, 16], strides = [1, 1]} : vector<10x32xf32> to vector<5x16xf32>
    %114 = vector.extract_strided_slice %91 {offsets = [0, 16], sizes = [5, 16], strides = [1, 1]} : vector<10x32xf32> to vector<5x16xf32>
    %cst_57 = arith.constant dense<0.000000e+00> : vector<5x5xf32>
    %115 = tpu.matmul %112, %113, %cst_57 {dimension_numbers = #tpu.dot_dimension_numbers<[1], [1], [0], [0], [0, 0, 1, 0], [], []>} : vector<5x16xf32>, vector<5x16xf32>, vector<5x5xf32> -> vector<5x5xf32>
    %cst_58 = arith.constant dense<0xFF800000> : vector<5xf32>
    %116 = vector.multi_reduction <maximumf>, %115, %cst_58 [1] : vector<5x5xf32> to vector<5xf32>
    %117 = vector.shape_cast %116 : vector<5xf32> to vector<5x1xf32>
    %118 = vector.broadcast %117 : vector<5x1xf32> to vector<5x5xf32>
    %119 = arith.subf %115, %118 : vector<5x5xf32>
    %120 = math.exp %119 : vector<5x5xf32>
    %cst_59 = arith.constant dense<0.000000e+00> : vector<5xf32>
    %121 = vector.multi_reduction <add>, %120, %cst_59 [1] : vector<5x5xf32> to vector<5xf32>
    %122 = vector.shape_cast %121 : vector<5xf32> to vector<5x1xf32>
    %123 = tpu.reciprocal %122 {approx = true} : vector<5x1xf32> -> vector<5x1xf32>
    %124 = vector.broadcast %123 : vector<5x1xf32> to vector<5x5xf32>
    %125 = arith.mulf %120, %124 : vector<5x5xf32>
    %cst_60 = arith.constant dense<0.000000e+00> : vector<5x16xf32>
    %126 = tpu.matmul %125, %114, %cst_60 {dimension_numbers = #tpu.dot_dimension_numbers<[1], [0], [0], [1], [0, 0, 1, 1], [], []>} : vector<5x5xf32>, vector<5x16xf32>, vector<5x16xf32> -> vector<5x16xf32>
    %127 = vector.extract_strided_slice %93 {offsets = [16, 0], sizes = [16, 32], strides = [1, 1]} : vector<32x32xbf16> to vector<16x32xbf16>
    %128 = arith.truncf %126 : vector<5x16xf32> to vector<5x16xbf16>
    %cst_61 = arith.constant dense<0.000000e+00> : vector<5x32xf32>
    %129 = tpu.matmul %128, %127, %cst_61 {dimension_numbers = #tpu.dot_dimension_numbers<[1], [0], [0], [1], [0, 0, 1, 1], [], []>} : vector<5x16xbf16>, vector<16x32xbf16>, vector<5x32xf32> -> vector<5x32xf32>
    %130 = arith.addf %111, %129 : vector<5x32xf32>
    %131 = vector.extract_strided_slice %75 {offsets = [5, 0], sizes = [5, 16], strides = [1, 1]} : vector<10x32xf32> to vector<5x16xf32>
    %132 = vector.extract_strided_slice %83 {offsets = [5, 0], sizes = [5, 16], strides = [1, 1]} : vector<10x32xf32> to vector<5x16xf32>
    %133 = vector.extract_strided_slice %91 {offsets = [5, 0], sizes = [5, 16], strides = [1, 1]} : vector<10x32xf32> to vector<5x16xf32>
    %cst_62 = arith.constant dense<0.000000e+00> : vector<5x5xf32>
    %134 = tpu.matmul %131, %132, %cst_62 {dimension_numbers = #tpu.dot_dimension_numbers<[1], [1], [0], [0], [0, 0, 1, 0], [], []>} : vector<5x16xf32>, vector<5x16xf32>, vector<5x5xf32> -> vector<5x5xf32>
    %cst_63 = arith.constant dense<0xFF800000> : vector<5xf32>
    %135 = vector.multi_reduction <maximumf>, %134, %cst_63 [1] : vector<5x5xf32> to vector<5xf32>
    %136 = vector.shape_cast %135 : vector<5xf32> to vector<5x1xf32>
    %137 = vector.broadcast %136 : vector<5x1xf32> to vector<5x5xf32>
    %138 = arith.subf %134, %137 : vector<5x5xf32>
    %139 = math.exp %138 : vector<5x5xf32>
    %cst_64 = arith.constant dense<0.000000e+00> : vector<5xf32>
    %140 = vector.multi_reduction <add>, %139, %cst_64 [1] : vector<5x5xf32> to vector<5xf32>
    %141 = vector.shape_cast %140 : vector<5xf32> to vector<5x1xf32>
    %142 = tpu.reciprocal %141 {approx = true} : vector<5x1xf32> -> vector<5x1xf32>
    %143 = vector.broadcast %142 : vector<5x1xf32> to vector<5x5xf32>
    %144 = arith.mulf %139, %143 : vector<5x5xf32>
    %cst_65 = arith.constant dense<0.000000e+00> : vector<5x16xf32>
    %145 = tpu.matmul %144, %133, %cst_65 {dimension_numbers = #tpu.dot_dimension_numbers<[1], [0], [0], [1], [0, 0, 1, 1], [], []>} : vector<5x5xf32>, vector<5x16xf32>, vector<5x16xf32> -> vector<5x16xf32>
    %146 = vector.extract_strided_slice %93 {offsets = [0, 0], sizes = [16, 32], strides = [1, 1]} : vector<32x32xbf16> to vector<16x32xbf16>
    %147 = arith.truncf %145 : vector<5x16xf32> to vector<5x16xbf16>
    %cst_66 = arith.constant dense<0.000000e+00> : vector<5x32xf32>
    %148 = tpu.matmul %147, %146, %cst_66 {dimension_numbers = #tpu.dot_dimension_numbers<[1], [0], [0], [1], [0, 0, 1, 1], [], []>} : vector<5x16xbf16>, vector<16x32xbf16>, vector<5x32xf32> -> vector<5x32xf32>
    %149 = vector.extract_strided_slice %75 {offsets = [5, 16], sizes = [5, 16], strides = [1, 1]} : vector<10x32xf32> to vector<5x16xf32>
    %150 = vector.extract_strided_slice %83 {offsets = [5, 16], sizes = [5, 16], strides = [1, 1]} : vector<10x32xf32> to vector<5x16xf32>
    %151 = vector.extract_strided_slice %91 {offsets = [5, 16], sizes = [5, 16], strides = [1, 1]} : vector<10x32xf32> to vector<5x16xf32>
    %cst_67 = arith.constant dense<0.000000e+00> : vector<5x5xf32>
    %152 = tpu.matmul %149, %150, %cst_67 {dimension_numbers = #tpu.dot_dimension_numbers<[1], [1], [0], [0], [0, 0, 1, 0], [], []>} : vector<5x16xf32>, vector<5x16xf32>, vector<5x5xf32> -> vector<5x5xf32>
    %cst_68 = arith.constant dense<0xFF800000> : vector<5xf32>
    %153 = vector.multi_reduction <maximumf>, %152, %cst_68 [1] : vector<5x5xf32> to vector<5xf32>
    %154 = vector.shape_cast %153 : vector<5xf32> to vector<5x1xf32>
    %155 = vector.broadcast %154 : vector<5x1xf32> to vector<5x5xf32>
    %156 = arith.subf %152, %155 : vector<5x5xf32>
    %157 = math.exp %156 : vector<5x5xf32>
    %cst_69 = arith.constant dense<0.000000e+00> : vector<5xf32>
    %158 = vector.multi_reduction <add>, %157, %cst_69 [1] : vector<5x5xf32> to vector<5xf32>
    %159 = vector.shape_cast %158 : vector<5xf32> to vector<5x1xf32>
    %160 = tpu.reciprocal %159 {approx = true} : vector<5x1xf32> -> vector<5x1xf32>
    %161 = vector.broadcast %160 : vector<5x1xf32> to vector<5x5xf32>
    %162 = arith.mulf %157, %161 : vector<5x5xf32>
    %cst_70 = arith.constant dense<0.000000e+00> : vector<5x16xf32>
    %163 = tpu.matmul %162, %151, %cst_70 {dimension_numbers = #tpu.dot_dimension_numbers<[1], [0], [0], [1], [0, 0, 1, 1], [], []>} : vector<5x5xf32>, vector<5x16xf32>, vector<5x16xf32> -> vector<5x16xf32>
    %164 = vector.extract_strided_slice %93 {offsets = [16, 0], sizes = [16, 32], strides = [1, 1]} : vector<32x32xbf16> to vector<16x32xbf16>
    %165 = arith.truncf %163 : vector<5x16xf32> to vector<5x16xbf16>
    %cst_71 = arith.constant dense<0.000000e+00> : vector<5x32xf32>
    %166 = tpu.matmul %165, %164, %cst_71 {dimension_numbers = #tpu.dot_dimension_numbers<[1], [0], [0], [1], [0, 0, 1, 1], [], []>} : vector<5x16xbf16>, vector<16x32xbf16>, vector<5x32xf32> -> vector<5x32xf32>
    %167 = arith.addf %148, %166 : vector<5x32xf32>
    %168 = tpu.concatenate %130, %167 in 0 : vector<5x32xf32>, vector<5x32xf32> -> vector<10x32xf32>
    %c0_72 = arith.constant 0 : index
    %c0_73 = arith.constant 0 : index
    %c0_74 = arith.constant 0 : index
    %169 = vector.load %arg15[%c0_72, %c0_73, %c0_74] : memref<2x1x32xf32, #tpu.memory_space<vmem>>, vector<1x1x32xf32>
    %170 = vector.shape_cast %169 : vector<1x1x32xf32> to vector<1x32xf32>
    %171 = vector.broadcast %170 : vector<1x32xf32> to vector<10x32xf32>
    %172 = arith.addf %168, %171 : vector<10x32xf32>
    %173 = arith.addf %39, %172 : vector<10x32xf32>
    %c0_75 = arith.constant 0 : index
    %c0_76 = arith.constant 0 : index
    %c0_77 = arith.constant 0 : index
    %174 = vector.load %arg16[%c0_75, %c0_76, %c0_77] : memref<2x1x32xf32, #tpu.memory_space<vmem>>, vector<1x1x32xf32>
    %175 = vector.shape_cast %174 : vector<1x1x32xf32> to vector<1x32xf32>
    %c0_78 = arith.constant 0 : index
    %c0_79 = arith.constant 0 : index
    %c0_80 = arith.constant 0 : index
    %176 = vector.load %arg17[%c0_78, %c0_79, %c0_80] : memref<2x1x32xf32, #tpu.memory_space<vmem>>, vector<1x1x32xf32>
    %177 = vector.shape_cast %176 : vector<1x1x32xf32> to vector<1x32xf32>
    %cst_81 = arith.constant dense<0.000000e+00> : vector<10xf32>
    %178 = vector.multi_reduction <add>, %173, %cst_81 [1] : vector<10x32xf32> to vector<10xf32>
    %179 = vector.shape_cast %178 : vector<10xf32> to vector<10x1xf32>
    %cst_82 = arith.constant 3.200000e+01 : f32
    %180 = vector.broadcast %cst_82 : f32 to vector<10x1xf32>
    %181 = arith.divf %179, %180 : vector<10x1xf32>
    %182 = vector.broadcast %181 : vector<10x1xf32> to vector<10x32xf32>
    %183 = arith.subf %173, %182 : vector<10x32xf32>
    %184 = arith.mulf %183, %183 : vector<10x32xf32>
    %cst_83 = arith.constant dense<0.000000e+00> : vector<10xf32>
    %185 = vector.multi_reduction <add>, %184, %cst_83 [1] : vector<10x32xf32> to vector<10xf32>
    %186 = vector.shape_cast %185 : vector<10xf32> to vector<10x1xf32>
    %cst_84 = arith.constant 3.200000e+01 : f32
    %187 = vector.broadcast %cst_84 : f32 to vector<10x1xf32>
    %188 = arith.divf %186, %187 : vector<10x1xf32>
    %189 = vector.broadcast %181 : vector<10x1xf32> to vector<10x32xf32>
    %190 = arith.subf %173, %189 : vector<10x32xf32>
    %cst_85 = arith.constant 9.99999974E-6 : f32
    %191 = vector.broadcast %cst_85 : f32 to vector<10x1xf32>
    %192 = arith.addf %188, %191 : vector<10x1xf32>
    %193 = math.rsqrt %192 : vector<10x1xf32>
    %194 = vector.broadcast %193 : vector<10x1xf32> to vector<10x32xf32>
    %195 = arith.mulf %190, %194 : vector<10x32xf32>
    %196 = vector.broadcast %175 : vector<1x32xf32> to vector<10x32xf32>
    %197 = arith.mulf %195, %196 : vector<10x32xf32>
    %198 = vector.broadcast %177 : vector<1x32xf32> to vector<10x32xf32>
    %199 = arith.addf %197, %198 : vector<10x32xf32>
    %c0_86 = arith.constant 0 : index
    %c0_87 = arith.constant 0 : index
    %c0_88 = arith.constant 0 : index
    %200 = vector.load %arg18[%c0_86, %c0_87, %c0_88] : memref<2x32x128xbf16, #tpu.memory_space<vmem>>, vector<1x32x128xbf16>
    %201 = vector.shape_cast %200 : vector<1x32x128xbf16> to vector<32x128xbf16>
    %202 = arith.truncf %199 : vector<10x32xf32> to vector<10x32xbf16>
    %cst_89 = arith.constant dense<0.000000e+00> : vector<10x128xf32>
    %203 = tpu.matmul %202, %201, %cst_89 {dimension_numbers = #tpu.dot_dimension_numbers<[1], [0], [0], [1], [0, 0, 1, 1], [], []>} : vector<10x32xbf16>, vector<32x128xbf16>, vector<10x128xf32> -> vector<10x128xf32>
    %c0_90 = arith.constant 0 : index
    %c0_91 = arith.constant 0 : index
    %c0_92 = arith.constant 0 : index
    %204 = vector.load %arg19[%c0_90, %c0_91, %c0_92] : memref<2x1x128xf32, #tpu.memory_space<vmem>>, vector<1x1x128xf32>
    %205 = vector.shape_cast %204 : vector<1x1x128xf32> to vector<1x128xf32>
    %206 = vector.broadcast %205 : vector<1x128xf32> to vector<10x128xf32>
    %207 = arith.addf %203, %206 : vector<10x128xf32>
    %cst_93 = arith.constant 1.702000e+00 : f32
    %208 = vector.broadcast %cst_93 : f32 to vector<10x128xf32>
    %209 = arith.mulf %208, %207 : vector<10x128xf32>
    %210 = arith.negf %209 : vector<10x128xf32>
    %211 = math.exp %210 : vector<10x128xf32>
    %cst_94 = arith.constant 1.000000e+00 : f32
    %212 = vector.broadcast %cst_94 : f32 to vector<10x128xf32>
    %213 = arith.addf %212, %211 : vector<10x128xf32>
    %214 = arith.divf %212, %213 : vector<10x128xf32>
    %215 = arith.mulf %207, %214 : vector<10x128xf32>
    %c0_95 = arith.constant 0 : index
    %c0_96 = arith.constant 0 : index
    %c0_97 = arith.constant 0 : index
    %216 = vector.load %arg20[%c0_95, %c0_96, %c0_97] : memref<2x128x32xbf16, #tpu.memory_space<vmem>>, vector<1x128x32xbf16>
    %217 = vector.shape_cast %216 : vector<1x128x32xbf16> to vector<128x32xbf16>
    %218 = arith.truncf %215 : vector<10x128xf32> to vector<10x128xbf16>
    %cst_98 = arith.constant dense<0.000000e+00> : vector<10x32xf32>
    %219 = tpu.matmul %218, %217, %cst_98 {dimension_numbers = #tpu.dot_dimension_numbers<[1], [0], [0], [1], [0, 0, 1, 1], [], []>} : vector<10x128xbf16>, vector<128x32xbf16>, vector<10x32xf32> -> vector<10x32xf32>
    %c0_99 = arith.constant 0 : index
    %c0_100 = arith.constant 0 : index
    %c0_101 = arith.constant 0 : index
    %220 = vector.load %arg21[%c0_99, %c0_100, %c0_101] : memref<2x1x32xf32, #tpu.memory_space<vmem>>, vector<1x1x32xf32>
    %221 = vector.shape_cast %220 : vector<1x1x32xf32> to vector<1x32xf32>
    %222 = vector.broadcast %221 : vector<1x32xf32> to vector<10x32xf32>
    %223 = arith.addf %219, %222 : vector<10x32xf32>
    %224 = arith.addf %173, %223 : vector<10x32xf32>
    %c1 = arith.constant 1 : index
    %c0_102 = arith.constant 0 : index
    %c0_103 = arith.constant 0 : index
    %225 = vector.load %arg6[%c1, %c0_102, %c0_103] : memref<2x1x32xf32, #tpu.memory_space<vmem>>, vector<1x1x32xf32>
    %226 = vector.shape_cast %225 : vector<1x1x32xf32> to vector<1x32xf32>
    %c1_104 = arith.constant 1 : index
    %c0_105 = arith.constant 0 : index
    %c0_106 = arith.constant 0 : index
    %227 = vector.load %arg7[%c1_104, %c0_105, %c0_106] : memref<2x1x32xf32, #tpu.memory_space<vmem>>, vector<1x1x32xf32>
    %228 = vector.shape_cast %227 : vector<1x1x32xf32> to vector<1x32xf32>
    %cst_107 = arith.constant dense<0.000000e+00> : vector<10xf32>
    %229 = vector.multi_reduction <add>, %224, %cst_107 [1] : vector<10x32xf32> to vector<10xf32>
    %230 = vector.shape_cast %229 : vector<10xf32> to vector<10x1xf32>
    %cst_108 = arith.constant 3.200000e+01 : f32
    %231 = vector.broadcast %cst_108 : f32 to vector<10x1xf32>
    %232 = arith.divf %230, %231 : vector<10x1xf32>
    %233 = vector.broadcast %232 : vector<10x1xf32> to vector<10x32xf32>
    %234 = arith.subf %224, %233 : vector<10x32xf32>
    %235 = arith.mulf %234, %234 : vector<10x32xf32>
    %cst_109 = arith.constant dense<0.000000e+00> : vector<10xf32>
    %236 = vector.multi_reduction <add>, %235, %cst_109 [1] : vector<10x32xf32> to vector<10xf32>
    %237 = vector.shape_cast %236 : vector<10xf32> to vector<10x1xf32>
    %cst_110 = arith.constant 3.200000e+01 : f32
    %238 = vector.broadcast %cst_110 : f32 to vector<10x1xf32>
    %239 = arith.divf %237, %238 : vector<10x1xf32>
    %240 = vector.broadcast %232 : vector<10x1xf32> to vector<10x32xf32>
    %241 = arith.subf %224, %240 : vector<10x32xf32>
    %cst_111 = arith.constant 9.99999974E-6 : f32
    %242 = vector.broadcast %cst_111 : f32 to vector<10x1xf32>
    %243 = arith.addf %239, %242 : vector<10x1xf32>
    %244 = math.rsqrt %243 : vector<10x1xf32>
    %245 = vector.broadcast %244 : vector<10x1xf32> to vector<10x32xf32>
    %246 = arith.mulf %241, %245 : vector<10x32xf32>
    %247 = vector.broadcast %226 : vector<1x32xf32> to vector<10x32xf32>
    %248 = arith.mulf %246, %247 : vector<10x32xf32>
    %249 = vector.broadcast %228 : vector<1x32xf32> to vector<10x32xf32>
    %250 = arith.addf %248, %249 : vector<10x32xf32>
    %c1_112 = arith.constant 1 : index
    %c0_113 = arith.constant 0 : index
    %c0_114 = arith.constant 0 : index
    %251 = vector.load %arg8[%c1_112, %c0_113, %c0_114] : memref<2x32x32xbf16, #tpu.memory_space<vmem>>, vector<1x32x32xbf16>
    %252 = vector.shape_cast %251 : vector<1x32x32xbf16> to vector<32x32xbf16>
    %253 = arith.truncf %250 : vector<10x32xf32> to vector<10x32xbf16>
    %cst_115 = arith.constant dense<0.000000e+00> : vector<10x32xf32>
    %254 = tpu.matmul %253, %252, %cst_115 {dimension_numbers = #tpu.dot_dimension_numbers<[1], [0], [0], [1], [0, 0, 1, 1], [], []>} : vector<10x32xbf16>, vector<32x32xbf16>, vector<10x32xf32> -> vector<10x32xf32>
    %c1_116 = arith.constant 1 : index
    %c0_117 = arith.constant 0 : index
    %c0_118 = arith.constant 0 : index
    %255 = vector.load %arg9[%c1_116, %c0_117, %c0_118] : memref<2x1x32xf32, #tpu.memory_space<vmem>>, vector<1x1x32xf32>
    %256 = vector.shape_cast %255 : vector<1x1x32xf32> to vector<1x32xf32>
    %257 = vector.broadcast %256 : vector<1x32xf32> to vector<10x32xf32>
    %258 = arith.addf %254, %257 : vector<10x32xf32>
    %cst_119 = arith.constant 2.500000e-01 : f32
    %259 = vector.broadcast %cst_119 : f32 to vector<10x32xf32>
    %260 = arith.mulf %258, %259 : vector<10x32xf32>
    %c1_120 = arith.constant 1 : index
    %c0_121 = arith.constant 0 : index
    %c0_122 = arith.constant 0 : index
    %261 = vector.load %arg10[%c1_120, %c0_121, %c0_122] : memref<2x32x32xbf16, #tpu.memory_space<vmem>>, vector<1x32x32xbf16>
    %262 = vector.shape_cast %261 : vector<1x32x32xbf16> to vector<32x32xbf16>
    %263 = arith.truncf %250 : vector<10x32xf32> to vector<10x32xbf16>
    %cst_123 = arith.constant dense<0.000000e+00> : vector<10x32xf32>
    %264 = tpu.matmul %263, %262, %cst_123 {dimension_numbers = #tpu.dot_dimension_numbers<[1], [0], [0], [1], [0, 0, 1, 1], [], []>} : vector<10x32xbf16>, vector<32x32xbf16>, vector<10x32xf32> -> vector<10x32xf32>
    %c1_124 = arith.constant 1 : index
    %c0_125 = arith.constant 0 : index
    %c0_126 = arith.constant 0 : index
    %265 = vector.load %arg11[%c1_124, %c0_125, %c0_126] : memref<2x1x32xf32, #tpu.memory_space<vmem>>, vector<1x1x32xf32>
    %266 = vector.shape_cast %265 : vector<1x1x32xf32> to vector<1x32xf32>
    %267 = vector.broadcast %266 : vector<1x32xf32> to vector<10x32xf32>
    %268 = arith.addf %264, %267 : vector<10x32xf32>
    %c1_127 = arith.constant 1 : index
    %c0_128 = arith.constant 0 : index
    %c0_129 = arith.constant 0 : index
    %269 = vector.load %arg12[%c1_127, %c0_128, %c0_129] : memref<2x32x32xbf16, #tpu.memory_space<vmem>>, vector<1x32x32xbf16>
    %270 = vector.shape_cast %269 : vector<1x32x32xbf16> to vector<32x32xbf16>
    %271 = arith.truncf %250 : vector<10x32xf32> to vector<10x32xbf16>
    %cst_130 = arith.constant dense<0.000000e+00> : vector<10x32xf32>
    %272 = tpu.matmul %271, %270, %cst_130 {dimension_numbers = #tpu.dot_dimension_numbers<[1], [0], [0], [1], [0, 0, 1, 1], [], []>} : vector<10x32xbf16>, vector<32x32xbf16>, vector<10x32xf32> -> vector<10x32xf32>
    %c1_131 = arith.constant 1 : index
    %c0_132 = arith.constant 0 : index
    %c0_133 = arith.constant 0 : index
    %273 = vector.load %arg13[%c1_131, %c0_132, %c0_133] : memref<2x1x32xf32, #tpu.memory_space<vmem>>, vector<1x1x32xf32>
    %274 = vector.shape_cast %273 : vector<1x1x32xf32> to vector<1x32xf32>
    %275 = vector.broadcast %274 : vector<1x32xf32> to vector<10x32xf32>
    %276 = arith.addf %272, %275 : vector<10x32xf32>
    %c1_134 = arith.constant 1 : index
    %c0_135 = arith.constant 0 : index
    %c0_136 = arith.constant 0 : index
    %277 = vector.load %arg14[%c1_134, %c0_135, %c0_136] : memref<2x32x32xbf16, #tpu.memory_space<vmem>>, vector<1x32x32xbf16>
    %278 = vector.shape_cast %277 : vector<1x32x32xbf16> to vector<32x32xbf16>
    %279 = vector.extract_strided_slice %260 {offsets = [0, 0], sizes = [5, 16], strides = [1, 1]} : vector<10x32xf32> to vector<5x16xf32>
    %280 = vector.extract_strided_slice %268 {offsets = [0, 0], sizes = [5, 16], strides = [1, 1]} : vector<10x32xf32> to vector<5x16xf32>
    %281 = vector.extract_strided_slice %276 {offsets = [0, 0], sizes = [5, 16], strides = [1, 1]} : vector<10x32xf32> to vector<5x16xf32>
    %cst_137 = arith.constant dense<0.000000e+00> : vector<5x5xf32>
    %282 = tpu.matmul %279, %280, %cst_137 {dimension_numbers = #tpu.dot_dimension_numbers<[1], [1], [0], [0], [0, 0, 1, 0], [], []>} : vector<5x16xf32>, vector<5x16xf32>, vector<5x5xf32> -> vector<5x5xf32>
    %cst_138 = arith.constant dense<0xFF800000> : vector<5xf32>
    %283 = vector.multi_reduction <maximumf>, %282, %cst_138 [1] : vector<5x5xf32> to vector<5xf32>
    %284 = vector.shape_cast %283 : vector<5xf32> to vector<5x1xf32>
    %285 = vector.broadcast %284 : vector<5x1xf32> to vector<5x5xf32>
    %286 = arith.subf %282, %285 : vector<5x5xf32>
    %287 = math.exp %286 : vector<5x5xf32>
    %cst_139 = arith.constant dense<0.000000e+00> : vector<5xf32>
    %288 = vector.multi_reduction <add>, %287, %cst_139 [1] : vector<5x5xf32> to vector<5xf32>
    %289 = vector.shape_cast %288 : vector<5xf32> to vector<5x1xf32>
    %290 = tpu.reciprocal %289 {approx = true} : vector<5x1xf32> -> vector<5x1xf32>
    %291 = vector.broadcast %290 : vector<5x1xf32> to vector<5x5xf32>
    %292 = arith.mulf %287, %291 : vector<5x5xf32>
    %cst_140 = arith.constant dense<0.000000e+00> : vector<5x16xf32>
    %293 = tpu.matmul %292, %281, %cst_140 {dimension_numbers = #tpu.dot_dimension_numbers<[1], [0], [0], [1], [0, 0, 1, 1], [], []>} : vector<5x5xf32>, vector<5x16xf32>, vector<5x16xf32> -> vector<5x16xf32>
    %294 = vector.extract_strided_slice %278 {offsets = [0, 0], sizes = [16, 32], strides = [1, 1]} : vector<32x32xbf16> to vector<16x32xbf16>
    %295 = arith.truncf %293 : vector<5x16xf32> to vector<5x16xbf16>
    %cst_141 = arith.constant dense<0.000000e+00> : vector<5x32xf32>
    %296 = tpu.matmul %295, %294, %cst_141 {dimension_numbers = #tpu.dot_dimension_numbers<[1], [0], [0], [1], [0, 0, 1, 1], [], []>} : vector<5x16xbf16>, vector<16x32xbf16>, vector<5x32xf32> -> vector<5x32xf32>
    %297 = vector.extract_strided_slice %260 {offsets = [0, 16], sizes = [5, 16], strides = [1, 1]} : vector<10x32xf32> to vector<5x16xf32>
    %298 = vector.extract_strided_slice %268 {offsets = [0, 16], sizes = [5, 16], strides = [1, 1]} : vector<10x32xf32> to vector<5x16xf32>
    %299 = vector.extract_strided_slice %276 {offsets = [0, 16], sizes = [5, 16], strides = [1, 1]} : vector<10x32xf32> to vector<5x16xf32>
    %cst_142 = arith.constant dense<0.000000e+00> : vector<5x5xf32>
    %300 = tpu.matmul %297, %298, %cst_142 {dimension_numbers = #tpu.dot_dimension_numbers<[1], [1], [0], [0], [0, 0, 1, 0], [], []>} : vector<5x16xf32>, vector<5x16xf32>, vector<5x5xf32> -> vector<5x5xf32>
    %cst_143 = arith.constant dense<0xFF800000> : vector<5xf32>
    %301 = vector.multi_reduction <maximumf>, %300, %cst_143 [1] : vector<5x5xf32> to vector<5xf32>
    %302 = vector.shape_cast %301 : vector<5xf32> to vector<5x1xf32>
    %303 = vector.broadcast %302 : vector<5x1xf32> to vector<5x5xf32>
    %304 = arith.subf %300, %303 : vector<5x5xf32>
    %305 = math.exp %304 : vector<5x5xf32>
    %cst_144 = arith.constant dense<0.000000e+00> : vector<5xf32>
    %306 = vector.multi_reduction <add>, %305, %cst_144 [1] : vector<5x5xf32> to vector<5xf32>
    %307 = vector.shape_cast %306 : vector<5xf32> to vector<5x1xf32>
    %308 = tpu.reciprocal %307 {approx = true} : vector<5x1xf32> -> vector<5x1xf32>
    %309 = vector.broadcast %308 : vector<5x1xf32> to vector<5x5xf32>
    %310 = arith.mulf %305, %309 : vector<5x5xf32>
    %cst_145 = arith.constant dense<0.000000e+00> : vector<5x16xf32>
    %311 = tpu.matmul %310, %299, %cst_145 {dimension_numbers = #tpu.dot_dimension_numbers<[1], [0], [0], [1], [0, 0, 1, 1], [], []>} : vector<5x5xf32>, vector<5x16xf32>, vector<5x16xf32> -> vector<5x16xf32>
    %312 = vector.extract_strided_slice %278 {offsets = [16, 0], sizes = [16, 32], strides = [1, 1]} : vector<32x32xbf16> to vector<16x32xbf16>
    %313 = arith.truncf %311 : vector<5x16xf32> to vector<5x16xbf16>
    %cst_146 = arith.constant dense<0.000000e+00> : vector<5x32xf32>
    %314 = tpu.matmul %313, %312, %cst_146 {dimension_numbers = #tpu.dot_dimension_numbers<[1], [0], [0], [1], [0, 0, 1, 1], [], []>} : vector<5x16xbf16>, vector<16x32xbf16>, vector<5x32xf32> -> vector<5x32xf32>
    %315 = arith.addf %296, %314 : vector<5x32xf32>
    %316 = vector.extract_strided_slice %260 {offsets = [5, 0], sizes = [5, 16], strides = [1, 1]} : vector<10x32xf32> to vector<5x16xf32>
    %317 = vector.extract_strided_slice %268 {offsets = [5, 0], sizes = [5, 16], strides = [1, 1]} : vector<10x32xf32> to vector<5x16xf32>
    %318 = vector.extract_strided_slice %276 {offsets = [5, 0], sizes = [5, 16], strides = [1, 1]} : vector<10x32xf32> to vector<5x16xf32>
    %cst_147 = arith.constant dense<0.000000e+00> : vector<5x5xf32>
    %319 = tpu.matmul %316, %317, %cst_147 {dimension_numbers = #tpu.dot_dimension_numbers<[1], [1], [0], [0], [0, 0, 1, 0], [], []>} : vector<5x16xf32>, vector<5x16xf32>, vector<5x5xf32> -> vector<5x5xf32>
    %cst_148 = arith.constant dense<0xFF800000> : vector<5xf32>
    %320 = vector.multi_reduction <maximumf>, %319, %cst_148 [1] : vector<5x5xf32> to vector<5xf32>
    %321 = vector.shape_cast %320 : vector<5xf32> to vector<5x1xf32>
    %322 = vector.broadcast %321 : vector<5x1xf32> to vector<5x5xf32>
    %323 = arith.subf %319, %322 : vector<5x5xf32>
    %324 = math.exp %323 : vector<5x5xf32>
    %cst_149 = arith.constant dense<0.000000e+00> : vector<5xf32>
    %325 = vector.multi_reduction <add>, %324, %cst_149 [1] : vector<5x5xf32> to vector<5xf32>
    %326 = vector.shape_cast %325 : vector<5xf32> to vector<5x1xf32>
    %327 = tpu.reciprocal %326 {approx = true} : vector<5x1xf32> -> vector<5x1xf32>
    %328 = vector.broadcast %327 : vector<5x1xf32> to vector<5x5xf32>
    %329 = arith.mulf %324, %328 : vector<5x5xf32>
    %cst_150 = arith.constant dense<0.000000e+00> : vector<5x16xf32>
    %330 = tpu.matmul %329, %318, %cst_150 {dimension_numbers = #tpu.dot_dimension_numbers<[1], [0], [0], [1], [0, 0, 1, 1], [], []>} : vector<5x5xf32>, vector<5x16xf32>, vector<5x16xf32> -> vector<5x16xf32>
    %331 = vector.extract_strided_slice %278 {offsets = [0, 0], sizes = [16, 32], strides = [1, 1]} : vector<32x32xbf16> to vector<16x32xbf16>
    %332 = arith.truncf %330 : vector<5x16xf32> to vector<5x16xbf16>
    %cst_151 = arith.constant dense<0.000000e+00> : vector<5x32xf32>
    %333 = tpu.matmul %332, %331, %cst_151 {dimension_numbers = #tpu.dot_dimension_numbers<[1], [0], [0], [1], [0, 0, 1, 1], [], []>} : vector<5x16xbf16>, vector<16x32xbf16>, vector<5x32xf32> -> vector<5x32xf32>
    %334 = vector.extract_strided_slice %260 {offsets = [5, 16], sizes = [5, 16], strides = [1, 1]} : vector<10x32xf32> to vector<5x16xf32>
    %335 = vector.extract_strided_slice %268 {offsets = [5, 16], sizes = [5, 16], strides = [1, 1]} : vector<10x32xf32> to vector<5x16xf32>
    %336 = vector.extract_strided_slice %276 {offsets = [5, 16], sizes = [5, 16], strides = [1, 1]} : vector<10x32xf32> to vector<5x16xf32>
    %cst_152 = arith.constant dense<0.000000e+00> : vector<5x5xf32>
    %337 = tpu.matmul %334, %335, %cst_152 {dimension_numbers = #tpu.dot_dimension_numbers<[1], [1], [0], [0], [0, 0, 1, 0], [], []>} : vector<5x16xf32>, vector<5x16xf32>, vector<5x5xf32> -> vector<5x5xf32>
    %cst_153 = arith.constant dense<0xFF800000> : vector<5xf32>
    %338 = vector.multi_reduction <maximumf>, %337, %cst_153 [1] : vector<5x5xf32> to vector<5xf32>
    %339 = vector.shape_cast %338 : vector<5xf32> to vector<5x1xf32>
    %340 = vector.broadcast %339 : vector<5x1xf32> to vector<5x5xf32>
    %341 = arith.subf %337, %340 : vector<5x5xf32>
    %342 = math.exp %341 : vector<5x5xf32>
    %cst_154 = arith.constant dense<0.000000e+00> : vector<5xf32>
    %343 = vector.multi_reduction <add>, %342, %cst_154 [1] : vector<5x5xf32> to vector<5xf32>
    %344 = vector.shape_cast %343 : vector<5xf32> to vector<5x1xf32>
    %345 = tpu.reciprocal %344 {approx = true} : vector<5x1xf32> -> vector<5x1xf32>
    %346 = vector.broadcast %345 : vector<5x1xf32> to vector<5x5xf32>
    %347 = arith.mulf %342, %346 : vector<5x5xf32>
    %cst_155 = arith.constant dense<0.000000e+00> : vector<5x16xf32>
    %348 = tpu.matmul %347, %336, %cst_155 {dimension_numbers = #tpu.dot_dimension_numbers<[1], [0], [0], [1], [0, 0, 1, 1], [], []>} : vector<5x5xf32>, vector<5x16xf32>, vector<5x16xf32> -> vector<5x16xf32>
    %349 = vector.extract_strided_slice %278 {offsets = [16, 0], sizes = [16, 32], strides = [1, 1]} : vector<32x32xbf16> to vector<16x32xbf16>
    %350 = arith.truncf %348 : vector<5x16xf32> to vector<5x16xbf16>
    %cst_156 = arith.constant dense<0.000000e+00> : vector<5x32xf32>
    %351 = tpu.matmul %350, %349, %cst_156 {dimension_numbers = #tpu.dot_dimension_numbers<[1], [0], [0], [1], [0, 0, 1, 1], [], []>} : vector<5x16xbf16>, vector<16x32xbf16>, vector<5x32xf32> -> vector<5x32xf32>
    %352 = arith.addf %333, %351 : vector<5x32xf32>
    %353 = tpu.concatenate %315, %352 in 0 : vector<5x32xf32>, vector<5x32xf32> -> vector<10x32xf32>
    %c1_157 = arith.constant 1 : index
    %c0_158 = arith.constant 0 : index
    %c0_159 = arith.constant 0 : index
    %354 = vector.load %arg15[%c1_157, %c0_158, %c0_159] : memref<2x1x32xf32, #tpu.memory_space<vmem>>, vector<1x1x32xf32>
    %355 = vector.shape_cast %354 : vector<1x1x32xf32> to vector<1x32xf32>
    %356 = vector.broadcast %355 : vector<1x32xf32> to vector<10x32xf32>
    %357 = arith.addf %353, %356 : vector<10x32xf32>
    %358 = arith.addf %224, %357 : vector<10x32xf32>
    %c1_160 = arith.constant 1 : index
    %c0_161 = arith.constant 0 : index
    %c0_162 = arith.constant 0 : index
    %359 = vector.load %arg16[%c1_160, %c0_161, %c0_162] : memref<2x1x32xf32, #tpu.memory_space<vmem>>, vector<1x1x32xf32>
    %360 = vector.shape_cast %359 : vector<1x1x32xf32> to vector<1x32xf32>
    %c1_163 = arith.constant 1 : index
    %c0_164 = arith.constant 0 : index
    %c0_165 = arith.constant 0 : index
    %361 = vector.load %arg17[%c1_163, %c0_164, %c0_165] : memref<2x1x32xf32, #tpu.memory_space<vmem>>, vector<1x1x32xf32>
    %362 = vector.shape_cast %361 : vector<1x1x32xf32> to vector<1x32xf32>
    %cst_166 = arith.constant dense<0.000000e+00> : vector<10xf32>
    %363 = vector.multi_reduction <add>, %358, %cst_166 [1] : vector<10x32xf32> to vector<10xf32>
    %364 = vector.shape_cast %363 : vector<10xf32> to vector<10x1xf32>
    %cst_167 = arith.constant 3.200000e+01 : f32
    %365 = vector.broadcast %cst_167 : f32 to vector<10x1xf32>
    %366 = arith.divf %364, %365 : vector<10x1xf32>
    %367 = vector.broadcast %366 : vector<10x1xf32> to vector<10x32xf32>
    %368 = arith.subf %358, %367 : vector<10x32xf32>
    %369 = arith.mulf %368, %368 : vector<10x32xf32>
    %cst_168 = arith.constant dense<0.000000e+00> : vector<10xf32>
    %370 = vector.multi_reduction <add>, %369, %cst_168 [1] : vector<10x32xf32> to vector<10xf32>
    %371 = vector.shape_cast %370 : vector<10xf32> to vector<10x1xf32>
    %cst_169 = arith.constant 3.200000e+01 : f32
    %372 = vector.broadcast %cst_169 : f32 to vector<10x1xf32>
    %373 = arith.divf %371, %372 : vector<10x1xf32>
    %374 = vector.broadcast %366 : vector<10x1xf32> to vector<10x32xf32>
    %375 = arith.subf %358, %374 : vector<10x32xf32>
    %cst_170 = arith.constant 9.99999974E-6 : f32
    %376 = vector.broadcast %cst_170 : f32 to vector<10x1xf32>
    %377 = arith.addf %373, %376 : vector<10x1xf32>
    %378 = math.rsqrt %377 : vector<10x1xf32>
    %379 = vector.broadcast %378 : vector<10x1xf32> to vector<10x32xf32>
    %380 = arith.mulf %375, %379 : vector<10x32xf32>
    %381 = vector.broadcast %360 : vector<1x32xf32> to vector<10x32xf32>
    %382 = arith.mulf %380, %381 : vector<10x32xf32>
    %383 = vector.broadcast %362 : vector<1x32xf32> to vector<10x32xf32>
    %384 = arith.addf %382, %383 : vector<10x32xf32>
    %c1_171 = arith.constant 1 : index
    %c0_172 = arith.constant 0 : index
    %c0_173 = arith.constant 0 : index
    %385 = vector.load %arg18[%c1_171, %c0_172, %c0_173] : memref<2x32x128xbf16, #tpu.memory_space<vmem>>, vector<1x32x128xbf16>
    %386 = vector.shape_cast %385 : vector<1x32x128xbf16> to vector<32x128xbf16>
    %387 = arith.truncf %384 : vector<10x32xf32> to vector<10x32xbf16>
    %cst_174 = arith.constant dense<0.000000e+00> : vector<10x128xf32>
    %388 = tpu.matmul %387, %386, %cst_174 {dimension_numbers = #tpu.dot_dimension_numbers<[1], [0], [0], [1], [0, 0, 1, 1], [], []>} : vector<10x32xbf16>, vector<32x128xbf16>, vector<10x128xf32> -> vector<10x128xf32>
    %c1_175 = arith.constant 1 : index
    %c0_176 = arith.constant 0 : index
    %c0_177 = arith.constant 0 : index
    %389 = vector.load %arg19[%c1_175, %c0_176, %c0_177] : memref<2x1x128xf32, #tpu.memory_space<vmem>>, vector<1x1x128xf32>
    %390 = vector.shape_cast %389 : vector<1x1x128xf32> to vector<1x128xf32>
    %391 = vector.broadcast %390 : vector<1x128xf32> to vector<10x128xf32>
    %392 = arith.addf %388, %391 : vector<10x128xf32>
    %cst_178 = arith.constant 1.702000e+00 : f32
    %393 = vector.broadcast %cst_178 : f32 to vector<10x128xf32>
    %394 = arith.mulf %393, %392 : vector<10x128xf32>
    %395 = arith.negf %394 : vector<10x128xf32>
    %396 = math.exp %395 : vector<10x128xf32>
    %cst_179 = arith.constant 1.000000e+00 : f32
    %397 = vector.broadcast %cst_179 : f32 to vector<10x128xf32>
    %398 = arith.addf %397, %396 : vector<10x128xf32>
    %399 = arith.divf %397, %398 : vector<10x128xf32>
    %400 = arith.mulf %392, %399 : vector<10x128xf32>
    %c1_180 = arith.constant 1 : index
    %c0_181 = arith.constant 0 : index
    %c0_182 = arith.constant 0 : index
    %401 = vector.load %arg20[%c1_180, %c0_181, %c0_182] : memref<2x128x32xbf16, #tpu.memory_space<vmem>>, vector<1x128x32xbf16>
    %402 = vector.shape_cast %401 : vector<1x128x32xbf16> to vector<128x32xbf16>
    %403 = arith.truncf %400 : vector<10x128xf32> to vector<10x128xbf16>
    %cst_183 = arith.constant dense<0.000000e+00> : vector<10x32xf32>
    %404 = tpu.matmul %403, %402, %cst_183 {dimension_numbers = #tpu.dot_dimension_numbers<[1], [0], [0], [1], [0, 0, 1, 1], [], []>} : vector<10x128xbf16>, vector<128x32xbf16>, vector<10x32xf32> -> vector<10x32xf32>
    %c1_184 = arith.constant 1 : index
    %c0_185 = arith.constant 0 : index
    %c0_186 = arith.constant 0 : index
    %405 = vector.load %arg21[%c1_184, %c0_185, %c0_186] : memref<2x1x32xf32, #tpu.memory_space<vmem>>, vector<1x1x32xf32>
    %406 = vector.shape_cast %405 : vector<1x1x32xf32> to vector<1x32xf32>
    %407 = vector.broadcast %406 : vector<1x32xf32> to vector<10x32xf32>
    %408 = arith.addf %404, %407 : vector<10x32xf32>
    %409 = arith.addf %358, %408 : vector<10x32xf32>
    %410 = vector.extract_strided_slice %409 {offsets = [0, 0], sizes = [1, 32], strides = [1, 1]} : vector<10x32xf32> to vector<1x32xf32>
    %411 = vector.extract_strided_slice %409 {offsets = [5, 0], sizes = [1, 32], strides = [1, 1]} : vector<10x32xf32> to vector<1x32xf32>
    %412 = tpu.concatenate %410, %411 in 0 : vector<1x32xf32>, vector<1x32xf32> -> vector<2x32xf32>
    %c0_187 = arith.constant 0 : index
    %c0_188 = arith.constant 0 : index
    %413 = vector.load %arg22[%c0_187, %c0_188] : memref<1x32xf32, #tpu.memory_space<vmem>>, vector<1x32xf32>
    %c0_189 = arith.constant 0 : index
    %c0_190 = arith.constant 0 : index
    %414 = vector.load %arg23[%c0_189, %c0_190] : memref<1x32xf32, #tpu.memory_space<vmem>>, vector<1x32xf32>
    %cst_191 = arith.constant dense<0.000000e+00> : vector<2xf32>
    %415 = vector.multi_reduction <add>, %412, %cst_191 [1] : vector<2x32xf32> to vector<2xf32>
    %416 = vector.shape_cast %415 : vector<2xf32> to vector<2x1xf32>
    %cst_192 = arith.constant 3.200000e+01 : f32
    %417 = vector.broadcast %cst_192 : f32 to vector<2x1xf32>
    %418 = arith.divf %416, %417 : vector<2x1xf32>
    %419 = vector.broadcast %418 : vector<2x1xf32> to vector<2x32xf32>
    %420 = arith.subf %412, %419 : vector<2x32xf32>
    %421 = arith.mulf %420, %420 : vector<2x32xf32>
    %cst_193 = arith.constant dense<0.000000e+00> : vector<2xf32>
    %422 = vector.multi_reduction <add>, %421, %cst_193 [1] : vector<2x32xf32> to vector<2xf32>
    %423 = vector.shape_cast %422 : vector<2xf32> to vector<2x1xf32>
    %cst_194 = arith.constant 3.200000e+01 : f32
    %424 = vector.broadcast %cst_194 : f32 to vector<2x1xf32>
    %425 = arith.divf %423, %424 : vector<2x1xf32>
    %426 = vector.broadcast %418 : vector<2x1xf32> to vector<2x32xf32>
    %427 = arith.subf %412, %426 : vector<2x32xf32>
    %cst_195 = arith.constant 9.99999974E-6 : f32
    %428 = vector.broadcast %cst_195 : f32 to vector<2x1xf32>
    %429 = arith.addf %425, %428 : vector<2x1xf32>
    %430 = math.rsqrt %429 : vector<2x1xf32>
    %431 = vector.broadcast %430 : vector<2x1xf32> to vector<2x32xf32>
    %432 = arith.mulf %427, %431 : vector<2x32xf32>
    %433 = vector.broadcast %413 : vector<1x32xf32> to vector<2x32xf32>
    %434 = arith.mulf %432, %433 : vector<2x32xf32>
    %435 = vector.broadcast %414 : vector<1x32xf32> to vector<2x32xf32>
    %436 = arith.addf %434, %435 : vector<2x32xf32>
    %c0_196 = arith.constant 0 : index
    %c0_197 = arith.constant 0 : index
    %437 = vector.load %arg24[%c0_196, %c0_197] : memref<2x32xf32, #tpu.memory_space<vmem>>, vector<2x32xf32>
    tpu.vector_store %arg24[%c0_196, %c0_197], %436 {strides = array<i32>} : memref<2x32xf32, #tpu.memory_space<vmem>>, vector<2x32xf32>,
    return
  }
}

module attributes {stable_mosaic.version = 11 : i64} {
  func.func @_mapper_head_kernel(%arg0: memref<2x32xf32, #tpu.memory_space<vmem>>, %arg1: memref<3x1x32xf32, #tpu.memory_space<vmem>>, %arg2: memref<3x1x32xf32, #tpu.memory_space<vmem>>, %arg3: memref<3x32x96xbf16, #tpu.memory_space<vmem>>, %arg4: memref<3x1x96xf32, #tpu.memory_space<vmem>>, %arg5: memref<3x32x32xbf16, #tpu.memory_space<vmem>>, %arg6: memref<3x1x32xf32, #tpu.memory_space<vmem>>, %arg7: memref<3x1x32xf32, #tpu.memory_space<vmem>>, %arg8: memref<3x1x32xf32, #tpu.memory_space<vmem>>, %arg9: memref<3x32x128xbf16, #tpu.memory_space<vmem>>, %arg10: memref<3x1x128xf32, #tpu.memory_space<vmem>>, %arg11: memref<3x128x32xbf16, #tpu.memory_space<vmem>>, %arg12: memref<3x1x32xf32, #tpu.memory_space<vmem>>, %arg13: memref<1x32xf32, #tpu.memory_space<vmem>>, %arg14: memref<1x32xf32, #tpu.memory_space<vmem>>, %arg15: memref<32x24xbf16, #tpu.memory_space<vmem>>, %arg16: memref<1x24xf32, #tpu.memory_space<vmem>>, %arg17: memref<2x24xf32, #tpu.memory_space<vmem>>) attributes {dimension_semantics = [], scalar_prefetch = 0 : i64, scratch_operands = 0 : i64, tpu.core_type = #tpu.core_type<tc>} {
    %c0 = arith.constant 0 : index
    %c0_0 = arith.constant 0 : index
    %0 = vector.load %arg0[%c0, %c0_0] : memref<2x32xf32, #tpu.memory_space<vmem>>, vector<2x32xf32>
    %c0_1 = arith.constant 0 : index
    %c0_2 = arith.constant 0 : index
    %c0_3 = arith.constant 0 : index
    %1 = vector.load %arg1[%c0_1, %c0_2, %c0_3] : memref<3x1x32xf32, #tpu.memory_space<vmem>>, vector<1x1x32xf32>
    %2 = vector.shape_cast %1 : vector<1x1x32xf32> to vector<1x32xf32>
    %c0_4 = arith.constant 0 : index
    %c0_5 = arith.constant 0 : index
    %c0_6 = arith.constant 0 : index
    %3 = vector.load %arg2[%c0_4, %c0_5, %c0_6] : memref<3x1x32xf32, #tpu.memory_space<vmem>>, vector<1x1x32xf32>
    %4 = vector.shape_cast %3 : vector<1x1x32xf32> to vector<1x32xf32>
    %cst = arith.constant dense<0.000000e+00> : vector<2xf32>
    %5 = vector.multi_reduction <add>, %0, %cst [1] : vector<2x32xf32> to vector<2xf32>
    %6 = vector.shape_cast %5 : vector<2xf32> to vector<2x1xf32>
    %cst_7 = arith.constant 3.200000e+01 : f32
    %7 = vector.broadcast %cst_7 : f32 to vector<2x1xf32>
    %8 = arith.divf %6, %7 : vector<2x1xf32>
    %9 = vector.broadcast %8 : vector<2x1xf32> to vector<2x32xf32>
    %10 = arith.subf %0, %9 : vector<2x32xf32>
    %11 = arith.mulf %10, %10 : vector<2x32xf32>
    %cst_8 = arith.constant dense<0.000000e+00> : vector<2xf32>
    %12 = vector.multi_reduction <add>, %11, %cst_8 [1] : vector<2x32xf32> to vector<2xf32>
    %13 = vector.shape_cast %12 : vector<2xf32> to vector<2x1xf32>
    %cst_9 = arith.constant 3.200000e+01 : f32
    %14 = vector.broadcast %cst_9 : f32 to vector<2x1xf32>
    %15 = arith.divf %13, %14 : vector<2x1xf32>
    %16 = vector.broadcast %8 : vector<2x1xf32> to vector<2x32xf32>
    %17 = arith.subf %0, %16 : vector<2x32xf32>
    %cst_10 = arith.constant 9.99999974E-6 : f32
    %18 = vector.broadcast %cst_10 : f32 to vector<2x1xf32>
    %19 = arith.addf %15, %18 : vector<2x1xf32>
    %20 = math.rsqrt %19 : vector<2x1xf32>
    %21 = vector.broadcast %20 : vector<2x1xf32> to vector<2x32xf32>
    %22 = arith.mulf %17, %21 : vector<2x32xf32>
    %23 = vector.broadcast %2 : vector<1x32xf32> to vector<2x32xf32>
    %24 = arith.mulf %22, %23 : vector<2x32xf32>
    %25 = vector.broadcast %4 : vector<1x32xf32> to vector<2x32xf32>
    %26 = arith.addf %24, %25 : vector<2x32xf32>
    %c0_11 = arith.constant 0 : index
    %c0_12 = arith.constant 0 : index
    %c0_13 = arith.constant 0 : index
    %27 = vector.load %arg3[%c0_11, %c0_12, %c0_13] : memref<3x32x96xbf16, #tpu.memory_space<vmem>>, vector<1x32x96xbf16>
    %28 = vector.shape_cast %27 : vector<1x32x96xbf16> to vector<32x96xbf16>
    %29 = arith.truncf %26 : vector<2x32xf32> to vector<2x32xbf16>
    %cst_14 = arith.constant dense<0.000000e+00> : vector<2x96xf32>
    %30 = tpu.matmul %29, %28, %cst_14 {dimension_numbers = #tpu.dot_dimension_numbers<[1], [0], [0], [1], [0, 0, 1, 1], [], []>} : vector<2x32xbf16>, vector<32x96xbf16>, vector<2x96xf32> -> vector<2x96xf32>
    %c0_15 = arith.constant 0 : index
    %c0_16 = arith.constant 0 : index
    %c0_17 = arith.constant 0 : index
    %31 = vector.load %arg4[%c0_15, %c0_16, %c0_17] : memref<3x1x96xf32, #tpu.memory_space<vmem>>, vector<1x1x96xf32>
    %32 = vector.shape_cast %31 : vector<1x1x96xf32> to vector<1x96xf32>
    %33 = vector.broadcast %32 : vector<1x96xf32> to vector<2x96xf32>
    %34 = arith.addf %30, %33 : vector<2x96xf32>
    %35 = vector.extract_strided_slice %34 {offsets = [0, 64], sizes = [2, 32], strides = [1, 1]} : vector<2x96xf32> to vector<2x32xf32>
    %c0_18 = arith.constant 0 : index
    %c0_19 = arith.constant 0 : index
    %c0_20 = arith.constant 0 : index
    %36 = vector.load %arg5[%c0_18, %c0_19, %c0_20] : memref<3x32x32xbf16, #tpu.memory_space<vmem>>, vector<1x32x32xbf16>
    %37 = vector.shape_cast %36 : vector<1x32x32xbf16> to vector<32x32xbf16>
    %38 = arith.truncf %35 : vector<2x32xf32> to vector<2x32xbf16>
    %cst_21 = arith.constant dense<0.000000e+00> : vector<2x32xf32>
    %39 = tpu.matmul %38, %37, %cst_21 {dimension_numbers = #tpu.dot_dimension_numbers<[1], [0], [0], [1], [0, 0, 1, 1], [], []>} : vector<2x32xbf16>, vector<32x32xbf16>, vector<2x32xf32> -> vector<2x32xf32>
    %40 = arith.addf %0, %39 : vector<2x32xf32>
    %c0_22 = arith.constant 0 : index
    %c0_23 = arith.constant 0 : index
    %c0_24 = arith.constant 0 : index
    %41 = vector.load %arg6[%c0_22, %c0_23, %c0_24] : memref<3x1x32xf32, #tpu.memory_space<vmem>>, vector<1x1x32xf32>
    %42 = vector.shape_cast %41 : vector<1x1x32xf32> to vector<1x32xf32>
    %43 = vector.broadcast %42 : vector<1x32xf32> to vector<2x32xf32>
    %44 = arith.addf %40, %43 : vector<2x32xf32>
    %c0_25 = arith.constant 0 : index
    %c0_26 = arith.constant 0 : index
    %c0_27 = arith.constant 0 : index
    %45 = vector.load %arg7[%c0_25, %c0_26, %c0_27] : memref<3x1x32xf32, #tpu.memory_space<vmem>>, vector<1x1x32xf32>
    %46 = vector.shape_cast %45 : vector<1x1x32xf32> to vector<1x32xf32>
    %c0_28 = arith.constant 0 : index
    %c0_29 = arith.constant 0 : index
    %c0_30 = arith.constant 0 : index
    %47 = vector.load %arg8[%c0_28, %c0_29, %c0_30] : memref<3x1x32xf32, #tpu.memory_space<vmem>>, vector<1x1x32xf32>
    %48 = vector.shape_cast %47 : vector<1x1x32xf32> to vector<1x32xf32>
    %cst_31 = arith.constant dense<0.000000e+00> : vector<2xf32>
    %49 = vector.multi_reduction <add>, %44, %cst_31 [1] : vector<2x32xf32> to vector<2xf32>
    %50 = vector.shape_cast %49 : vector<2xf32> to vector<2x1xf32>
    %cst_32 = arith.constant 3.200000e+01 : f32
    %51 = vector.broadcast %cst_32 : f32 to vector<2x1xf32>
    %52 = arith.divf %50, %51 : vector<2x1xf32>
    %53 = vector.broadcast %52 : vector<2x1xf32> to vector<2x32xf32>
    %54 = arith.subf %44, %53 : vector<2x32xf32>
    %55 = arith.mulf %54, %54 : vector<2x32xf32>
    %cst_33 = arith.constant dense<0.000000e+00> : vector<2xf32>
    %56 = vector.multi_reduction <add>, %55, %cst_33 [1] : vector<2x32xf32> to vector<2xf32>
    %57 = vector.shape_cast %56 : vector<2xf32> to vector<2x1xf32>
    %cst_34 = arith.constant 3.200000e+01 : f32
    %58 = vector.broadcast %cst_34 : f32 to vector<2x1xf32>
    %59 = arith.divf %57, %58 : vector<2x1xf32>
    %60 = vector.broadcast %52 : vector<2x1xf32> to vector<2x32xf32>
    %61 = arith.subf %44, %60 : vector<2x32xf32>
    %cst_35 = arith.constant 9.99999974E-6 : f32
    %62 = vector.broadcast %cst_35 : f32 to vector<2x1xf32>
    %63 = arith.addf %59, %62 : vector<2x1xf32>
    %64 = math.rsqrt %63 : vector<2x1xf32>
    %65 = vector.broadcast %64 : vector<2x1xf32> to vector<2x32xf32>
    %66 = arith.mulf %61, %65 : vector<2x32xf32>
    %67 = vector.broadcast %46 : vector<1x32xf32> to vector<2x32xf32>
    %68 = arith.mulf %66, %67 : vector<2x32xf32>
    %69 = vector.broadcast %48 : vector<1x32xf32> to vector<2x32xf32>
    %70 = arith.addf %68, %69 : vector<2x32xf32>
    %c0_36 = arith.constant 0 : index
    %c0_37 = arith.constant 0 : index
    %c0_38 = arith.constant 0 : index
    %71 = vector.load %arg9[%c0_36, %c0_37, %c0_38] : memref<3x32x128xbf16, #tpu.memory_space<vmem>>, vector<1x32x128xbf16>
    %72 = vector.shape_cast %71 : vector<1x32x128xbf16> to vector<32x128xbf16>
    %73 = arith.truncf %70 : vector<2x32xf32> to vector<2x32xbf16>
    %cst_39 = arith.constant dense<0.000000e+00> : vector<2x128xf32>
    %74 = tpu.matmul %73, %72, %cst_39 {dimension_numbers = #tpu.dot_dimension_numbers<[1], [0], [0], [1], [0, 0, 1, 1], [], []>} : vector<2x32xbf16>, vector<32x128xbf16>, vector<2x128xf32> -> vector<2x128xf32>
    %c0_40 = arith.constant 0 : index
    %c0_41 = arith.constant 0 : index
    %c0_42 = arith.constant 0 : index
    %75 = vector.load %arg10[%c0_40, %c0_41, %c0_42] : memref<3x1x128xf32, #tpu.memory_space<vmem>>, vector<1x1x128xf32>
    %76 = vector.shape_cast %75 : vector<1x1x128xf32> to vector<1x128xf32>
    %77 = vector.broadcast %76 : vector<1x128xf32> to vector<2x128xf32>
    %78 = arith.addf %74, %77 : vector<2x128xf32>
    %cst_43 = arith.constant 1.702000e+00 : f32
    %79 = vector.broadcast %cst_43 : f32 to vector<2x128xf32>
    %80 = arith.mulf %79, %78 : vector<2x128xf32>
    %81 = arith.negf %80 : vector<2x128xf32>
    %82 = math.exp %81 : vector<2x128xf32>
    %cst_44 = arith.constant 1.000000e+00 : f32
    %83 = vector.broadcast %cst_44 : f32 to vector<2x128xf32>
    %84 = arith.addf %83, %82 : vector<2x128xf32>
    %85 = arith.divf %83, %84 : vector<2x128xf32>
    %86 = arith.mulf %78, %85 : vector<2x128xf32>
    %c0_45 = arith.constant 0 : index
    %c0_46 = arith.constant 0 : index
    %c0_47 = arith.constant 0 : index
    %87 = vector.load %arg11[%c0_45, %c0_46, %c0_47] : memref<3x128x32xbf16, #tpu.memory_space<vmem>>, vector<1x128x32xbf16>
    %88 = vector.shape_cast %87 : vector<1x128x32xbf16> to vector<128x32xbf16>
    %89 = arith.truncf %86 : vector<2x128xf32> to vector<2x128xbf16>
    %cst_48 = arith.constant dense<0.000000e+00> : vector<2x32xf32>
    %90 = tpu.matmul %89, %88, %cst_48 {dimension_numbers = #tpu.dot_dimension_numbers<[1], [0], [0], [1], [0, 0, 1, 1], [], []>} : vector<2x128xbf16>, vector<128x32xbf16>, vector<2x32xf32> -> vector<2x32xf32>
    %91 = arith.addf %44, %90 : vector<2x32xf32>
    %c0_49 = arith.constant 0 : index
    %c0_50 = arith.constant 0 : index
    %c0_51 = arith.constant 0 : index
    %92 = vector.load %arg12[%c0_49, %c0_50, %c0_51] : memref<3x1x32xf32, #tpu.memory_space<vmem>>, vector<1x1x32xf32>
    %93 = vector.shape_cast %92 : vector<1x1x32xf32> to vector<1x32xf32>
    %94 = vector.broadcast %93 : vector<1x32xf32> to vector<2x32xf32>
    %95 = arith.addf %91, %94 : vector<2x32xf32>
    %c1 = arith.constant 1 : index
    %c0_52 = arith.constant 0 : index
    %c0_53 = arith.constant 0 : index
    %96 = vector.load %arg1[%c1, %c0_52, %c0_53] : memref<3x1x32xf32, #tpu.memory_space<vmem>>, vector<1x1x32xf32>
    %97 = vector.shape_cast %96 : vector<1x1x32xf32> to vector<1x32xf32>
    %c1_54 = arith.constant 1 : index
    %c0_55 = arith.constant 0 : index
    %c0_56 = arith.constant 0 : index
    %98 = vector.load %arg2[%c1_54, %c0_55, %c0_56] : memref<3x1x32xf32, #tpu.memory_space<vmem>>, vector<1x1x32xf32>
    %99 = vector.shape_cast %98 : vector<1x1x32xf32> to vector<1x32xf32>
    %cst_57 = arith.constant dense<0.000000e+00> : vector<2xf32>
    %100 = vector.multi_reduction <add>, %95, %cst_57 [1] : vector<2x32xf32> to vector<2xf32>
    %101 = vector.shape_cast %100 : vector<2xf32> to vector<2x1xf32>
    %cst_58 = arith.constant 3.200000e+01 : f32
    %102 = vector.broadcast %cst_58 : f32 to vector<2x1xf32>
    %103 = arith.divf %101, %102 : vector<2x1xf32>
    %104 = vector.broadcast %103 : vector<2x1xf32> to vector<2x32xf32>
    %105 = arith.subf %95, %104 : vector<2x32xf32>
    %106 = arith.mulf %105, %105 : vector<2x32xf32>
    %cst_59 = arith.constant dense<0.000000e+00> : vector<2xf32>
    %107 = vector.multi_reduction <add>, %106, %cst_59 [1] : vector<2x32xf32> to vector<2xf32>
    %108 = vector.shape_cast %107 : vector<2xf32> to vector<2x1xf32>
    %cst_60 = arith.constant 3.200000e+01 : f32
    %109 = vector.broadcast %cst_60 : f32 to vector<2x1xf32>
    %110 = arith.divf %108, %109 : vector<2x1xf32>
    %111 = vector.broadcast %103 : vector<2x1xf32> to vector<2x32xf32>
    %112 = arith.subf %95, %111 : vector<2x32xf32>
    %cst_61 = arith.constant 9.99999974E-6 : f32
    %113 = vector.broadcast %cst_61 : f32 to vector<2x1xf32>
    %114 = arith.addf %110, %113 : vector<2x1xf32>
    %115 = math.rsqrt %114 : vector<2x1xf32>
    %116 = vector.broadcast %115 : vector<2x1xf32> to vector<2x32xf32>
    %117 = arith.mulf %112, %116 : vector<2x32xf32>
    %118 = vector.broadcast %97 : vector<1x32xf32> to vector<2x32xf32>
    %119 = arith.mulf %117, %118 : vector<2x32xf32>
    %120 = vector.broadcast %99 : vector<1x32xf32> to vector<2x32xf32>
    %121 = arith.addf %119, %120 : vector<2x32xf32>
    %c1_62 = arith.constant 1 : index
    %c0_63 = arith.constant 0 : index
    %c0_64 = arith.constant 0 : index
    %122 = vector.load %arg3[%c1_62, %c0_63, %c0_64] : memref<3x32x96xbf16, #tpu.memory_space<vmem>>, vector<1x32x96xbf16>
    %123 = vector.shape_cast %122 : vector<1x32x96xbf16> to vector<32x96xbf16>
    %124 = arith.truncf %121 : vector<2x32xf32> to vector<2x32xbf16>
    %cst_65 = arith.constant dense<0.000000e+00> : vector<2x96xf32>
    %125 = tpu.matmul %124, %123, %cst_65 {dimension_numbers = #tpu.dot_dimension_numbers<[1], [0], [0], [1], [0, 0, 1, 1], [], []>} : vector<2x32xbf16>, vector<32x96xbf16>, vector<2x96xf32> -> vector<2x96xf32>
    %c1_66 = arith.constant 1 : index
    %c0_67 = arith.constant 0 : index
    %c0_68 = arith.constant 0 : index
    %126 = vector.load %arg4[%c1_66, %c0_67, %c0_68] : memref<3x1x96xf32, #tpu.memory_space<vmem>>, vector<1x1x96xf32>
    %127 = vector.shape_cast %126 : vector<1x1x96xf32> to vector<1x96xf32>
    %128 = vector.broadcast %127 : vector<1x96xf32> to vector<2x96xf32>
    %129 = arith.addf %125, %128 : vector<2x96xf32>
    %130 = vector.extract_strided_slice %129 {offsets = [0, 64], sizes = [2, 32], strides = [1, 1]} : vector<2x96xf32> to vector<2x32xf32>
    %c1_69 = arith.constant 1 : index
    %c0_70 = arith.constant 0 : index
    %c0_71 = arith.constant 0 : index
    %131 = vector.load %arg5[%c1_69, %c0_70, %c0_71] : memref<3x32x32xbf16, #tpu.memory_space<vmem>>, vector<1x32x32xbf16>
    %132 = vector.shape_cast %131 : vector<1x32x32xbf16> to vector<32x32xbf16>
    %133 = arith.truncf %130 : vector<2x32xf32> to vector<2x32xbf16>
    %cst_72 = arith.constant dense<0.000000e+00> : vector<2x32xf32>
    %134 = tpu.matmul %133, %132, %cst_72 {dimension_numbers = #tpu.dot_dimension_numbers<[1], [0], [0], [1], [0, 0, 1, 1], [], []>} : vector<2x32xbf16>, vector<32x32xbf16>, vector<2x32xf32> -> vector<2x32xf32>
    %135 = arith.addf %95, %134 : vector<2x32xf32>
    %c1_73 = arith.constant 1 : index
    %c0_74 = arith.constant 0 : index
    %c0_75 = arith.constant 0 : index
    %136 = vector.load %arg6[%c1_73, %c0_74, %c0_75] : memref<3x1x32xf32, #tpu.memory_space<vmem>>, vector<1x1x32xf32>
    %137 = vector.shape_cast %136 : vector<1x1x32xf32> to vector<1x32xf32>
    %138 = vector.broadcast %137 : vector<1x32xf32> to vector<2x32xf32>
    %139 = arith.addf %135, %138 : vector<2x32xf32>
    %c1_76 = arith.constant 1 : index
    %c0_77 = arith.constant 0 : index
    %c0_78 = arith.constant 0 : index
    %140 = vector.load %arg7[%c1_76, %c0_77, %c0_78] : memref<3x1x32xf32, #tpu.memory_space<vmem>>, vector<1x1x32xf32>
    %141 = vector.shape_cast %140 : vector<1x1x32xf32> to vector<1x32xf32>
    %c1_79 = arith.constant 1 : index
    %c0_80 = arith.constant 0 : index
    %c0_81 = arith.constant 0 : index
    %142 = vector.load %arg8[%c1_79, %c0_80, %c0_81] : memref<3x1x32xf32, #tpu.memory_space<vmem>>, vector<1x1x32xf32>
    %143 = vector.shape_cast %142 : vector<1x1x32xf32> to vector<1x32xf32>
    %cst_82 = arith.constant dense<0.000000e+00> : vector<2xf32>
    %144 = vector.multi_reduction <add>, %139, %cst_82 [1] : vector<2x32xf32> to vector<2xf32>
    %145 = vector.shape_cast %144 : vector<2xf32> to vector<2x1xf32>
    %cst_83 = arith.constant 3.200000e+01 : f32
    %146 = vector.broadcast %cst_83 : f32 to vector<2x1xf32>
    %147 = arith.divf %145, %146 : vector<2x1xf32>
    %148 = vector.broadcast %147 : vector<2x1xf32> to vector<2x32xf32>
    %149 = arith.subf %139, %148 : vector<2x32xf32>
    %150 = arith.mulf %149, %149 : vector<2x32xf32>
    %cst_84 = arith.constant dense<0.000000e+00> : vector<2xf32>
    %151 = vector.multi_reduction <add>, %150, %cst_84 [1] : vector<2x32xf32> to vector<2xf32>
    %152 = vector.shape_cast %151 : vector<2xf32> to vector<2x1xf32>
    %cst_85 = arith.constant 3.200000e+01 : f32
    %153 = vector.broadcast %cst_85 : f32 to vector<2x1xf32>
    %154 = arith.divf %152, %153 : vector<2x1xf32>
    %155 = vector.broadcast %147 : vector<2x1xf32> to vector<2x32xf32>
    %156 = arith.subf %139, %155 : vector<2x32xf32>
    %cst_86 = arith.constant 9.99999974E-6 : f32
    %157 = vector.broadcast %cst_86 : f32 to vector<2x1xf32>
    %158 = arith.addf %154, %157 : vector<2x1xf32>
    %159 = math.rsqrt %158 : vector<2x1xf32>
    %160 = vector.broadcast %159 : vector<2x1xf32> to vector<2x32xf32>
    %161 = arith.mulf %156, %160 : vector<2x32xf32>
    %162 = vector.broadcast %141 : vector<1x32xf32> to vector<2x32xf32>
    %163 = arith.mulf %161, %162 : vector<2x32xf32>
    %164 = vector.broadcast %143 : vector<1x32xf32> to vector<2x32xf32>
    %165 = arith.addf %163, %164 : vector<2x32xf32>
    %c1_87 = arith.constant 1 : index
    %c0_88 = arith.constant 0 : index
    %c0_89 = arith.constant 0 : index
    %166 = vector.load %arg9[%c1_87, %c0_88, %c0_89] : memref<3x32x128xbf16, #tpu.memory_space<vmem>>, vector<1x32x128xbf16>
    %167 = vector.shape_cast %166 : vector<1x32x128xbf16> to vector<32x128xbf16>
    %168 = arith.truncf %165 : vector<2x32xf32> to vector<2x32xbf16>
    %cst_90 = arith.constant dense<0.000000e+00> : vector<2x128xf32>
    %169 = tpu.matmul %168, %167, %cst_90 {dimension_numbers = #tpu.dot_dimension_numbers<[1], [0], [0], [1], [0, 0, 1, 1], [], []>} : vector<2x32xbf16>, vector<32x128xbf16>, vector<2x128xf32> -> vector<2x128xf32>
    %c1_91 = arith.constant 1 : index
    %c0_92 = arith.constant 0 : index
    %c0_93 = arith.constant 0 : index
    %170 = vector.load %arg10[%c1_91, %c0_92, %c0_93] : memref<3x1x128xf32, #tpu.memory_space<vmem>>, vector<1x1x128xf32>
    %171 = vector.shape_cast %170 : vector<1x1x128xf32> to vector<1x128xf32>
    %172 = vector.broadcast %171 : vector<1x128xf32> to vector<2x128xf32>
    %173 = arith.addf %169, %172 : vector<2x128xf32>
    %cst_94 = arith.constant 1.702000e+00 : f32
    %174 = vector.broadcast %cst_94 : f32 to vector<2x128xf32>
    %175 = arith.mulf %174, %173 : vector<2x128xf32>
    %176 = arith.negf %175 : vector<2x128xf32>
    %177 = math.exp %176 : vector<2x128xf32>
    %cst_95 = arith.constant 1.000000e+00 : f32
    %178 = vector.broadcast %cst_95 : f32 to vector<2x128xf32>
    %179 = arith.addf %178, %177 : vector<2x128xf32>
    %180 = arith.divf %178, %179 : vector<2x128xf32>
    %181 = arith.mulf %173, %180 : vector<2x128xf32>
    %c1_96 = arith.constant 1 : index
    %c0_97 = arith.constant 0 : index
    %c0_98 = arith.constant 0 : index
    %182 = vector.load %arg11[%c1_96, %c0_97, %c0_98] : memref<3x128x32xbf16, #tpu.memory_space<vmem>>, vector<1x128x32xbf16>
    %183 = vector.shape_cast %182 : vector<1x128x32xbf16> to vector<128x32xbf16>
    %184 = arith.truncf %181 : vector<2x128xf32> to vector<2x128xbf16>
    %cst_99 = arith.constant dense<0.000000e+00> : vector<2x32xf32>
    %185 = tpu.matmul %184, %183, %cst_99 {dimension_numbers = #tpu.dot_dimension_numbers<[1], [0], [0], [1], [0, 0, 1, 1], [], []>} : vector<2x128xbf16>, vector<128x32xbf16>, vector<2x32xf32> -> vector<2x32xf32>
    %186 = arith.addf %139, %185 : vector<2x32xf32>
    %c1_100 = arith.constant 1 : index
    %c0_101 = arith.constant 0 : index
    %c0_102 = arith.constant 0 : index
    %187 = vector.load %arg12[%c1_100, %c0_101, %c0_102] : memref<3x1x32xf32, #tpu.memory_space<vmem>>, vector<1x1x32xf32>
    %188 = vector.shape_cast %187 : vector<1x1x32xf32> to vector<1x32xf32>
    %189 = vector.broadcast %188 : vector<1x32xf32> to vector<2x32xf32>
    %190 = arith.addf %186, %189 : vector<2x32xf32>
    %c2 = arith.constant 2 : index
    %c0_103 = arith.constant 0 : index
    %c0_104 = arith.constant 0 : index
    %191 = vector.load %arg1[%c2, %c0_103, %c0_104] : memref<3x1x32xf32, #tpu.memory_space<vmem>>, vector<1x1x32xf32>
    %192 = vector.shape_cast %191 : vector<1x1x32xf32> to vector<1x32xf32>
    %c2_105 = arith.constant 2 : index
    %c0_106 = arith.constant 0 : index
    %c0_107 = arith.constant 0 : index
    %193 = vector.load %arg2[%c2_105, %c0_106, %c0_107] : memref<3x1x32xf32, #tpu.memory_space<vmem>>, vector<1x1x32xf32>
    %194 = vector.shape_cast %193 : vector<1x1x32xf32> to vector<1x32xf32>
    %cst_108 = arith.constant dense<0.000000e+00> : vector<2xf32>
    %195 = vector.multi_reduction <add>, %190, %cst_108 [1] : vector<2x32xf32> to vector<2xf32>
    %196 = vector.shape_cast %195 : vector<2xf32> to vector<2x1xf32>
    %cst_109 = arith.constant 3.200000e+01 : f32
    %197 = vector.broadcast %cst_109 : f32 to vector<2x1xf32>
    %198 = arith.divf %196, %197 : vector<2x1xf32>
    %199 = vector.broadcast %198 : vector<2x1xf32> to vector<2x32xf32>
    %200 = arith.subf %190, %199 : vector<2x32xf32>
    %201 = arith.mulf %200, %200 : vector<2x32xf32>
    %cst_110 = arith.constant dense<0.000000e+00> : vector<2xf32>
    %202 = vector.multi_reduction <add>, %201, %cst_110 [1] : vector<2x32xf32> to vector<2xf32>
    %203 = vector.shape_cast %202 : vector<2xf32> to vector<2x1xf32>
    %cst_111 = arith.constant 3.200000e+01 : f32
    %204 = vector.broadcast %cst_111 : f32 to vector<2x1xf32>
    %205 = arith.divf %203, %204 : vector<2x1xf32>
    %206 = vector.broadcast %198 : vector<2x1xf32> to vector<2x32xf32>
    %207 = arith.subf %190, %206 : vector<2x32xf32>
    %cst_112 = arith.constant 9.99999974E-6 : f32
    %208 = vector.broadcast %cst_112 : f32 to vector<2x1xf32>
    %209 = arith.addf %205, %208 : vector<2x1xf32>
    %210 = math.rsqrt %209 : vector<2x1xf32>
    %211 = vector.broadcast %210 : vector<2x1xf32> to vector<2x32xf32>
    %212 = arith.mulf %207, %211 : vector<2x32xf32>
    %213 = vector.broadcast %192 : vector<1x32xf32> to vector<2x32xf32>
    %214 = arith.mulf %212, %213 : vector<2x32xf32>
    %215 = vector.broadcast %194 : vector<1x32xf32> to vector<2x32xf32>
    %216 = arith.addf %214, %215 : vector<2x32xf32>
    %c2_113 = arith.constant 2 : index
    %c0_114 = arith.constant 0 : index
    %c0_115 = arith.constant 0 : index
    %217 = vector.load %arg3[%c2_113, %c0_114, %c0_115] : memref<3x32x96xbf16, #tpu.memory_space<vmem>>, vector<1x32x96xbf16>
    %218 = vector.shape_cast %217 : vector<1x32x96xbf16> to vector<32x96xbf16>
    %219 = arith.truncf %216 : vector<2x32xf32> to vector<2x32xbf16>
    %cst_116 = arith.constant dense<0.000000e+00> : vector<2x96xf32>
    %220 = tpu.matmul %219, %218, %cst_116 {dimension_numbers = #tpu.dot_dimension_numbers<[1], [0], [0], [1], [0, 0, 1, 1], [], []>} : vector<2x32xbf16>, vector<32x96xbf16>, vector<2x96xf32> -> vector<2x96xf32>
    %c2_117 = arith.constant 2 : index
    %c0_118 = arith.constant 0 : index
    %c0_119 = arith.constant 0 : index
    %221 = vector.load %arg4[%c2_117, %c0_118, %c0_119] : memref<3x1x96xf32, #tpu.memory_space<vmem>>, vector<1x1x96xf32>
    %222 = vector.shape_cast %221 : vector<1x1x96xf32> to vector<1x96xf32>
    %223 = vector.broadcast %222 : vector<1x96xf32> to vector<2x96xf32>
    %224 = arith.addf %220, %223 : vector<2x96xf32>
    %225 = vector.extract_strided_slice %224 {offsets = [0, 64], sizes = [2, 32], strides = [1, 1]} : vector<2x96xf32> to vector<2x32xf32>
    %c2_120 = arith.constant 2 : index
    %c0_121 = arith.constant 0 : index
    %c0_122 = arith.constant 0 : index
    %226 = vector.load %arg5[%c2_120, %c0_121, %c0_122] : memref<3x32x32xbf16, #tpu.memory_space<vmem>>, vector<1x32x32xbf16>
    %227 = vector.shape_cast %226 : vector<1x32x32xbf16> to vector<32x32xbf16>
    %228 = arith.truncf %225 : vector<2x32xf32> to vector<2x32xbf16>
    %cst_123 = arith.constant dense<0.000000e+00> : vector<2x32xf32>
    %229 = tpu.matmul %228, %227, %cst_123 {dimension_numbers = #tpu.dot_dimension_numbers<[1], [0], [0], [1], [0, 0, 1, 1], [], []>} : vector<2x32xbf16>, vector<32x32xbf16>, vector<2x32xf32> -> vector<2x32xf32>
    %230 = arith.addf %190, %229 : vector<2x32xf32>
    %c2_124 = arith.constant 2 : index
    %c0_125 = arith.constant 0 : index
    %c0_126 = arith.constant 0 : index
    %231 = vector.load %arg6[%c2_124, %c0_125, %c0_126] : memref<3x1x32xf32, #tpu.memory_space<vmem>>, vector<1x1x32xf32>
    %232 = vector.shape_cast %231 : vector<1x1x32xf32> to vector<1x32xf32>
    %233 = vector.broadcast %232 : vector<1x32xf32> to vector<2x32xf32>
    %234 = arith.addf %230, %233 : vector<2x32xf32>
    %c2_127 = arith.constant 2 : index
    %c0_128 = arith.constant 0 : index
    %c0_129 = arith.constant 0 : index
    %235 = vector.load %arg7[%c2_127, %c0_128, %c0_129] : memref<3x1x32xf32, #tpu.memory_space<vmem>>, vector<1x1x32xf32>
    %236 = vector.shape_cast %235 : vector<1x1x32xf32> to vector<1x32xf32>
    %c2_130 = arith.constant 2 : index
    %c0_131 = arith.constant 0 : index
    %c0_132 = arith.constant 0 : index
    %237 = vector.load %arg8[%c2_130, %c0_131, %c0_132] : memref<3x1x32xf32, #tpu.memory_space<vmem>>, vector<1x1x32xf32>
    %238 = vector.shape_cast %237 : vector<1x1x32xf32> to vector<1x32xf32>
    %cst_133 = arith.constant dense<0.000000e+00> : vector<2xf32>
    %239 = vector.multi_reduction <add>, %234, %cst_133 [1] : vector<2x32xf32> to vector<2xf32>
    %240 = vector.shape_cast %239 : vector<2xf32> to vector<2x1xf32>
    %cst_134 = arith.constant 3.200000e+01 : f32
    %241 = vector.broadcast %cst_134 : f32 to vector<2x1xf32>
    %242 = arith.divf %240, %241 : vector<2x1xf32>
    %243 = vector.broadcast %242 : vector<2x1xf32> to vector<2x32xf32>
    %244 = arith.subf %234, %243 : vector<2x32xf32>
    %245 = arith.mulf %244, %244 : vector<2x32xf32>
    %cst_135 = arith.constant dense<0.000000e+00> : vector<2xf32>
    %246 = vector.multi_reduction <add>, %245, %cst_135 [1] : vector<2x32xf32> to vector<2xf32>
    %247 = vector.shape_cast %246 : vector<2xf32> to vector<2x1xf32>
    %cst_136 = arith.constant 3.200000e+01 : f32
    %248 = vector.broadcast %cst_136 : f32 to vector<2x1xf32>
    %249 = arith.divf %247, %248 : vector<2x1xf32>
    %250 = vector.broadcast %242 : vector<2x1xf32> to vector<2x32xf32>
    %251 = arith.subf %234, %250 : vector<2x32xf32>
    %cst_137 = arith.constant 9.99999974E-6 : f32
    %252 = vector.broadcast %cst_137 : f32 to vector<2x1xf32>
    %253 = arith.addf %249, %252 : vector<2x1xf32>
    %254 = math.rsqrt %253 : vector<2x1xf32>
    %255 = vector.broadcast %254 : vector<2x1xf32> to vector<2x32xf32>
    %256 = arith.mulf %251, %255 : vector<2x32xf32>
    %257 = vector.broadcast %236 : vector<1x32xf32> to vector<2x32xf32>
    %258 = arith.mulf %256, %257 : vector<2x32xf32>
    %259 = vector.broadcast %238 : vector<1x32xf32> to vector<2x32xf32>
    %260 = arith.addf %258, %259 : vector<2x32xf32>
    %c2_138 = arith.constant 2 : index
    %c0_139 = arith.constant 0 : index
    %c0_140 = arith.constant 0 : index
    %261 = vector.load %arg9[%c2_138, %c0_139, %c0_140] : memref<3x32x128xbf16, #tpu.memory_space<vmem>>, vector<1x32x128xbf16>
    %262 = vector.shape_cast %261 : vector<1x32x128xbf16> to vector<32x128xbf16>
    %263 = arith.truncf %260 : vector<2x32xf32> to vector<2x32xbf16>
    %cst_141 = arith.constant dense<0.000000e+00> : vector<2x128xf32>
    %264 = tpu.matmul %263, %262, %cst_141 {dimension_numbers = #tpu.dot_dimension_numbers<[1], [0], [0], [1], [0, 0, 1, 1], [], []>} : vector<2x32xbf16>, vector<32x128xbf16>, vector<2x128xf32> -> vector<2x128xf32>
    %c2_142 = arith.constant 2 : index
    %c0_143 = arith.constant 0 : index
    %c0_144 = arith.constant 0 : index
    %265 = vector.load %arg10[%c2_142, %c0_143, %c0_144] : memref<3x1x128xf32, #tpu.memory_space<vmem>>, vector<1x1x128xf32>
    %266 = vector.shape_cast %265 : vector<1x1x128xf32> to vector<1x128xf32>
    %267 = vector.broadcast %266 : vector<1x128xf32> to vector<2x128xf32>
    %268 = arith.addf %264, %267 : vector<2x128xf32>
    %cst_145 = arith.constant 1.702000e+00 : f32
    %269 = vector.broadcast %cst_145 : f32 to vector<2x128xf32>
    %270 = arith.mulf %269, %268 : vector<2x128xf32>
    %271 = arith.negf %270 : vector<2x128xf32>
    %272 = math.exp %271 : vector<2x128xf32>
    %cst_146 = arith.constant 1.000000e+00 : f32
    %273 = vector.broadcast %cst_146 : f32 to vector<2x128xf32>
    %274 = arith.addf %273, %272 : vector<2x128xf32>
    %275 = arith.divf %273, %274 : vector<2x128xf32>
    %276 = arith.mulf %268, %275 : vector<2x128xf32>
    %c2_147 = arith.constant 2 : index
    %c0_148 = arith.constant 0 : index
    %c0_149 = arith.constant 0 : index
    %277 = vector.load %arg11[%c2_147, %c0_148, %c0_149] : memref<3x128x32xbf16, #tpu.memory_space<vmem>>, vector<1x128x32xbf16>
    %278 = vector.shape_cast %277 : vector<1x128x32xbf16> to vector<128x32xbf16>
    %279 = arith.truncf %276 : vector<2x128xf32> to vector<2x128xbf16>
    %cst_150 = arith.constant dense<0.000000e+00> : vector<2x32xf32>
    %280 = tpu.matmul %279, %278, %cst_150 {dimension_numbers = #tpu.dot_dimension_numbers<[1], [0], [0], [1], [0, 0, 1, 1], [], []>} : vector<2x128xbf16>, vector<128x32xbf16>, vector<2x32xf32> -> vector<2x32xf32>
    %281 = arith.addf %234, %280 : vector<2x32xf32>
    %c2_151 = arith.constant 2 : index
    %c0_152 = arith.constant 0 : index
    %c0_153 = arith.constant 0 : index
    %282 = vector.load %arg12[%c2_151, %c0_152, %c0_153] : memref<3x1x32xf32, #tpu.memory_space<vmem>>, vector<1x1x32xf32>
    %283 = vector.shape_cast %282 : vector<1x1x32xf32> to vector<1x32xf32>
    %284 = vector.broadcast %283 : vector<1x32xf32> to vector<2x32xf32>
    %285 = arith.addf %281, %284 : vector<2x32xf32>
    %c0_154 = arith.constant 0 : index
    %c0_155 = arith.constant 0 : index
    %286 = vector.load %arg13[%c0_154, %c0_155] : memref<1x32xf32, #tpu.memory_space<vmem>>, vector<1x32xf32>
    %c0_156 = arith.constant 0 : index
    %c0_157 = arith.constant 0 : index
    %287 = vector.load %arg14[%c0_156, %c0_157] : memref<1x32xf32, #tpu.memory_space<vmem>>, vector<1x32xf32>
    %cst_158 = arith.constant dense<0.000000e+00> : vector<2xf32>
    %288 = vector.multi_reduction <add>, %285, %cst_158 [1] : vector<2x32xf32> to vector<2xf32>
    %289 = vector.shape_cast %288 : vector<2xf32> to vector<2x1xf32>
    %cst_159 = arith.constant 3.200000e+01 : f32
    %290 = vector.broadcast %cst_159 : f32 to vector<2x1xf32>
    %291 = arith.divf %289, %290 : vector<2x1xf32>
    %292 = vector.broadcast %291 : vector<2x1xf32> to vector<2x32xf32>
    %293 = arith.subf %285, %292 : vector<2x32xf32>
    %294 = arith.mulf %293, %293 : vector<2x32xf32>
    %cst_160 = arith.constant dense<0.000000e+00> : vector<2xf32>
    %295 = vector.multi_reduction <add>, %294, %cst_160 [1] : vector<2x32xf32> to vector<2xf32>
    %296 = vector.shape_cast %295 : vector<2xf32> to vector<2x1xf32>
    %cst_161 = arith.constant 3.200000e+01 : f32
    %297 = vector.broadcast %cst_161 : f32 to vector<2x1xf32>
    %298 = arith.divf %296, %297 : vector<2x1xf32>
    %299 = vector.broadcast %291 : vector<2x1xf32> to vector<2x32xf32>
    %300 = arith.subf %285, %299 : vector<2x32xf32>
    %cst_162 = arith.constant 9.99999974E-6 : f32
    %301 = vector.broadcast %cst_162 : f32 to vector<2x1xf32>
    %302 = arith.addf %298, %301 : vector<2x1xf32>
    %303 = math.rsqrt %302 : vector<2x1xf32>
    %304 = vector.broadcast %303 : vector<2x1xf32> to vector<2x32xf32>
    %305 = arith.mulf %300, %304 : vector<2x32xf32>
    %306 = vector.broadcast %286 : vector<1x32xf32> to vector<2x32xf32>
    %307 = arith.mulf %305, %306 : vector<2x32xf32>
    %308 = vector.broadcast %287 : vector<1x32xf32> to vector<2x32xf32>
    %309 = arith.addf %307, %308 : vector<2x32xf32>
    %c0_163 = arith.constant 0 : index
    %c0_164 = arith.constant 0 : index
    %310 = vector.load %arg15[%c0_163, %c0_164] : memref<32x24xbf16, #tpu.memory_space<vmem>>, vector<32x24xbf16>
    %311 = arith.truncf %309 : vector<2x32xf32> to vector<2x32xbf16>
    %cst_165 = arith.constant dense<0.000000e+00> : vector<2x24xf32>
    %312 = tpu.matmul %311, %310, %cst_165 {dimension_numbers = #tpu.dot_dimension_numbers<[1], [0], [0], [1], [0, 0, 1, 1], [], []>} : vector<2x32xbf16>, vector<32x24xbf16>, vector<2x24xf32> -> vector<2x24xf32>
    %c0_166 = arith.constant 0 : index
    %c0_167 = arith.constant 0 : index
    %313 = vector.load %arg16[%c0_166, %c0_167] : memref<1x24xf32, #tpu.memory_space<vmem>>, vector<1x24xf32>
    %314 = vector.broadcast %313 : vector<1x24xf32> to vector<2x24xf32>
    %315 = arith.addf %312, %314 : vector<2x24xf32>
    %c0_168 = arith.constant 0 : index
    %c0_169 = arith.constant 0 : index
    %316 = vector.load %arg17[%c0_168, %c0_169] : memref<2x24xf32, #tpu.memory_space<vmem>>, vector<2x24xf32>
    tpu.vector_store %arg17[%c0_168, %c0_169], %315 {strides = array<i32>} : memref<2x24xf32, #tpu.memory_space<vmem>>, vector<2x24xf32>,
    return
  }
}

</mosaic_0001>

<bundles_post_ra>
// kernel: frozen_clip_image_embedder_only_class.3
= control target key start
LH: loop header
LB: loop body
LE: loop exit
PB: predicated region body
PF: predicated region fallthrough
CT: control target
= control target key end

     0   :  { %s1793_s0 = inlined_call_operand.vmem [shape: f32[2,32], index: 0, kind: input, shape index: {}]   ;;  %s1794_s1 = inlined_call_operand.vmem [shape: f32[3,1,32], index: 1, kind: input, shape index: {}]   ;;  %s1795_s2 = inlined_call_operand.vmem [shape: f32[3,1,32], index: 2, kind: input, shape index: {}]   ;;  %s1796_s3 = inlined_call_operand.vmem [shape: bf16[3,32,96], index: 3, kind: input, shape index: {}]   ;;  %s1797_s4 = inlined_call_operand.vmem [shape: f32[3,1,96], index: 4, kind: input, shape index: {}]   ;;  %s1798_s5 = inlined_call_operand.vmem [shape: bf16[3,32,32], index: 5, kind: input, shape index: {}]   ;;  %s1799_s6 = inlined_call_operand.vmem [shape: f32[3,1,32], index: 6, kind: input, shape index: {}]   ;;  %s1800_s7 = inlined_call_operand.vmem [shape: f32[3,1,32], index: 7, kind: input, shape index: {}]   ;;  %s1801_s8 = inlined_call_operand.vmem [shape: f32[3,1,32], index: 8, kind: input, shape index: {}]   ;;  %s1802_s9 = inlined_call_operand.vmem [shape: bf16[3,32,128], index: 9, kind: input, shape index: {}]   ;;  %s1803_s10 = inlined_call_operand.vmem [shape: f32[3,1,128], index: 10, kind: input, shape index: {}]   ;;  %s1804_s11 = inlined_call_operand.vmem [shape: bf16[3,128,32], index: 11, kind: input, shape index: {}]   ;;  %s1805_s12 = inlined_call_operand.vmem [shape: f32[3,1,32], index: 12, kind: input, shape index: {}]   ;;  %s1806_s13 = inlined_call_operand.vmem [shape: f32[1,32], index: 13, kind: input, shape index: {}]   ;;  %s1807_s14 = inlined_call_operand.vmem [shape: f32[1,32], index: 14, kind: input, shape index: {}]   ;;  %s1808_s15 = inlined_call_operand.vmem [shape: bf16[32,24], index: 15, kind: input, shape index: {}]   ;;  %s1809_s16 = inlined_call_operand.vmem [shape: f32[1,24], index: 16, kind: input, shape index: {}]   ;;  %s1810_s17 = inlined_call_operand.hbm [shape: f32[2,24], index: 17, kind: output, shape index: {}]  }
   0x1   :  { %1812 = sst [smem:[#allocation5_spill]] %s1793_s0 }
   0x2   :  { %1813 = sst [smem:[#allocation6_spill]] %s1794_s1 }
   0x3   :  { %s1814_s26 = sld [smem:[#allocation5_spill]]  ;;  %vm61_vm0 = vcmask 254976  }
   0x9   :  { %v58_v0 = vld [vmem:[%s1814_s26] sm:$0x3] }
   0xa   :  { %v62_v1 = vsel %vm61_vm0, %v58_v0, 0.0 }
   0xb   :  { %63 = vadd.xlane.f32.xlu0 %v62_v1 }
   0xc   :  { %22 = vsyncpa [#allocation3], 0  ;;  %v1423_v2 = vmov 32.0   ;;  %v1296_v14 = vld [vmem:[%s1796_s3 + $0x8] sm:$0xff]  ;;  %v1295_v15 = vld [vmem:[%s1796_s3] sm:$0xff]  ;;  %s1815_s19 = sld [smem:[#allocation6_spill]] }
   0xd   :  { %1369 = vrcp.f32 %v1423_v2  ;;  %130 = vmatpush.bf16.msra.mxu0 %v1296_v14  ;;  %v1343_v28 = vld [vmem:[%s1795_s2] ss:$0 sm:$0xff]  ;;  %vm120_vm5 = vcmask 261120   ;;  %v1298_v32 = vld [vmem:[%s1798_s5 + $0x8] sm:$0xff]  ;;  %s1424_s27 = smov 64  }
   0xe   :  { %166 = vmatpush.bf16.msra.mxu3 %v1298_v32  ;;  %v1297_v33 = vld [vmem:[%s1798_s5] sm:$0xff]  ;;  %v1300_v51 = vld [vmem:[%s1802_s9 + $0x8] sm:$0xff] }
   0xf   :  { %v1344_v34 = vld [vmem:[%s1797_s4] ss:$0 sm:$0xff]  ;;  %241 = vmatpush.bf16.msra.mxu2 %v1300_v51 }
  0x10   :  { %v1345_v40 = vld [vmem:[%s1799_s6] ss:$0 sm:$0xff] }
  0x11   :  { %131 = vmatpush.bf16.msra.mxu0 %v1295_v15  ;;  %v1299_v52 = vld [vmem:[%s1802_s9] sm:$0xff] }
  0x12   :  { %v1342_v25 = vld [vmem:[%s1815_s19] ss:$0 sm:$0xff]  ;;  %167 = vmatpush.bf16.msra.mxu3 %v1297_v33 }
  0x13   :  { %v1370_v3 = vpop.eup %1369  ;;  %242 = vmatpush.bf16.msra.mxu2 %v1299_v52  ;;  %v1346_v62 = vld [vmem:[%s1800_s7] ss:$0 sm:$0xff] }
  0x14   :  { %v66_v4 = vmul.f32 32.0, %v1370_v3  ;;  %vm70_vm1 = vweird.f32 %v1370_v3  ;;  %v1347_v1 = vld [vmem:[%s1801_s8] ss:$0 sm:$0xff] }
  0x15   :  { %v1301_v15 = vld [vmem:[%s1804_s11] sm:$0xff] }
  0x16   :  { %v67_v5 = vsub.f32 1.0, %v66_v4 }
  0x18   :  { %v68_v6 = vmul.f32 %v1370_v3, %v67_v5  ;;  %v1308_v5 = vld [vmem:[%s1804_s11 + $0x38] sm:$0xff] }
  0x19   :  { %334 = vmatpush.bf16.msrb.mxu3 %v1308_v5 }
  0x1a   :  { %v69_v7 = vadd.f32 %v1370_v3, %v68_v6  ;;  %v1307_v6 = vld [vmem:[%s1804_s11 + $0x30] sm:$0xff] }
  0x1c   :  { %v1520_v8 = vsel %vm70_vm1, %v1370_v3, %v69_v7  ;;  %v1306_v7 = vld [vmem:[%s1804_s11 + $0x28] sm:$0xff] }
  0x1d   :  { %335 = vmatpush.bf16.msrb.mxu3 %v1307_v6 }
  0x21   :  { %336 = vmatpush.bf16.msrb.mxu3 %v1306_v7  ;;  %v1353_v7 = vld [vmem:[%s1799_s6 + $0x1] ss:$0 sm:$0xff] }
  0x7e   :  { %v64_v9 = vpop.xlane.xlu0 %63 }
  0x7f   :  { %v72_v10 = vmul.f32 %v1520_v8, %v64_v9  ;;  %v1305_v9 = vld [vmem:[%s1804_s11 + $0x20] sm:$0xff] }
  0x80   :  { %337 = vmatpush.bf16.msrb.mxu3 %v1305_v9 }
  0x81   :  { %v73_v11 = vsub.f32 %v58_v0, %v72_v10  ;;  %v1304_v10 = vld [vmem:[%s1804_s11 + $0x18] sm:$0xff] }
  0x83   :  { %v74_v12 = vmul.f32 %v73_v11, %v73_v11 }
  0x84   :  { %338 = vmatpush.bf16.msrb.mxu3 %v1304_v10 }
  0x85   :  { %v75_v13 = vsel %vm61_vm0, %v74_v12, 0.0  ;;  %v1302_v12 = vld [vmem:[%s1804_s11 + $0x8] sm:$0xff] }
  0x86   :  { %76 = vadd.xlane.f32.xlu0 %v75_v13  ;;  %v1348_v13 = vld [vmem:[%s1803_s10] ss:$0 sm:$0xff] }
  0xf9   :  { %v77_v16 = vpop.xlane.xlu0 %76 }
  0xfa   :  { %v78_v17 = vmul.f32 %v77_v16, %v1520_v8 }
  0xfc   :  { %v79_v18 = vadd.f32 1e-05, %v78_v17 }
  0xfe   :  { %1371 = vrsqrt.f32 %v79_v18  ;;  %vm86_vm3 = vweird.f32 %v79_v18 }
 0x104   :  { %v1372_v19 = vpop.eup %1371 }
 0x105   :  { %v81_v20 = vmul.f32 %v1372_v19, %v79_v18  ;;  %vm87_vm2 = vweird.f32 %v1372_v19 }
 0x106   :  { %vm88_vm4 = vmor %vm86_vm3, %vm87_vm2 }
 0x107   :  { %v82_v21 = vmul.f32 %v1372_v19, %v81_v20 }
 0x109   :  { %v83_v22 = vmul.f32 0.5, %v82_v21 }
 0x10b   :  { %v84_v23 = vsub.f32 1.5, %v83_v22 }
 0x10d   :  { %v85_v24 = vmul.f32 %v1372_v19, %v84_v23 }
 0x10f   :  { %v89_v26 = vsel %vm88_vm4, %v1372_v19, %v85_v24 }
 0x110   :  { %v90_v27 = vmul.f32 %v89_v26, %v73_v11  ;;  %v1303_v11 = vld [vmem:[%s1804_s11 + $0x10] sm:$0xff] }
 0x111   :  { %339 = vmatpush.bf16.msrb.mxu3 %v1303_v11 }
 0x112   :  { %v94_v29 = vmul.f32 %v1342_v25, %v90_v27 }
 0x114   :  { %v98_v30 = vadd.f32 %v1343_v28, %v94_v29 }
 0x115   :  { %340 = vmatpush.bf16.msrb.mxu3 %v1302_v12 }
 0x116   :  { %v103_v31 = vpack.c.bf16 %v98_v30, %v98_v30 }
 0x118   :  { %1042 = vmatmul.msk.bf16.vlgmr.msra.gmra.mxu0 %vm120_vm5, %v103_v31 }
 0x119   :  { %341 = vmatpush.bf16.msrb.mxu3 %v1301_v15 }
 0x195   :  { %v133_v35 = vpop.f32.mrf.mxu0 }
 0x196   :  { %v134_v36 = vadd.f32 %v1344_v34, %v133_v35  ;;  %v1349_v34 = vld [vmem:[%s1805_s12] ss:$0 sm:$0xff] }
 0x198   :  { %v141_v37 = vpack.c.bf16 %v134_v36, %v134_v36 }
 0x19a   :  { %143 = vrot.lane.b32.xlu1 %v141_v37, %s1424_s27 }
 0x19d   :  { %v135_v38 = vpop.f32.mrf.mxu0 }
 0x20c   :  { %v144_v39 = vpop.permute.xlu1 %143 }
 0x20d   :  { %1051 = vmatmul.msk.bf16.vlgmr.msra.gmra.mxu3 %vm120_vm5, %v144_v39 }
 0x290   :  { %v169_v41 = vpop.f32.mrf.mxu3 }
 0x291   :  { %v173_v42 = vadd.f32 %v169_v41, %v58_v0 }
 0x293   :  { %v1552_v43 = vadd.f32 %v1345_v40, %v173_v42 }
 0x295   :  { %v181_v44 = vsel %vm61_vm0, %v1552_v43, 0.0 }
 0x296   :  { %182 = vadd.xlane.f32.xlu1 %v181_v44 }
 0x298   :  { %v171_v45 = vpop.f32.mrf.mxu3 }
 0x309   :  { %v183_v46 = vpop.xlane.xlu1 %182 }
 0x30a   :  { %v184_v47 = vmul.f32 %v183_v46, %v1520_v8  ;;  %v1310_v46 = vld [vmem:[%s1796_s3 + $0x18] sm:$0xff] }
 0x30b   :  { %419 = vmatpush.bf16.msrb.mxu0 %v1310_v46 }
 0x30c   :  { %v185_v48 = vsub.f32 %v1552_v43, %v184_v47 }
 0x30e   :  { %v186_v49 = vmul.f32 %v185_v48, %v185_v48 }
 0x310   :  { %v187_v50 = vsel %vm61_vm0, %v186_v49, 0.0 }
 0x311   :  { %188 = vadd.xlane.f32.xlu2 %v187_v50 }
 0x384   :  { %v189_v53 = vpop.xlane.xlu2 %188 }
 0x385   :  { %v190_v54 = vmul.f32 %v189_v53, %v1520_v8 }
 0x387   :  { %v191_v55 = vadd.f32 1e-05, %v190_v54 }
 0x389   :  { %1373 = vrsqrt.f32 %v191_v55  ;;  %vm198_vm7 = vweird.f32 %v191_v55 }
 0x38f   :  { %v1374_v56 = vpop.eup %1373 }
 0x390   :  { %v193_v57 = vmul.f32 %v1374_v56, %v191_v55  ;;  %vm199_vm6 = vweird.f32 %v1374_v56 }
 0x391   :  { %vm200_vm8 = vmor %vm198_vm7, %vm199_vm6 }
 0x392   :  { %v194_v58 = vmul.f32 %v1374_v56, %v193_v57 }
 0x394   :  { %v195_v59 = vmul.f32 0.5, %v194_v58 }
 0x396   :  { %v196_v60 = vsub.f32 1.5, %v195_v59  ;;  %v1351_v59 = vld [vmem:[%s1795_s2 + $0x1] ss:$0 sm:$0xff] }
 0x398   :  { %v197_v61 = vmul.f32 %v1374_v56, %v196_v60 }
 0x39a   :  { %v201_v63 = vsel %vm200_vm8, %v1374_v56, %v197_v61  ;;  %v1350_v56 = vld [vmem:[%s1815_s19 + $0x1] ss:$0 sm:$0xff] }
 0x39b   :  { %v202_v0 = vmul.f32 %v201_v63, %v185_v48  ;;  %v1312_v63 = vld [vmem:[%s1798_s5 + $0x18] sm:$0xff] }
 0x39c   :  { %456 = vmatpush.bf16.msra.mxu1 %v1312_v63 }
 0x39d   :  { %v206_v2 = vmul.f32 %v1346_v62, %v202_v0  ;;  %v1311_v0 = vld [vmem:[%s1798_s5 + $0x10] sm:$0xff] }
 0x39f   :  { %v210_v3 = vadd.f32 %v1347_v1, %v206_v2  ;;  %v1352_v1 = vld [vmem:[%s1797_s4 + $0x1] ss:$0 sm:$0xff] }
 0x3a0   :  { %457 = vmatpush.bf16.msra.mxu1 %v1311_v0 }
 0x3a1   :  { %v215_v4 = vpack.c.bf16 %v210_v3, %v210_v3 }
 0x3a3   :  { %1060 = vmatmul.msk.bf16.vlgmr.msra.gmra.mxu2 %vm120_vm5, %v215_v4 }
 0x426   :  { %v244_v14 = vpop.f32.mrf.mxu2 }
 0x427   :  { %v245_v16 = vadd.f32 %v1348_v13, %v244_v14 }
 0x429   :  { %v1061_v17 = vmul.f32 -1.702, %v245_v16 }
 0x42b   :  { %v250_v18 = vmul.f32 1.442695, %v1061_v17 }
 0x42d   :  { %1375 = vpow2.f32 %v250_v18 }
 0x42e   :  { %v246_v19 = vpop.f32.mrf.mxu2 }
 0x42f   :  { %v1314_v19 = vld [vmem:[%s1802_s9 + $0x18] sm:$0xff] }
 0x430   :  { %536 = vmatpush.bf16.msrb.mxu2 %v1314_v19 }
 0x433   :  { %v1376_v20 = vpop.eup %1375 }
 0x434   :  { %v252_v21 = vadd.f32 1.0, %v1376_v20  ;;  %v1313_v20 = vld [vmem:[%s1802_s9 + $0x10] sm:$0xff] }
 0x435   :  { %537 = vmatpush.bf16.msrb.mxu2 %v1313_v20 }
 0x436   :  { %1377 = vrcp.f32 %v252_v21  ;;  %v264_v25 = vand.u32 2147483648, %v252_v21  ;;  %v262_v27 = vand.u32 2147483647, %v252_v21  ;;  %vm258_vm10 = vweird.f32 %v252_v21 }
 0x438   :  { %v265_v29 = vor.u32 1.1754944e-38, %v264_v25  ;;  %vm263_vm12 = vcmp.eq.f32.partialorder %v262_v27, 8.507059e+37 }
 0x43c   :  { %v1378_v22 = vpop.eup %1377 }
 0x43d   :  { %v254_v23 = vmul.f32 %v1378_v22, %v252_v21  ;;  %vm259_vm9 = vweird.f32 %v1378_v22 }
 0x43e   :  { %vm260_vm11 = vmor %vm258_vm10, %vm259_vm9 }
 0x43f   :  { %v255_v24 = vsub.f32 1.0, %v254_v23 }
 0x441   :  { %v256_v26 = vmul.f32 %v1378_v22, %v255_v24 }
 0x443   :  { %v257_v28 = vadd.f32 %v1378_v22, %v256_v26 }
 0x445   :  { %v261_v30 = vsel %vm260_vm11, %v1378_v22, %v257_v28 }
 0x446   :  { %v266_v31 = vsel %vm263_vm12, %v265_v29, %v261_v30  ;;  %v1354_v30 = vld [vmem:[%s1800_s7 + $0x1] ss:$0 sm:$0xff] }
 0x447   :  { %v268_v32 = vmul.f32 %v266_v31, %v245_v16 }
 0x449   :  { %v285_v33 = vpack.c.bf16 %v268_v32, %v268_v32 }
 0x44b   :  { %342 = vmatmul.bf16.vlgmr.msrb.gmra.mxu3 %v285_v33  ;;  %v1355_v33 = vld [vmem:[%s1801_s8 + $0x1] ss:$0 sm:$0xff] }
 0x4ce   :  { %v343_v35 = vpop.f32.mrf.mxu3 }
 0x4cf   :  { %v347_v36 = vadd.f32 %v343_v35, %v1552_v43  ;;  %v1309_v43 = vld [vmem:[%s1796_s3 + $0x10] sm:$0xff] }
 0x4d0   :  { %420 = vmatpush.bf16.msrb.mxu0 %v1309_v43  ;;  %v1315_v43 = vld [vmem:[%s1804_s11 + $0x40] sm:$0xff] }
 0x4d1   :  { %v352_v37 = vadd.f32 %v1349_v34, %v347_v36 }
 0x4d3   :  { %v357_v38 = vsel %vm61_vm0, %v352_v37, 0.0 }
 0x4d4   :  { %358 = vadd.xlane.f32.xlu2 %v357_v38  ;;  %v1321_v38 = vld [vmem:[%s1804_s11 + $0x70] sm:$0xff] }
 0x4d6   :  { %v345_v39 = vpop.f32.mrf.mxu3 }
 0x4d7   :  { %v1320_v39 = vld [vmem:[%s1804_s11 + $0x68] sm:$0xff] }
 0x547   :  { %v359_v40 = vpop.xlane.xlu2 %358 }
 0x548   :  { %v360_v41 = vmul.f32 %v359_v40, %v1520_v8  ;;  %v1319_v40 = vld [vmem:[%s1804_s11 + $0x60] sm:$0xff] }
 0x54a   :  { %v361_v42 = vsub.f32 %v352_v37, %v360_v41  ;;  %v1318_v41 = vld [vmem:[%s1804_s11 + $0x58] sm:$0xff] }
 0x54c   :  { %v362_v44 = vmul.f32 %v361_v42, %v361_v42 }
 0x54e   :  { %v363_v45 = vsel %vm61_vm0, %v362_v44, 0.0  ;;  %v1316_v44 = vld [vmem:[%s1804_s11 + $0x48] sm:$0xff] }
 0x54f   :  { %364 = vadd.xlane.f32.xlu0 %v363_v45  ;;  %v1356_v45 = vld [vmem:[%s1803_s10 + $0x1] ss:$0 sm:$0xff] }
 0x5c2   :  { %v365_v47 = vpop.xlane.xlu0 %364 }
 0x5c3   :  { %v366_v48 = vmul.f32 %v365_v47, %v1520_v8 }
 0x5c5   :  { %v367_v49 = vadd.f32 1e-05, %v366_v48 }
 0x5c7   :  { %1379 = vrsqrt.f32 %v367_v49  ;;  %vm374_vm14 = vweird.f32 %v367_v49 }
 0x5cd   :  { %v1380_v50 = vpop.eup %1379 }
 0x5ce   :  { %v369_v51 = vmul.f32 %v1380_v50, %v367_v49  ;;  %vm375_vm13 = vweird.f32 %v1380_v50 }
 0x5cf   :  { %vm376_vm15 = vmor %vm374_vm14, %vm375_vm13 }
 0x5d0   :  { %v370_v52 = vmul.f32 %v1380_v50, %v369_v51 }
 0x5d2   :  { %v371_v53 = vmul.f32 0.5, %v370_v52 }
 0x5d4   :  { %v372_v54 = vsub.f32 1.5, %v371_v53 }
 0x5d6   :  { %v373_v55 = vmul.f32 %v1380_v50, %v372_v54 }
 0x5d8   :  { %v377_v57 = vsel %vm376_vm15, %v1380_v50, %v373_v55 }
 0x5d9   :  { %v378_v58 = vmul.f32 %v377_v57, %v361_v42  ;;  %v1317_v42 = vld [vmem:[%s1804_s11 + $0x50] sm:$0xff] }
 0x5db   :  { %v382_v60 = vmul.f32 %v1350_v56, %v378_v58 }
 0x5dd   :  { %v386_v61 = vadd.f32 %v1351_v59, %v382_v60 }
 0x5df   :  { %v392_v62 = vpack.c.bf16 %v386_v61, %v386_v61 }
 0x5e1   :  { %1109 = vmatmul.msk.bf16.vlgmr.msrb.gmra.mxu0 %vm120_vm5, %v392_v62 }
 0x65e   :  { %v422_v2 = vpop.f32.mrf.mxu0 }
 0x65f   :  { %v423_v3 = vadd.f32 %v1352_v1, %v422_v2  ;;  %v1357_v1 = vld [vmem:[%s1805_s12 + $0x1] ss:$0 sm:$0xff] }
 0x661   :  { %v431_v4 = vpack.c.bf16 %v423_v3, %v423_v3 }
 0x663   :  { %433 = vrot.lane.b32.xlu2 %v431_v4, %s1424_s27 }
 0x666   :  { %v424_v5 = vpop.f32.mrf.mxu0 }
 0x6bd   :  { %v434_v6 = vpop.permute.xlu2 %433 }
 0x6be   :  { %1122 = vmatmul.msk.bf16.vlgmr.msra.gmra.mxu1 %vm120_vm5, %v434_v6 }
 0x73b   :  { %v459_v9 = vpop.f32.mrf.mxu1 }
 0x73c   :  { %v463_v10 = vadd.f32 %v459_v9, %v352_v37  ;;  %v1322_v37 = vld [vmem:[%s1804_s11 + $0x78] sm:$0xff] }
 0x73d   :  { %630 = vmatpush.bf16.msra.mxu0 %v1322_v37 }
 0x73e   :  { %v1635_v11 = vadd.f32 %v1353_v7, %v463_v10 }
 0x740   :  { %v474_v12 = vsel %vm61_vm0, %v1635_v11, 0.0 }
 0x741   :  { %475 = vadd.xlane.f32.xlu0 %v474_v12  ;;  %631 = vmatpush.bf16.msra.mxu0 %v1321_v38 }
 0x743   :  { %v461_v13 = vpop.f32.mrf.mxu1 }
 0x745   :  { %632 = vmatpush.bf16.msra.mxu0 %v1320_v39  ;;  %v1361_v39 = vld [vmem:[%s1799_s6 + $0x2] ss:$0 sm:$0xff] }
 0x749   :  { %633 = vmatpush.bf16.msra.mxu0 %v1319_v40 }
 0x74d   :  { %634 = vmatpush.bf16.msra.mxu0 %v1318_v41 }
 0x751   :  { %635 = vmatpush.bf16.msra.mxu0 %v1317_v42 }
 0x755   :  { %636 = vmatpush.bf16.msra.mxu0 %v1316_v44 }
 0x759   :  { %637 = vmatpush.bf16.msra.mxu0 %v1315_v43 }
 0x7b4   :  { %v476_v14 = vpop.xlane.xlu0 %475 }
 0x7b5   :  { %v477_v15 = vmul.f32 %v476_v14, %v1520_v8  ;;  %v1324_v14 = vld [vmem:[%s1796_s3 + $0x28] sm:$0xff] }
 0x7b6   :  { %716 = vmatpush.bf16.msrb.mxu1 %v1324_v14 }
 0x7b7   :  { %v478_v16 = vsub.f32 %v1635_v11, %v477_v15 }
 0x7b9   :  { %v479_v17 = vmul.f32 %v478_v16, %v478_v16 }
 0x7bb   :  { %v480_v18 = vsel %vm61_vm0, %v479_v17, 0.0 }
 0x7bc   :  { %481 = vadd.xlane.f32.xlu0 %v480_v18 }
 0x82f   :  { %v482_v21 = vpop.xlane.xlu0 %481 }
 0x830   :  { %v483_v22 = vmul.f32 %v482_v21, %v1520_v8 }
 0x832   :  { %v484_v23 = vadd.f32 1e-05, %v483_v22 }
 0x834   :  { %1381 = vrsqrt.f32 %v484_v23  ;;  %vm491_vm2 = vweird.f32 %v484_v23 }
 0x83a   :  { %v1382_v24 = vpop.eup %1381 }
 0x83b   :  { %v486_v25 = vmul.f32 %v1382_v24, %v484_v23  ;;  %vm492_vm1 = vweird.f32 %v1382_v24 }
 0x83c   :  { %vm493_vm3 = vmor %vm491_vm2, %vm492_vm1 }
 0x83d   :  { %v487_v26 = vmul.f32 %v1382_v24, %v486_v25 }
 0x83f   :  { %v488_v27 = vmul.f32 0.5, %v487_v26 }
 0x841   :  { %v489_v28 = vsub.f32 1.5, %v488_v27  ;;  %v1359_v27 = vld [vmem:[%s1795_s2 + $0x2] ss:$0 sm:$0xff] }
 0x843   :  { %v490_v29 = vmul.f32 %v1382_v24, %v489_v28 }
 0x845   :  { %v494_v31 = vsel %vm493_vm3, %v1382_v24, %v490_v29  ;;  %v1358_v24 = vld [vmem:[%s1815_s19 + $0x2] ss:$0 sm:$0xff] }
 0x846   :  { %v495_v32 = vmul.f32 %v494_v31, %v478_v16  ;;  %v1326_v31 = vld [vmem:[%s1798_s5 + $0x28] sm:$0xff] }
 0x847   :  { %753 = vmatpush.bf16.msra.mxu2 %v1326_v31 }
 0x848   :  { %v499_v34 = vmul.f32 %v1354_v30, %v495_v32  ;;  %v1325_v32 = vld [vmem:[%s1798_s5 + $0x20] sm:$0xff] }
 0x84a   :  { %v503_v35 = vadd.f32 %v1355_v33, %v499_v34  ;;  %v1360_v33 = vld [vmem:[%s1797_s4 + $0x2] ss:$0 sm:$0xff] }
 0x84b   :  { %754 = vmatpush.bf16.msra.mxu2 %v1325_v32 }
 0x84c   :  { %v509_v36 = vpack.c.bf16 %v503_v35, %v503_v35 }
 0x84e   :  { %1139 = vmatmul.msk.bf16.vlgmr.msrb.gmra.mxu2 %vm120_vm5, %v509_v36 }
 0x8d1   :  { %v539_v46 = vpop.f32.mrf.mxu2 }
 0x8d2   :  { %v540_v47 = vadd.f32 %v1356_v45, %v539_v46 }
 0x8d4   :  { %v1140_v48 = vmul.f32 -1.702, %v540_v47 }
 0x8d6   :  { %v545_v49 = vmul.f32 1.442695, %v1140_v48 }
 0x8d8   :  { %1383 = vpow2.f32 %v545_v49 }
 0x8d9   :  { %v541_v50 = vpop.f32.mrf.mxu2 }
 0x8da   :  { %v1328_v50 = vld [vmem:[%s1802_s9 + $0x28] sm:$0xff] }
 0x8db   :  { %833 = vmatpush.bf16.msra.mxu3 %v1328_v50 }
 0x8de   :  { %v1384_v51 = vpop.eup %1383 }
 0x8df   :  { %v547_v52 = vadd.f32 1.0, %v1384_v51  ;;  %v1327_v51 = vld [vmem:[%s1802_s9 + $0x20] sm:$0xff] }
 0x8e0   :  { %834 = vmatpush.bf16.msra.mxu3 %v1327_v51 }
 0x8e1   :  { %1385 = vrcp.f32 %v547_v52  ;;  %v559_v56 = vand.u32 2147483648, %v547_v52  ;;  %v557_v58 = vand.u32 2147483647, %v547_v52  ;;  %vm553_vm6 = vweird.f32 %v547_v52 }
 0x8e3   :  { %v560_v60 = vor.u32 1.1754944e-38, %v559_v56  ;;  %vm558_vm8 = vcmp.eq.f32.partialorder %v557_v58, 8.507059e+37 }
 0x8e7   :  { %v1386_v53 = vpop.eup %1385 }
 0x8e8   :  { %v549_v54 = vmul.f32 %v1386_v53, %v547_v52  ;;  %vm554_vm4 = vweird.f32 %v1386_v53 }
 0x8e9   :  { %vm555_vm7 = vmor %vm553_vm6, %vm554_vm4 }
 0x8ea   :  { %v550_v55 = vsub.f32 1.0, %v549_v54 }
 0x8ec   :  { %v551_v57 = vmul.f32 %v1386_v53, %v550_v55 }
 0x8ee   :  { %v552_v59 = vadd.f32 %v1386_v53, %v551_v57 }
 0x8f0   :  { %v556_v61 = vsel %vm555_vm7, %v1386_v53, %v552_v59  ;;  %vm1016_vm7 = vcmask 189440  }
 0x8f1   :  { %v561_v62 = vsel %vm558_vm8, %v560_v60, %v556_v61  ;;  %v1362_v61 = vld [vmem:[%s1800_s7 + $0x2] ss:$0 sm:$0xff] }
 0x8f2   :  { %v563_v63 = vmul.f32 %v561_v62, %v540_v47 }
 0x8f4   :  { %v581_v0 = vpack.c.bf16 %v563_v63, %v563_v63 }
 0x8f6   :  { %638 = vmatmul.bf16.vlgmr.msra.gmra.mxu0 %v581_v0  ;;  %v1363_v0 = vld [vmem:[%s1801_s8 + $0x2] ss:$0 sm:$0xff]  ;;  %s1025_s8 = sshll.u32 %s1810_s17, 4  ;;  %s1026_s8 = int_to_ptr.hbm [resolvable:$true] %s1025_s8 }
 0x973   :  { %v639_v2 = vpop.f32.mrf.mxu0 }
 0x974   :  { %v643_v3 = vadd.f32 %v639_v2, %v1635_v11  ;;  %v1323_v11 = vld [vmem:[%s1796_s3 + $0x20] sm:$0xff]  ;;  %s1425_s3 = smov [#allocation2]  }
 0x975   :  { %717 = vmatpush.bf16.msrb.mxu1 %v1323_v11  ;;  %v1329_v11 = vld [vmem:[%s1804_s11 + $0x80] sm:$0xff]  ;;  %s1023_s7 = sshll.u32 %s1425_s3, 4  ;;  %s1024_s7 = int_to_ptr.vmem [resolvable:$true] %s1023_s7 }
 0x976   :  { %v649_v4 = vadd.f32 %v1357_v1, %v643_v3 }
 0x978   :  { %v654_v5 = vsel %vm61_vm0, %v649_v4, 0.0 }
 0x979   :  { %655 = vadd.xlane.f32.xlu0 %v654_v5  ;;  %v1335_v5 = vld [vmem:[%s1804_s11 + $0xb0] sm:$0xff] }
 0x97b   :  { %v641_v6 = vpop.f32.mrf.mxu0 }
 0x97c   :  { %v1334_v6 = vld [vmem:[%s1804_s11 + $0xa8] sm:$0xff] }
 0x9ec   :  { %v656_v7 = vpop.xlane.xlu0 %655 }
 0x9ed   :  { %v657_v9 = vmul.f32 %v656_v7, %v1520_v8  ;;  %v1333_v7 = vld [vmem:[%s1804_s11 + $0xa0] sm:$0xff] }
 0x9ef   :  { %v658_v10 = vsub.f32 %v649_v4, %v657_v9  ;;  %v1332_v9 = vld [vmem:[%s1804_s11 + $0x98] sm:$0xff] }
 0x9f1   :  { %v659_v12 = vmul.f32 %v658_v10, %v658_v10 }
 0x9f3   :  { %v660_v13 = vsel %vm61_vm0, %v659_v12, 0.0  ;;  %v1330_v12 = vld [vmem:[%s1804_s11 + $0x88] sm:$0xff] }
 0x9f4   :  { %661 = vadd.xlane.f32.xlu2 %v660_v13  ;;  %v1364_v13 = vld [vmem:[%s1803_s10 + $0x2] ss:$0 sm:$0xff] }
 0xa67   :  { %v662_v15 = vpop.xlane.xlu2 %661 }
 0xa68   :  { %v663_v16 = vmul.f32 %v662_v15, %v1520_v8 }
 0xa6a   :  { %v664_v17 = vadd.f32 1e-05, %v663_v16 }
 0xa6c   :  { %1387 = vrsqrt.f32 %v664_v17  ;;  %vm671_vm10 = vweird.f32 %v664_v17 }
 0xa72   :  { %v1388_v18 = vpop.eup %1387 }
 0xa73   :  { %v666_v19 = vmul.f32 %v1388_v18, %v664_v17  ;;  %vm672_vm9 = vweird.f32 %v1388_v18 }
 0xa74   :  { %vm673_vm11 = vmor %vm671_vm10, %vm672_vm9 }
 0xa75   :  { %v667_v20 = vmul.f32 %v1388_v18, %v666_v19 }
 0xa77   :  { %v668_v21 = vmul.f32 0.5, %v667_v20 }
 0xa79   :  { %v669_v22 = vsub.f32 1.5, %v668_v21 }
 0xa7b   :  { %v670_v23 = vmul.f32 %v1388_v18, %v669_v22 }
 0xa7d   :  { %v674_v25 = vsel %vm673_vm11, %v1388_v18, %v670_v23 }
 0xa7e   :  { %v675_v26 = vmul.f32 %v674_v25, %v658_v10  ;;  %v1331_v10 = vld [vmem:[%s1804_s11 + $0x90] sm:$0xff] }
 0xa80   :  { %v679_v28 = vmul.f32 %v1358_v24, %v675_v26 }
 0xa82   :  { %v683_v29 = vadd.f32 %v1359_v27, %v679_v28 }
 0xa84   :  { %v689_v30 = vpack.c.bf16 %v683_v29, %v683_v29 }
 0xa86   :  { %1205 = vmatmul.msk.bf16.vlgmr.msrb.gmra.mxu1 %vm120_vm5, %v689_v30 }
 0xb03   :  { %v719_v34 = vpop.f32.mrf.mxu1 }
 0xb04   :  { %v720_v35 = vadd.f32 %v1360_v33, %v719_v34  ;;  %v1365_v33 = vld [vmem:[%s1805_s12 + $0x2] ss:$0 sm:$0xff] }
 0xb06   :  { %v728_v36 = vpack.c.bf16 %v720_v35, %v720_v35 }
 0xb08   :  { %730 = vrot.lane.b32.xlu0 %v728_v36, %s1424_s27 }
 0xb0b   :  { %v721_v37 = vpop.f32.mrf.mxu1 }
 0xb7a   :  { %v731_v38 = vpop.permute.xlu0 %730 }
 0xb7b   :  { %1218 = vmatmul.msk.bf16.vlgmr.msra.gmra.mxu2 %vm120_vm5, %v731_v38 }
 0xbfe   :  { %v756_v40 = vpop.f32.mrf.mxu2 }
 0xbff   :  { %v760_v41 = vadd.f32 %v756_v40, %v649_v4  ;;  %v1336_v4 = vld [vmem:[%s1804_s11 + $0xb8] sm:$0xff] }
 0xc00   :  { %927 = vmatpush.bf16.msra.mxu1 %v1336_v4 }
 0xc01   :  { %v1718_v42 = vadd.f32 %v1361_v39, %v760_v41 }
 0xc03   :  { %v771_v44 = vsel %vm61_vm0, %v1718_v42, 0.0 }
 0xc04   :  { %772 = vadd.xlane.f32.xlu1 %v771_v44  ;;  %928 = vmatpush.bf16.msra.mxu1 %v1335_v5 }
 0xc06   :  { %v758_v45 = vpop.f32.mrf.mxu2 }
 0xc08   :  { %929 = vmatpush.bf16.msra.mxu1 %v1334_v6 }
 0xc0c   :  { %930 = vmatpush.bf16.msra.mxu1 %v1333_v7 }
 0xc10   :  { %931 = vmatpush.bf16.msra.mxu1 %v1332_v9 }
 0xc14   :  { %932 = vmatpush.bf16.msra.mxu1 %v1331_v10 }
 0xc18   :  { %933 = vmatpush.bf16.msra.mxu1 %v1330_v12 }
 0xc1c   :  { %934 = vmatpush.bf16.msra.mxu1 %v1329_v11 }
 0xc77   :  { %v773_v46 = vpop.xlane.xlu1 %772 }
 0xc78   :  { %v774_v43 = vmul.f32 %v773_v46, %v1520_v8  ;;  %v1338_v46 = vld [vmem:[%s1808_s15 + $0x8] sm:$0xff] }
 0xc79   :  { %1009 = vmatpush.bf16.msrb.mxu2 %v1338_v46 }
 0xc7a   :  { %v775_v47 = vsub.f32 %v1718_v42, %v774_v43 }
 0xc7c   :  { %v776_v48 = vmul.f32 %v775_v47, %v775_v47 }
 0xc7e   :  { %v777_v49 = vsel %vm61_vm0, %v776_v48, 0.0 }
 0xc7f   :  { %778 = vadd.xlane.f32.xlu1 %v777_v49 }
 0xcf2   :  { %v779_v52 = vpop.xlane.xlu1 %778 }
 0xcf3   :  { %v780_v53 = vmul.f32 %v779_v52, %v1520_v8 }
 0xcf5   :  { %v781_v54 = vadd.f32 1e-05, %v780_v53 }
 0xcf7   :  { %1389 = vrsqrt.f32 %v781_v54  ;;  %vm788_vm13 = vweird.f32 %v781_v54 }
 0xcfd   :  { %v1390_v55 = vpop.eup %1389 }
 0xcfe   :  { %v783_v56 = vmul.f32 %v1390_v55, %v781_v54  ;;  %vm789_vm12 = vweird.f32 %v1390_v55 }
 0xcff   :  { %vm790_vm14 = vmor %vm788_vm13, %vm789_vm12 }
 0xd00   :  { %v784_v57 = vmul.f32 %v1390_v55, %v783_v56 }
 0xd02   :  { %v785_v58 = vmul.f32 0.5, %v784_v57 }
 0xd04   :  { %v786_v59 = vsub.f32 1.5, %v785_v58 }
 0xd06   :  { %v787_v60 = vmul.f32 %v1390_v55, %v786_v59 }
 0xd08   :  { %v791_v62 = vsel %vm790_vm14, %v1390_v55, %v787_v60  ;;  %v1366_v55 = vld [vmem:[%s1806_s13] ss:$0 sm:$0xff] }
 0xd09   :  { %v792_v63 = vmul.f32 %v791_v62, %v775_v47 }
 0xd0b   :  { %v796_v1 = vmul.f32 %v1362_v61, %v792_v63  ;;  %v1368_v61 = vld [vmem:[%s1809_s16] ss:$0 sm:$0xff] }
 0xd0d   :  { %v800_v2 = vadd.f32 %v1363_v0, %v796_v1 }
 0xd0f   :  { %v806_v3 = vpack.c.bf16 %v800_v2, %v800_v2 }
 0xd11   :  { %1235 = vmatmul.msk.bf16.vlgmr.msra.gmra.mxu3 %vm120_vm5, %v806_v3 }
 0xd94   :  { %v836_v14 = vpop.f32.mrf.mxu3 }
 0xd95   :  { %v837_v15 = vadd.f32 %v1364_v13, %v836_v14 }
 0xd97   :  { %v1236_v16 = vmul.f32 -1.702, %v837_v15 }
 0xd99   :  { %v842_v17 = vmul.f32 1.442695, %v1236_v16 }
 0xd9b   :  { %1391 = vpow2.f32 %v842_v17 }
 0xd9c   :  { %v838_v18 = vpop.f32.mrf.mxu3 }
 0xda1   :  { %v1392_v19 = vpop.eup %1391 }
 0xda2   :  { %v844_v20 = vadd.f32 1.0, %v1392_v19 }
 0xda4   :  { %1393 = vrcp.f32 %v844_v20  ;;  %v856_v24 = vand.u32 2147483648, %v844_v20  ;;  %v854_v26 = vand.u32 2147483647, %v844_v20  ;;  %vm850_vm1 = vweird.f32 %v844_v20 }
 0xda6   :  { %v857_v28 = vor.u32 1.1754944e-38, %v856_v24  ;;  %vm855_vm3 = vcmp.eq.f32.partialorder %v854_v26, 8.507059e+37 }
 0xdaa   :  { %v1394_v21 = vpop.eup %1393 }
 0xdab   :  { %v846_v22 = vmul.f32 %v1394_v21, %v844_v20  ;;  %vm851_vm15 = vweird.f32 %v1394_v21 }
 0xdac   :  { %vm852_vm2 = vmor %vm850_vm1, %vm851_vm15 }
 0xdad   :  { %v847_v23 = vsub.f32 1.0, %v846_v22 }
 0xdaf   :  { %v848_v25 = vmul.f32 %v1394_v21, %v847_v23 }
 0xdb1   :  { %v849_v27 = vadd.f32 %v1394_v21, %v848_v25 }
 0xdb3   :  { %v853_v29 = vsel %vm852_vm2, %v1394_v21, %v849_v27 }
 0xdb4   :  { %v858_v30 = vsel %vm855_vm3, %v857_v28, %v853_v29 }
 0xdb5   :  { %v860_v31 = vmul.f32 %v858_v30, %v837_v15 }
 0xdb7   :  { %v878_v32 = vpack.c.bf16 %v860_v31, %v860_v31 }
 0xdb9   :  { %935 = vmatmul.bf16.vlgmr.msra.gmra.mxu1 %v878_v32 }
 0xe36   :  { %v936_v34 = vpop.f32.mrf.mxu1 }
 0xe37   :  { %v940_v35 = vadd.f32 %v936_v34, %v1718_v42  ;;  %v1337_v42 = vld [vmem:[%s1808_s15] sm:$0xff] }
 0xe38   :  { %1010 = vmatpush.bf16.msrb.mxu2 %v1337_v42 }
 0xe39   :  { %v946_v36 = vadd.f32 %v1365_v33, %v940_v35 }
 0xe3b   :  { %v949_v37 = vsel %vm61_vm0, %v946_v36, 0.0 }
 0xe3c   :  { %950 = vadd.xlane.f32.xlu1 %v949_v37 }
 0xe3e   :  { %v938_v38 = vpop.f32.mrf.mxu1 }
 0xeaf   :  { %v951_v39 = vpop.xlane.xlu1 %950 }
 0xeb0   :  { %v952_v40 = vmul.f32 %v951_v39, %v1520_v8 }
 0xeb2   :  { %v953_v41 = vsub.f32 %v946_v36, %v952_v40 }
 0xeb4   :  { %v954_v44 = vmul.f32 %v953_v41, %v953_v41 }
 0xeb6   :  { %v955_v45 = vsel %vm61_vm0, %v954_v44, 0.0 }
 0xeb7   :  { %956 = vadd.xlane.f32.xlu0 %v955_v45 }
 0xf2a   :  { %v957_v43 = vpop.xlane.xlu0 %956 }
 0xf2b   :  { %v958_v47 = vmul.f32 %v957_v43, %v1520_v8  ;;  %v1367_v8 = vld [vmem:[%s1807_s14] ss:$0 sm:$0xff] }
 0xf2d   :  { %v959_v48 = vadd.f32 1e-05, %v958_v47 }
 0xf2f   :  { %1395 = vrsqrt.f32 %v959_v48  ;;  %vm966_vm4 = vweird.f32 %v959_v48 }
 0xf35   :  { %v1396_v49 = vpop.eup %1395 }
 0xf36   :  { %v961_v50 = vmul.f32 %v1396_v49, %v959_v48  ;;  %vm967_vm0 = vweird.f32 %v1396_v49 }
 0xf37   :  { %vm968_vm6 = vmor %vm966_vm4, %vm967_vm0 }
 0xf38   :  { %v962_v51 = vmul.f32 %v1396_v49, %v961_v50 }
 0xf3a   :  { %v963_v52 = vmul.f32 0.5, %v962_v51 }
 0xf3c   :  { %v964_v53 = vsub.f32 1.5, %v963_v52 }
 0xf3e   :  { %v965_v54 = vmul.f32 %v1396_v49, %v964_v53 }
 0xf40   :  { %v969_v56 = vsel %vm968_vm6, %v1396_v49, %v965_v54 }
 0xf41   :  { %v970_v57 = vmul.f32 %v969_v56, %v953_v41 }
 0xf43   :  { %v974_v58 = vmul.f32 %v1366_v55, %v970_v57 }
 0xf45   :  { %v978_v59 = vadd.f32 %v1367_v8, %v974_v58 }
 0xf47   :  { %v983_v60 = vpack.c.bf16 %v978_v59, %v978_v59 }
 0xf49   :  { %1294 = vmatmul.msk.bf16.vlgmr.msrb.gmra.mxu2 %vm120_vm5, %v983_v60 }
 0xfcc   :  { %v1012_v62 = vpop.f32.mrf.mxu2 }
 0xfcd   :  { %v1013_v63 = vadd.f32 %v1368_v61, %v1012_v62 }
 0xfcf   :  { %1017 = vst.msk [vmem:[#allocation2] sm:$0x3] %vm1016_vm7, %v1013_v63 }
 0xfd0   :  { %1028 = dma.vmem_to_hbm [thread:$0]  %s1024_s7, 32, %s1026_s8, [#allocation3]  }
 0xfd4   :  { %v1014_v0 = vpop.f32.mrf.mxu2 }
 0xfd5   :  { %1421 = dma.done.wait [#allocation3], 32  }
 0xfd6   :  { %1422 = vsyncadd [#allocation3], 4294967264 }
 0xfd7   :  { %1033 = vsyncpa [#allocation3], 1 }

// kernel: frozen_clip_image_embedder_only_class.2
= control target key start
LH: loop header
LB: loop body
LE: loop exit
PB: predicated region body
PF: predicated region fallthrough
CT: control target
= control target key end

     0   :  { %vm181_vm0 = vcmask 523264   ;;  %vm230_vm1 = vcmask 1040384   ;;  %vm232_vm2 = vcmask 1044480   ;;  %vm234_vm3 = vcmask 1045504   ;;  %s2835_s1 = inlined_call_operand.vmem [shape: bf16[192,32], index: 1, kind: input, shape index: {}]   ;;  %s2836_s0 = inlined_call_operand.vmem [shape: bf16[8,192], index: 0, kind: input, shape index: {}]   ;;  %s2837_s3 = inlined_call_operand.vmem [shape: f32[5,32], index: 3, kind: input, shape index: {}]   ;;  %s2838_s2 = inlined_call_operand.vmem [shape: f32[1,32], index: 2, kind: input, shape index: {}]   ;;  %s2839_s4 = inlined_call_operand.vmem [shape: f32[1,32], index: 4, kind: input, shape index: {}]   ;;  %s2840_s5 = inlined_call_operand.vmem [shape: f32[1,32], index: 5, kind: input, shape index: {}]   ;;  %s2841_s6 = inlined_call_operand.vmem [shape: f32[2,1,32], index: 6, kind: input, shape index: {}]   ;;  %s2842_s7 = inlined_call_operand.vmem [shape: f32[2,1,32], index: 7, kind: input, shape index: {}]   ;;  %s2843_s9 = inlined_call_operand.vmem [shape: f32[2,1,32], index: 9, kind: input, shape index: {}]   ;;  %s2844_s8 = inlined_call_operand.vmem [shape: bf16[2,32,32], index: 8, kind: input, shape index: {}]   ;;  %s2845_s12 = inlined_call_operand.vmem [shape: bf16[2,32,32], index: 12, kind: input, shape index: {}]   ;;  %s2846_s10 = inlined_call_operand.vmem [shape: bf16[2,32,32], index: 10, kind: input, shape index: {}]   ;;  %s2847_s13 = inlined_call_operand.vmem [shape: f32[2,1,32], index: 13, kind: input, shape index: {}]   ;;  %s2848_s11 = inlined_call_operand.vmem [shape: f32[2,1,32], index: 11, kind: input, shape index: {}]   ;;  %s2849_s14 = inlined_call_operand.vmem [shape: bf16[2,32,32], index: 14, kind: input, shape index: {}]   ;;  %s2850_s15 = inlined_call_operand.vmem [shape: f32[2,1,32], index: 15, kind: input, shape index: {}]   ;;  %s2851_s16 = inlined_call_operand.vmem [shape: f32[2,1,32], index: 16, kind: input, shape index: {}]   ;;  %s2852_s17 = inlined_call_operand.vmem [shape: f32[2,1,32], index: 17, kind: input, shape index: {}]   ;;  %s2853_s19 = inlined_call_operand.vmem [shape: f32[2,1,128], index: 19, kind: input, shape index: {}]   ;;  %s2854_s18 = inlined_call_operand.vmem [shape: bf16[2,32,128], index: 18, kind: input, shape index: {}]   ;;  %s2855_s21 = inlined_call_operand.vmem [shape: f32[2,1,32], index: 21, kind: input, shape index: {}]   ;;  %s2856_s20 = inlined_call_operand.vmem [shape: bf16[2,128,32], index: 20, kind: input, shape index: {}]   ;;  %s2857_s22 = inlined_call_operand.vmem [shape: f32[1,32], index: 22, kind: input, shape index: {}]   ;;  %s2858_s23 = inlined_call_operand.vmem [shape: f32[1,32], index: 23, kind: input, shape index: {}]   ;;  %s2859_s24 = inlined_call_operand.vmem [shape: f32[2,32], index: 24, kind: output, shape index: {}]  }
   0x1   :  { %2864 = sst [smem:[#allocation2_spill]] %s2835_s1  ;;  %vm238_vm4 = vcmask 261120   ;;  %vm242_vm5 = vcmask 254976   ;;  %v2293_v37 = vmov 32.0  }
   0x2   :  { %2865 = sst [smem:[#allocation3_spill]] %s2836_s0  ;;  %2221 = vrcp.f32 %v2293_v37  ;;  %v2162_v37 = vld [vmem:[%s2846_s10 + $0x8] sm:$0xff] }
   0x3   :  { %2866 = sst [smem:[#allocation4_spill]] %s2837_s3 }
   0x4   :  { %2867 = sst [smem:[#allocation5_spill]] %s2838_s2 }
   0x5   :  { %2868 = sst [smem:[#allocation6_spill]] %s2839_s4 }
   0x6   :  { %2869 = sst [smem:[#allocation7_spill]] %s2840_s5 }
   0x7   :  { %2870 = sst [smem:[#allocation8_spill]] %s2841_s6 }
   0x8   :  { %2871 = sst [smem:[#allocation9_spill]] %s2842_s7  ;;  %v2222_v38 = vpop.eup %2221 }
   0x9   :  { %2872 = sst [smem:[#allocation10_spill]] %s2843_s9  ;;  %v247_v39 = vmul.f32 32.0, %v2222_v38  ;;  %vm251_vm6 = vweird.f32 %v2222_v38 }
   0xa   :  { %s2873_s27 = sld [smem:[#allocation2_spill]] }
   0xb   :  { %s2874_s5 = sld [smem:[#allocation3_spill]]  ;;  %v248_v40 = vsub.f32 1.0, %v247_v39 }
   0xc   :  { %s2875_s26 = sld [smem:[#allocation4_spill]] }
   0xd   :  { %s2876_s3 = sld [smem:[#allocation5_spill]]  ;;  %v249_v41 = vmul.f32 %v2222_v38, %v248_v40  ;;  %v2161_v40 = vld [vmem:[%s2846_s10] sm:$0xff] }
   0xe   :  { %s2877_s1 = sld [smem:[#allocation6_spill]] }
   0xf   :  { %v250_v42 = vadd.f32 %v2222_v38, %v249_v41  ;;  %s2878_s2 = sld [smem:[#allocation7_spill]] }
  0x10   :  { %v2154_v0 = vld [vmem:[%s2873_s27 + $0x38] sm:$0xff]  ;;  %v2153_v2 = vld [vmem:[%s2873_s27 + $0x30] sm:$0xff]  ;;  %v2152_v4 = vld [vmem:[%s2873_s27 + $0x28] sm:$0xff]  ;;  %s2880_s4 = sld [smem:[#allocation9_spill]] }
  0x11   :  { %v2158_v1 = vld [vmem:[%s2873_s27 + $0x58] sm:$0xff]  ;;  %185 = vmatpush.bf16.msra.mxu0 %v2154_v0  ;;  %v2157_v3 = vld [vmem:[%s2873_s27 + $0x50] sm:$0xff]  ;;  %v2156_v5 = vld [vmem:[%s2873_s27 + $0x48] sm:$0xff]  ;;  %v2469_v43 = vsel %vm251_vm6, %v2222_v38, %v250_v42 }
  0x12   :  { %202 = vmatpush.bf16.msra.mxu1 %v2158_v1  ;;  %v78_v6 = vld [vmem:[%s2874_s5] sm:$0xff]  ;;  %v2150_v10 = vld [vmem:[%s2873_s27 + $0x18] sm:$0xff]  ;;  %v2149_v12 = vld [vmem:[%s2873_s27 + $0x10] sm:$0xff] }
  0x13   :  { %v2151_v7 = vld [vmem:[%s2873_s27 + $0x20] sm:$0xff]  ;;  %v105_v8 = vunpack.c.h.b16 %v78_v6  ;;  %v2148_v13 = vld [vmem:[%s2873_s27 + $0x8] sm:$0xff]  ;;  %v104_v14 = vunpack.c.l.b16 %v78_v6 }
  0x14   :  { %v2155_v9 = vld [vmem:[%s2873_s27 + $0x40] sm:$0xff] }
  0x15   :  { %186 = vmatpush.bf16.msra.mxu0 %v2153_v2  ;;  %v107_v11 = vpack.c.b16 %v105_v8, %v105_v8  ;;  %v2147_v15 = vld [vmem:[%s2873_s27] sm:$0xff]  ;;  %v106_v16 = vpack.c.b16 %v104_v14, %v104_v14 }
  0x16   :  { %203 = vmatpush.bf16.msra.mxu1 %v2157_v3  ;;  %v212_v19 = vld [vmem:[%s2875_s26] sm:$0x1f]  ;;  %s2881_s26 = sld [smem:[#allocation10_spill]] }
  0x17   :  { %v211_v20 = vld [vmem:[%s2876_s3] sm:$0x1]  ;;  %v215_v21 = vrot.slane %v212_v19, 1  ;;  %v218_v22 = vrot.slane %v212_v19, 5  ;;  %s2294_s3 = smov 112  }
  0x18   :  { %v213_v24 = vadd.f32 %v212_v19, %v211_v20  ;;  %v2198_v8 = vld [vmem:[%s2878_s2] ss:$0 sm:$0xff]  ;;  %s2879_s2 = sld [smem:[#allocation8_spill]] }
  0x19   :  { %187 = vmatpush.bf16.msra.mxu0 %v2152_v4  ;;  %v2197_v4 = vld [vmem:[%s2877_s1] ss:$0 sm:$0xff] }
  0x1a   :  { %204 = vmatpush.bf16.msra.mxu1 %v2156_v5  ;;  %v225_v28 = vperm.slane %v213_v24, 0 }
  0x1d   :  { %188 = vmatpush.bf16.msra.mxu0 %v2151_v7 }
  0x1e   :  { %205 = vmatpush.bf16.msra.mxu1 %v2155_v9 }
  0x21   :  { %189 = vmatpush.bf16.msra.mxu0 %v2150_v10  ;;  %1904 = vmatmul.msk.bf16.vlgmr.msra.gmra.mxu1 %vm181_vm0, %v107_v11 }
  0x25   :  { %190 = vmatpush.bf16.msra.mxu0 %v2149_v12 }
  0x29   :  { %191 = vmatpush.bf16.msra.mxu0 %v2148_v13 }
  0x2d   :  { %192 = vmatpush.bf16.msra.mxu0 %v2147_v15 }
  0x30   :  { %193 = vmatmul.bf16.vlgmr.msra.gmra.mxu0 %v106_v16 }
  0x9e   :  { %v207_v17 = vpop.f32.mrf.mxu1 }
  0xa6   :  { %v209_v18 = vpop.f32.mrf.mxu1 }
  0xad   :  { %v194_v23 = vpop.f32.mrf.mxu0 }
  0xae   :  { %v208_v25 = vadd.f32 %v207_v17, %v194_v23 }
  0xb0   :  { %v217_v26 = vadd.f32 %v215_v21, %v208_v25  ;;  %v220_v27 = vadd.f32 %v218_v22, %v208_v25 }
  0xb2   :  { %v222_v29 = vrot.slane %v217_v26, 7  ;;  %v228_v30 = vrot.slane %v220_v27, 6 }
  0xb4   :  { %v231_v31 = vsel %vm230_vm1, %v213_v24, %v222_v29  ;;  %v243_v36 = vsel %vm242_vm5, %v228_v30, 0.0 }
  0xb5   :  { %v196_v32 = vpop.f32.mrf.mxu0  ;;  %v233_v33 = vsel %vm232_vm2, %v231_v31, %v225_v28  ;;  %v2164_v31 = vld [vmem:[%s2845_s12 + $0x8] sm:$0xff] }
  0xb6   :  { %v235_v34 = vsel %vm234_vm3, %v233_v33, %v228_v30  ;;  %457 = vmatpush.bf16.msra.mxu2 %v2164_v31  ;;  %v2159_v33 = vld [vmem:[%s2844_s8] sm:$0xff] }
  0xb7   :  { %v239_v35 = vsel %vm238_vm4, %v235_v34, 0.0 }
  0xb8   :  { %240 = vadd.xlane.f32.xlu0 %v239_v35 }
  0xc0   :  { %244 = vadd.xlane.f32.xlu0 %v243_v36 }
 0x12b   :  { %v241_v44 = vpop.xlane.xlu0 %240 }
 0x12c   :  { %v253_v45 = vmul.f32 %v2469_v43, %v241_v44 }
 0x12e   :  { %v255_v46 = vsub.f32 %v235_v34, %v253_v45  ;;  %v2163_v34 = vld [vmem:[%s2845_s12] sm:$0xff] }
 0x12f   :  { %458 = vmatpush.bf16.msra.mxu2 %v2163_v34 }
 0x130   :  { %v257_v47 = vmul.f32 %v255_v46, %v255_v46 }
 0x132   :  { %v259_v48 = vsel %vm238_vm4, %v257_v47, 0.0 }
 0x133   :  { %260 = vadd.xlane.f32.xlu1 %v259_v48  ;;  %v245_v49 = vpop.xlane.xlu0 %244 }
 0x134   :  { %v254_v50 = vmul.f32 %v2469_v43, %v245_v49 }
 0x136   :  { %v256_v51 = vsub.f32 %v228_v30, %v254_v50  ;;  %v2160_v30 = vld [vmem:[%s2844_s8 + $0x8] sm:$0xff] }
 0x137   :  { %387 = vmatpush.bf16.msra.mxu3 %v2160_v30 }
 0x138   :  { %v258_v52 = vmul.f32 %v256_v51, %v256_v51 }
 0x13a   :  { %v262_v53 = vsel %vm242_vm5, %v258_v52, 0.0 }
 0x13b   :  { %263 = vadd.xlane.f32.xlu1 %v262_v53  ;;  %388 = vmatpush.bf16.msra.mxu3 %v2159_v33 }
 0x13f   :  { %423 = vmatpush.bf16.msrb.mxu3 %v2162_v37 }
 0x143   :  { %424 = vmatpush.bf16.msrb.mxu3 %v2161_v40 }
 0x1a6   :  { %v261_v54 = vpop.xlane.xlu1 %260 }
 0x1a7   :  { %v265_v55 = vmul.f32 %v261_v54, %v2469_v43 }
 0x1a9   :  { %v267_v56 = vadd.f32 1e-05, %v265_v55 }
 0x1ab   :  { %2223 = vrsqrt.f32 %v267_v56  ;;  %vm275_vm8 = vweird.f32 %v267_v56 }
 0x1ae   :  { %v264_v57 = vpop.xlane.xlu1 %263 }
 0x1af   :  { %v266_v58 = vmul.f32 %v264_v57, %v2469_v43 }
 0x1b1   :  { %v2224_v59 = vpop.eup %2223  ;;  %v268_v60 = vadd.f32 1e-05, %v266_v58 }
 0x1b2   :  { %v270_v61 = vmul.f32 %v2224_v59, %v267_v56  ;;  %vm276_vm7 = vweird.f32 %v2224_v59  ;;  %v2199_v56 = vld [vmem:[%s2879_s2] ss:$0 sm:$0xff] }
 0x1b3   :  { %2225 = vrsqrt.f32 %v268_v60  ;;  %vm277_vm9 = vmor %vm275_vm8, %vm276_vm7  ;;  %vm285_vm11 = vweird.f32 %v268_v60  ;;  %vm469_vm7 = vcmask 130048   ;;  %vm648_vm8 = vcmask 1042432  }
 0x1b4   :  { %v271_v62 = vmul.f32 %v2224_v59, %v270_v61  ;;  %v2200_v61 = vld [vmem:[%s2880_s4] ss:$0 sm:$0xff] }
 0x1b6   :  { %v272_v63 = vmul.f32 0.5, %v271_v62 }
 0x1b8   :  { %v273_v0 = vsub.f32 1.5, %v272_v63 }
 0x1b9   :  { %v2226_v1 = vpop.eup %2225 }
 0x1ba   :  { %v274_v2 = vmul.f32 %v2224_v59, %v273_v0  ;;  %v280_v3 = vmul.f32 %v2226_v1, %v268_v60  ;;  %vm286_vm10 = vweird.f32 %v2226_v1 }
 0x1bb   :  { %vm287_vm12 = vmor %vm285_vm11, %vm286_vm10  ;;  %vm508_vm10 = vcmask 39936  }
 0x1bc   :  { %v278_v5 = vsel %vm277_vm9, %v2224_v59, %v274_v2  ;;  %v281_v6 = vmul.f32 %v2226_v1, %v280_v3  ;;  %v2203_v2 = vld [vmem:[%s2881_s26] ss:$0 sm:$0xff]  ;;  %vm496_vm9 = vcmask 36864  }
 0x1bd   :  { %v289_v7 = vmul.f32 %v278_v5, %v255_v46  ;;  %v2532_v3 = vld [vmem:[%s2847_s13] ss:$0 sm:$0xff] }
 0x1be   :  { %v282_v9 = vmul.f32 0.5, %v281_v6 }
 0x1bf   :  { %v294_v10 = vmul.f32 %v2197_v4, %v289_v7 }
 0x1c0   :  { %v283_v11 = vsub.f32 1.5, %v282_v9 }
 0x1c1   :  { %v2483_v12 = vadd.f32 %v2198_v8, %v294_v10  ;;  %v2205_v10 = vld [vmem:[%s2848_s11] ss:$0 sm:$0xff] }
 0x1c2   :  { %v284_v13 = vmul.f32 %v2226_v1, %v283_v11 }
 0x1c3   :  { %v303_v14 = vsel %vm238_vm4, %v2483_v12, 0.0 }
 0x1c4   :  { %v288_v15 = vsel %vm287_vm12, %v2226_v1, %v284_v13  ;;  %304 = vadd.xlane.f32.xlu2 %v303_v14 }
 0x1c5   :  { %v290_v16 = vmul.f32 %v288_v15, %v256_v51 }
 0x1c7   :  { %v295_v17 = vmul.f32 %v2197_v4, %v290_v16 }
 0x1c9   :  { %v2487_v18 = vadd.f32 %v2198_v8, %v295_v17 }
 0x1cb   :  { %v306_v19 = vsel %vm242_vm5, %v2487_v18, 0.0 }
 0x1cc   :  { %307 = vadd.xlane.f32.xlu2 %v306_v19 }
 0x237   :  { %v305_v20 = vpop.xlane.xlu2 %304 }
 0x238   :  { %v309_v21 = vmul.f32 %v305_v20, %v2469_v43 }
 0x23a   :  { %v311_v22 = vsub.f32 %v2483_v12, %v309_v21 }
 0x23c   :  { %v313_v23 = vmul.f32 %v311_v22, %v311_v22 }
 0x23e   :  { %v315_v24 = vsel %vm238_vm4, %v313_v23, 0.0 }
 0x23f   :  { %316 = vadd.xlane.f32.xlu0 %v315_v24  ;;  %v308_v25 = vpop.xlane.xlu2 %307 }
 0x240   :  { %v310_v26 = vmul.f32 %v308_v25, %v2469_v43 }
 0x242   :  { %v312_v27 = vsub.f32 %v2487_v18, %v310_v26 }
 0x244   :  { %v314_v28 = vmul.f32 %v312_v27, %v312_v27 }
 0x246   :  { %v318_v29 = vsel %vm242_vm5, %v314_v28, 0.0 }
 0x247   :  { %319 = vadd.xlane.f32.xlu1 %v318_v29 }
 0x2b2   :  { %v317_v32 = vpop.xlane.xlu0 %316 }
 0x2b3   :  { %v321_v35 = vmul.f32 %v317_v32, %v2469_v43 }
 0x2b5   :  { %v323_v36 = vadd.f32 1e-05, %v321_v35 }
 0x2b7   :  { %2227 = vrsqrt.f32 %v323_v36  ;;  %vm331_vm14 = vweird.f32 %v323_v36 }
 0x2ba   :  { %v320_v38 = vpop.xlane.xlu1 %319 }
 0x2bb   :  { %v322_v39 = vmul.f32 %v320_v38, %v2469_v43 }
 0x2bd   :  { %v2228_v41 = vpop.eup %2227  ;;  %v324_v42 = vadd.f32 1e-05, %v322_v39 }
 0x2be   :  { %v326_v44 = vmul.f32 %v2228_v41, %v323_v36  ;;  %vm332_vm13 = vweird.f32 %v2228_v41 }
 0x2bf   :  { %2229 = vrsqrt.f32 %v324_v42  ;;  %vm333_vm15 = vmor %vm331_vm14, %vm332_vm13  ;;  %vm341_vm3 = vweird.f32 %v324_v42 }
 0x2c0   :  { %v327_v45 = vmul.f32 %v2228_v41, %v326_v44 }
 0x2c2   :  { %v328_v46 = vmul.f32 0.5, %v327_v45 }
 0x2c4   :  { %v329_v47 = vsub.f32 1.5, %v328_v46 }
 0x2c5   :  { %v2230_v48 = vpop.eup %2229 }
 0x2c6   :  { %v330_v49 = vmul.f32 %v2228_v41, %v329_v47  ;;  %v336_v50 = vmul.f32 %v2230_v48, %v324_v42  ;;  %vm342_vm0 = vweird.f32 %v2230_v48 }
 0x2c7   :  { %vm343_vm6 = vmor %vm341_vm3, %vm342_vm0 }
 0x2c8   :  { %v337_v51 = vmul.f32 %v2230_v48, %v336_v50  ;;  %v334_v52 = vsel %vm333_vm15, %v2228_v41, %v330_v49 }
 0x2c9   :  { %v345_v55 = vmul.f32 %v334_v52, %v311_v22 }
 0x2ca   :  { %v338_v53 = vmul.f32 0.5, %v337_v51 }
 0x2cb   :  { %v350_v60 = vmul.f32 %v2199_v56, %v345_v55 }
 0x2cc   :  { %v339_v54 = vsub.f32 1.5, %v338_v53 }
 0x2cd   :  { %v355_v63 = vadd.f32 %v2200_v61, %v350_v60 }
 0x2ce   :  { %v340_v57 = vmul.f32 %v2230_v48, %v339_v54 }
 0x2d0   :  { %v344_v58 = vsel %vm343_vm6, %v2230_v48, %v340_v57 }
 0x2d1   :  { %v346_v59 = vmul.f32 %v344_v58, %v312_v27 }
 0x2d3   :  { %v351_v62 = vmul.f32 %v2199_v56, %v346_v59 }
 0x2d5   :  { %v356_v0 = vadd.f32 %v2200_v61, %v351_v62 }
 0x2d7   :  { %v361_v1 = vpack.c.bf16 %v356_v0, %v355_v63 }
 0x2d9   :  { %1913 = vmatmul.msk.bf16.vlgmr.msra.gmra.mxu3 %vm238_vm4, %v361_v1  ;;  %1931 = vmatmul.msk.bf16.vlgmr.msra.gmra.mxu2 %vm238_vm4, %v361_v1 }
 0x2e9   :  { %1922 = vmatmul.msk.bf16.vlgmr.msrb.gmra.mxu3 %vm238_vm4, %v361_v1 }
 0x35c   :  { %v390_v4 = vpop.f32.mrf.mxu3  ;;  %v460_v5 = vpop.f32.mrf.mxu2 }
 0x35d   :  { %v391_v6 = vadd.f32 %v2203_v2, %v390_v4  ;;  %v2535_v7 = vadd.f32 %v2532_v3, %v460_v5  ;;  %v2165_v5 = vld [vmem:[%s2849_s14] sm:$0xff] }
 0x35f   :  { %v395_v8 = vmul.f32 0.25, %v391_v6  ;;  %1934 = vmatpush.msk.msrb.mxu1 %vm232_vm2, %v2535_v7  ;;  %v692_v51 = vrot.slane %v2535_v7, 5 }
 0x361   :  { %536 = vrot.lane.b32.xlu0 %v395_v8, %s2294_s3  ;;  %v649_v17 = vrot.slane %v395_v8, 5 }
 0x364   :  { %v392_v9 = vpop.f32.mrf.mxu3  ;;  %v462_v48 = vpop.f32.mrf.mxu2 }
 0x365   :  { %v393_v11 = vadd.f32 %v2203_v2, %v392_v9  ;;  %v463_v49 = vadd.f32 %v2532_v3, %v462_v48 }
 0x367   :  { %v396_v15 = vmul.f32 0.25, %v393_v11  ;;  %v693_v50 = vrot.slane %v463_v49, 5 }
 0x369   :  { %v650_v16 = vrot.slane %v396_v15, 5  ;;  %v694_v52 = vsel %vm648_vm8, %v692_v51, %v693_v50 }
 0x36b   :  { %v651_v21 = vsel %vm648_vm8, %v649_v17, %v650_v16  ;;  %v2166_v17 = vld [vmem:[%s2849_s14 + $0x8] sm:$0xff] }
 0x36c   :  { %v426_v13 = vpop.f32.mrf.mxu3  ;;  %619 = vmatpush.bf16.msrb.mxu2 %v2166_v17 }
 0x36d   :  { %v427_v14 = vadd.f32 %v2205_v10, %v426_v13 }
 0x36f   :  { %538 = vrot.lane.b32.xlu2 %v427_v14, %s2294_s3  ;;  %1932 = vmatpush.xpose.msk.msra.mxu3 %vm469_vm7, %v427_v14  ;;  %v653_v22 = vrot.slane %v427_v14, 5 }
 0x370   :  { %798 = vmatpush.bf16.msra.mxu2 %v2166_v17 }
 0x372   :  { %1933 = vmatmul.msk.f32.vlgmr.msra.gmra.mxu3 %vm469_vm7, %v395_v8 }
 0x374   :  { %v428_v19 = vpop.f32.mrf.mxu3 }
 0x375   :  { %v429_v20 = vadd.f32 %v2205_v10, %v428_v19 }
 0x377   :  { %v654_v23 = vrot.slane %v429_v20, 5  ;;  %721 = vrot.lane.b32.xlu2 %v651_v21, %s2294_s3 }
 0x379   :  { %v655_v24 = vsel %vm648_vm8, %v653_v22, %v654_v23 }
 0x37a   :  { %723 = vrot.lane.b32.xlu1 %v655_v24, %s2294_s3  ;;  %1950 = vmatpush.xpose.msk.msrb.mxu0 %vm469_vm7, %v655_v24 }
 0x37d   :  { %1951 = vmatmul.msk.f32.vlgmr.msrb.gmra.mxu0 %vm469_vm7, %v651_v21 }
 0x3c9   :  { %v539_v25 = vpop.permute.xlu2 %538 }
 0x3ca   :  { %1936 = vmatpush.xpose.msk.msrb.mxu3 %vm469_vm7, %v539_v25 }
 0x3ce   :  { %641 = vmatpush.bf16.msra.mxu3 %v2165_v5 }
 0x3d1   :  { %v722_v28 = vpop.permute.xlu2 %721 }
 0x3d3   :  { %v537_v26 = vpop.permute.xlu0 %536 }
 0x3d4   :  { %1937 = vmatmul.msk.f32.vlgmr.msrb.gmra.mxu3 %vm469_vm7, %v537_v26 }
 0x3d5   :  { %814 = vmatpush.bf16.msrb.mxu3 %v2165_v5 }
 0x3ec   :  { %v724_v27 = vpop.permute.xlu1 %723 }
 0x3ed   :  { %1954 = vmatpush.xpose.msk.msra.mxu0 %vm469_vm7, %v724_v27 }
 0x3f0   :  { %1955 = vmatmul.msk.f32.vlgmr.msra.gmra.mxu0 %vm469_vm7, %v722_v28 }
 0x3f5   :  { %v493_v29 = vpop.f32.mrf.mxu3 }
 0x3f6   :  { %v497_v30 = vsel %vm496_vm9, %v493_v29, -inf }
 0x3f7   :  { %498 = vmax.xlane.f32.xlu0 %v497_v30 }
 0x3fa   :  { %v677_v31 = vpop.f32.mrf.mxu0 }
 0x3fb   :  { %v680_v32 = vsel %vm496_vm9, %v677_v31, -inf }
 0x3fc   :  { %681 = vmax.xlane.f32.xlu1 %v680_v32 }
 0x457   :  { %v561_v33 = vpop.f32.mrf.mxu3 }
 0x458   :  { %v564_v34 = vsel %vm496_vm9, %v561_v33, -inf }
 0x459   :  { %565 = vmax.xlane.f32.xlu2 %v564_v34 }
 0x46a   :  { %v499_v35 = vpop.xlane.xlu0 %498 }
 0x46b   :  { %v500_v36 = vsub.f32 %v493_v29, %v499_v35 }
 0x46d   :  { %v501_v37 = vmul.f32 1.442695, %v500_v36  ;;  %v746_v38 = vpop.f32.mrf.mxu0 }
 0x46e   :  { %v749_v39 = vsel %vm496_vm9, %v746_v38, -inf }
 0x46f   :  { %2231 = vpow2.f32 %v501_v37  ;;  %750 = vmax.xlane.f32.xlu0 %v749_v39  ;;  %v682_v40 = vpop.xlane.xlu1 %681 }
 0x470   :  { %v683_v41 = vsub.f32 %v677_v31, %v682_v40 }
 0x472   :  { %v684_v42 = vmul.f32 1.442695, %v683_v41 }
 0x474   :  { %2233 = vpow2.f32 %v684_v42 }
 0x475   :  { %v2232_v44 = vpop.eup %2231 }
 0x476   :  { %v503_v45 = vsel %vm496_vm9, %v2232_v44, 0.0 }
 0x477   :  { %504 = vadd.xlane.f32.xlu2 %v503_v45 }
 0x47a   :  { %v2234_v46 = vpop.eup %2233 }
 0x47b   :  { %v686_v47 = vsel %vm496_vm9, %v2234_v46, 0.0 }
 0x47c   :  { %687 = vadd.xlane.f32.xlu0 %v686_v47 }
 0x48f   :  { %575 = vrot.lane.b32.xlu2 %v2535_v7, %s2294_s3 }
 0x490   :  { %760 = vrot.lane.b32.xlu0 %v694_v52, %s2294_s3 }
 0x4cc   :  { %v566_v53 = vpop.xlane.xlu2 %565 }
 0x4cd   :  { %v567_v54 = vsub.f32 %v561_v33, %v566_v53  ;;  %v2206_v33 = vld [vmem:[%s2850_s15] ss:$0 sm:$0xff]  ;;  %v2168_v53 = vld [vmem:[%s2854_s18 + $0x8] sm:$0xff] }
 0x4ce   :  { %918 = vmatpush.bf16.msrb.mxu0 %v2168_v53 }
 0x4cf   :  { %v568_v55 = vmul.f32 1.442695, %v567_v54 }
 0x4d1   :  { %2235 = vpow2.f32 %v568_v55 }
 0x4d7   :  { %v2236_v56 = vpop.eup %2235 }
 0x4d8   :  { %v570_v57 = vsel %vm496_vm9, %v2236_v56, 0.0 }
 0x4d9   :  { %571 = vadd.xlane.f32.xlu1 %v570_v57  ;;  %v2167_v57 = vld [vmem:[%s2854_s18] sm:$0xff] }
 0x4da   :  { %919 = vmatpush.bf16.msrb.mxu0 %v2167_v57 }
 0x4e2   :  { %v751_v58 = vpop.xlane.xlu0 %750 }
 0x4e3   :  { %v752_v59 = vsub.f32 %v746_v38, %v751_v58 }
 0x4e5   :  { %v753_v60 = vmul.f32 1.442695, %v752_v59 }
 0x4e7   :  { %2237 = vpow2.f32 %v753_v60 }
 0x4ea   :  { %v505_v61 = vpop.xlane.xlu2 %504 }
 0x4eb   :  { %2239 = vrcp.f32 %v505_v61 }
 0x4ed   :  { %v2238_v62 = vpop.eup %2237 }
 0x4ee   :  { %v755_v63 = vsel %vm496_vm9, %v2238_v62, 0.0 }
 0x4ef   :  { %756 = vadd.xlane.f32.xlu1 %v755_v63  ;;  %v688_v4 = vpop.xlane.xlu0 %687 }
 0x4f1   :  { %v2240_v0 = vpop.eup %2239 }
 0x4f2   :  { %v576_v1 = vpop.permute.xlu2 %575  ;;  %v507_v2 = vmul.f32 %v2240_v0, %v2232_v44 }
 0x4f3   :  { %1938 = vmatpush.msk.msra.mxu1 %vm232_vm2, %v576_v1 }
 0x4f4   :  { %1935 = vmatmul.msk.f32.vlgmr.msrb.gmra.mxu1 %vm508_vm10, %v507_v2 }
 0x4f5   :  { %1952 = vmatpush.msk.msrb.mxu1 %vm232_vm2, %v694_v52 }
 0x502   :  { %v761_v8 = vpop.permute.xlu0 %760 }
 0x54c   :  { %v572_v3 = vpop.xlane.xlu1 %571 }
 0x54d   :  { %2241 = vrcp.f32 %v572_v3 }
 0x54e   :  { %2243 = vrcp.f32 %v688_v4 }
 0x553   :  { %v2242_v6 = vpop.eup %2241 }
 0x554   :  { %v574_v7 = vmul.f32 %v2242_v6, %v2236_v56  ;;  %v2244_v9 = vpop.eup %2243 }
 0x555   :  { %v690_v10 = vmul.f32 %v2244_v9, %v2234_v46  ;;  %v2207_v9 = vld [vmem:[%s2851_s16] ss:$0 sm:$0xff] }
 0x556   :  { %1939 = vmatmul.msk.f32.vlgmr.msra.gmra.mxu1 %vm508_vm10, %v574_v7 }
 0x557   :  { %1956 = vmatpush.msk.msra.mxu1 %vm232_vm2, %v761_v8 }
 0x55e   :  { %1953 = vmatmul.msk.f32.vlgmr.msrb.gmra.mxu1 %vm508_vm10, %v690_v10 }
 0x562   :  { %v757_v11 = vpop.xlane.xlu1 %756 }
 0x563   :  { %2245 = vrcp.f32 %v757_v11 }
 0x569   :  { %v2246_v13 = vpop.eup %2245 }
 0x56a   :  { %v759_v14 = vmul.f32 %v2246_v13, %v2238_v62 }
 0x56c   :  { %1957 = vmatmul.msk.f32.vlgmr.msra.gmra.mxu1 %vm508_vm10, %v759_v14  ;;  %v2208_v14 = vld [vmem:[%s2852_s17] ss:$0 sm:$0xff] }
 0x571   :  { %v532_v15 = vpop.f32.mrf.mxu1 }
 0x572   :  { %v535_v16 = vpack.c.bf16 %v532_v15, %v532_v15 }
 0x574   :  { %1949 = vmatmul.msk.bf16.vlgmr.msra.gmra.mxu3 %vm469_vm7, %v535_v16 }
 0x5d3   :  { %v599_v19 = vpop.f32.mrf.mxu1 }
 0x5d4   :  { %v602_v20 = vpack.c.bf16 %v599_v19, %v599_v19 }
 0x5d6   :  { %1944 = vmatmul.msk.bf16.vlgmr.msrb.gmra.mxu2 %vm469_vm7, %v602_v20 }
 0x5db   :  { %v717_v21 = vpop.f32.mrf.mxu1 }
 0x5dc   :  { %v720_v22 = vpack.c.bf16 %v717_v21, %v717_v21 }
 0x5de   :  { %1959 = vmatmul.msk.bf16.vlgmr.msrb.gmra.mxu3 %vm469_vm7, %v720_v22  ;;  %v2176_v22 = vld [vmem:[%s2856_s20 + $0x38] sm:$0xff] }
 0x5df   :  { %1037 = vmatpush.bf16.msrb.mxu1 %v2176_v22  ;;  %v2178_v22 = vld [vmem:[%s2844_s8 + $0x18] sm:$0xff] }
 0x5e0   :  { %1143 = vmatpush.bf16.msrb.mxu2 %v2178_v22 }
 0x5e9   :  { %v784_v23 = vpop.f32.mrf.mxu1 }
 0x5ea   :  { %v787_v24 = vpack.c.bf16 %v784_v23, %v784_v23  ;;  %v2175_v23 = vld [vmem:[%s2856_s20 + $0x30] sm:$0xff] }
 0x5eb   :  { %1038 = vmatpush.bf16.msrb.mxu1 %v2175_v23  ;;  %v2180_v23 = vld [vmem:[%s2846_s10 + $0x18] sm:$0xff] }
 0x5ec   :  { %1958 = vmatmul.msk.bf16.vlgmr.msra.gmra.mxu2 %vm469_vm7, %v787_v24  ;;  %v2174_v24 = vld [vmem:[%s2856_s20 + $0x28] sm:$0xff]  ;;  %1181 = vmatpush.bf16.msra.mxu3 %v2180_v23 }
 0x5ef   :  { %1039 = vmatpush.bf16.msrb.mxu1 %v2174_v24  ;;  %v2182_v24 = vld [vmem:[%s2845_s12 + $0x18] sm:$0xff] }
 0x5f0   :  { %1217 = vmatpush.bf16.msra.mxu0 %v2182_v24 }
 0x5f7   :  { %v643_v25 = vpop.f32.mrf.mxu3 }
 0x5ff   :  { %v645_v26 = vpop.f32.mrf.mxu3 }
 0x600   :  { %v2209_v26 = vld [vmem:[%s2853_s19] ss:$0 sm:$0xff] }
 0x659   :  { %v621_v27 = vpop.f32.mrf.mxu2 }
 0x65a   :  { %v644_v34 = vadd.f32 %v643_v25, %v621_v27  ;;  %v2173_v25 = vld [vmem:[%s2856_s20 + $0x20] sm:$0xff]  ;;  %v2172_v27 = vld [vmem:[%s2856_s20 + $0x18] sm:$0xff] }
 0x65b   :  { %1040 = vmatpush.bf16.msrb.mxu1 %v2173_v25 }
 0x65f   :  { %1041 = vmatpush.bf16.msrb.mxu1 %v2172_v27 }
 0x661   :  { %v623_v28 = vpop.f32.mrf.mxu2  ;;  %v816_v29 = vpop.f32.mrf.mxu3 }
 0x669   :  { %v818_v30 = vpop.f32.mrf.mxu3 }
 0x66a   :  { %v2171_v30 = vld [vmem:[%s2856_s20 + $0x10] sm:$0xff] }
 0x66b   :  { %1042 = vmatpush.bf16.msrb.mxu1 %v2171_v30  ;;  %v2181_v30 = vld [vmem:[%s2845_s12 + $0x10] sm:$0xff] }
 0x66c   :  { %1218 = vmatpush.bf16.msra.mxu0 %v2181_v30 }
 0x66f   :  { %v800_v31 = vpop.f32.mrf.mxu2 }
 0x670   :  { %v817_v32 = vadd.f32 %v816_v29, %v800_v31 }
 0x672   :  { %v821_v35 = vrot.slane %v817_v32, 3 }
 0x674   :  { %v823_v36 = vsel %vm232_vm2, %v644_v34, %v821_v35  ;;  %v829_v40 = vadd.f32 %v2206_v33, %v821_v35 }
 0x675   :  { %v828_v37 = vadd.f32 %v2206_v33, %v823_v36  ;;  %v2170_v33 = vld [vmem:[%s2856_s20 + $0x8] sm:$0xff]  ;;  %v2169_v36 = vld [vmem:[%s2856_s20] sm:$0xff] }
 0x676   :  { %v2597_v42 = vadd.f32 %v829_v40, %v2487_v18  ;;  %1043 = vmatpush.bf16.msrb.mxu1 %v2170_v33 }
 0x677   :  { %v802_v38 = vpop.f32.mrf.mxu2  ;;  %v2592_v39 = vadd.f32 %v828_v37, %v2483_v12 }
 0x678   :  { %v837_v44 = vsel %vm242_vm5, %v2597_v42, 0.0 }
 0x679   :  { %v834_v41 = vsel %vm238_vm4, %v2592_v39, 0.0 }
 0x67a   :  { %835 = vadd.xlane.f32.xlu1 %v834_v41  ;;  %1044 = vmatpush.bf16.msrb.mxu1 %v2169_v36 }
 0x682   :  { %838 = vadd.xlane.f32.xlu1 %v837_v44 }
 0x6ed   :  { %v836_v45 = vpop.xlane.xlu1 %835 }
 0x6ee   :  { %v840_v46 = vmul.f32 %v836_v45, %v2469_v43 }
 0x6f0   :  { %v842_v47 = vsub.f32 %v2592_v39, %v840_v46 }
 0x6f2   :  { %v844_v48 = vmul.f32 %v842_v47, %v842_v47 }
 0x6f4   :  { %v846_v12 = vsel %vm238_vm4, %v844_v48, 0.0 }
 0x6f5   :  { %847 = vadd.xlane.f32.xlu2 %v846_v12  ;;  %v839_v49 = vpop.xlane.xlu1 %838 }
 0x6f6   :  { %v841_v50 = vmul.f32 %v839_v49, %v2469_v43 }
 0x6f8   :  { %v843_v51 = vsub.f32 %v2597_v42, %v841_v50 }
 0x6fa   :  { %v845_v18 = vmul.f32 %v843_v51, %v843_v51 }
 0x6fc   :  { %v849_v52 = vsel %vm242_vm5, %v845_v18, 0.0 }
 0x6fd   :  { %850 = vadd.xlane.f32.xlu0 %v849_v52 }
 0x768   :  { %v848_v54 = vpop.xlane.xlu2 %847 }
 0x769   :  { %v852_v55 = vmul.f32 %v848_v54, %v2469_v43 }
 0x76b   :  { %v854_v56 = vadd.f32 1e-05, %v852_v55 }
 0x76d   :  { %2247 = vrsqrt.f32 %v854_v56  ;;  %vm862_vm12 = vweird.f32 %v854_v56 }
 0x770   :  { %v851_v58 = vpop.xlane.xlu0 %850 }
 0x771   :  { %v853_v59 = vmul.f32 %v851_v58, %v2469_v43 }
 0x773   :  { %v2248_v60 = vpop.eup %2247  ;;  %v855_v61 = vadd.f32 1e-05, %v853_v59 }
 0x774   :  { %v857_v62 = vmul.f32 %v2248_v60, %v854_v56  ;;  %vm863_vm11 = vweird.f32 %v2248_v60 }
 0x775   :  { %2249 = vrsqrt.f32 %v855_v61  ;;  %vm864_vm13 = vmor %vm862_vm12, %vm863_vm11  ;;  %vm872_vm15 = vweird.f32 %v855_v61 }
 0x776   :  { %v858_v63 = vmul.f32 %v2248_v60, %v857_v62 }
 0x778   :  { %v859_v0 = vmul.f32 0.5, %v858_v63 }
 0x77a   :  { %v860_v1 = vsub.f32 1.5, %v859_v0 }
 0x77b   :  { %v2250_v2 = vpop.eup %2249 }
 0x77c   :  { %v861_v3 = vmul.f32 %v2248_v60, %v860_v1  ;;  %v867_v4 = vmul.f32 %v2250_v2, %v855_v61  ;;  %vm873_vm14 = vweird.f32 %v2250_v2 }
 0x77d   :  { %vm874_vm0 = vmor %vm872_vm15, %vm873_vm14 }
 0x77e   :  { %v868_v5 = vmul.f32 %v2250_v2, %v867_v4  ;;  %v865_v6 = vsel %vm864_vm13, %v2248_v60, %v861_v3  ;;  %v2210_v3 = vld [vmem:[%s2855_s21] ss:$0 sm:$0xff] }
 0x77f   :  { %v876_v10 = vmul.f32 %v865_v6, %v842_v47 }
 0x780   :  { %v869_v7 = vmul.f32 0.5, %v868_v5 }
 0x781   :  { %v881_v15 = vmul.f32 %v2207_v9, %v876_v10 }
 0x782   :  { %v870_v8 = vsub.f32 1.5, %v869_v7 }
 0x783   :  { %v886_v19 = vadd.f32 %v2208_v14, %v881_v15 }
 0x784   :  { %v871_v11 = vmul.f32 %v2250_v2, %v870_v8 }
 0x786   :  { %v875_v13 = vsel %vm874_vm0, %v2250_v2, %v871_v11 }
 0x787   :  { %v877_v16 = vmul.f32 %v875_v13, %v843_v51 }
 0x789   :  { %v882_v17 = vmul.f32 %v2207_v9, %v877_v16 }
 0x78b   :  { %v887_v20 = vadd.f32 %v2208_v14, %v882_v17 }
 0x78d   :  { %v892_v21 = vpack.c.bf16 %v887_v20, %v886_v19 }
 0x78f   :  { %1968 = vmatmul.msk.bf16.vlgmr.msrb.gmra.mxu0 %vm238_vm4, %v892_v21 }
 0x80c   :  { %v921_v28 = vpop.f32.mrf.mxu0 }
 0x80d   :  { %v922_v29 = vadd.f32 %v2209_v26, %v921_v28  ;;  %v2177_v28 = vld [vmem:[%s2844_s8 + $0x10] sm:$0xff] }
 0x80e   :  { %1144 = vmatpush.bf16.msrb.mxu2 %v2177_v28 }
 0x80f   :  { %v1969_v31 = vmul.f32 -1.702, %v922_v29 }
 0x811   :  { %v930_v32 = vmul.f32 1.442695, %v1969_v31 }
 0x813   :  { %2251 = vpow2.f32 %v930_v32 }
 0x814   :  { %v923_v34 = vpop.f32.mrf.mxu0 }
 0x815   :  { %v924_v35 = vadd.f32 %v2209_v26, %v923_v34 }
 0x817   :  { %v1970_v37 = vmul.f32 -1.702, %v924_v35 }
 0x819   :  { %v2252_v38 = vpop.eup %2251  ;;  %v932_v40 = vmul.f32 1.442695, %v1970_v37 }
 0x81a   :  { %v934_v41 = vadd.f32 1.0, %v2252_v38 }
 0x81b   :  { %2253 = vpow2.f32 %v932_v40 }
 0x81c   :  { %2255 = vrcp.f32 %v934_v41  ;;  %v947_v18 = vand.u32 2147483648, %v934_v41  ;;  %vm941_vm6 = vweird.f32 %v934_v41  ;;  %v945_v52 = vand.u32 2147483647, %v934_v41 }
 0x81e   :  { %v948_v58 = vor.u32 1.1754944e-38, %v947_v18  ;;  %vm946_vm13 = vcmp.eq.f32.partialorder %v945_v52, 8.507059e+37  ;;  %v2202_v18 = vld [vmem:[%s2880_s4 + $0x1] ss:$0 sm:$0xff] }
 0x821   :  { %v2254_v44 = vpop.eup %2253 }
 0x822   :  { %v2256_v45 = vpop.eup %2255  ;;  %v935_v46 = vadd.f32 1.0, %v2254_v44 }
 0x823   :  { %v937_v47 = vmul.f32 %v2256_v45, %v934_v41  ;;  %vm942_vm3 = vweird.f32 %v2256_v45 }
 0x824   :  { %2257 = vrcp.f32 %v935_v46  ;;  %vm943_vm11 = vmor %vm941_vm6, %vm942_vm3  ;;  %v962_v54 = vand.u32 2147483648, %v935_v46  ;;  %v960_v57 = vand.u32 2147483647, %v935_v46  ;;  %vm956_vm14 = vweird.f32 %v935_v46 }
 0x825   :  { %v938_v48 = vsub.f32 1.0, %v937_v47 }
 0x826   :  { %v963_v61 = vor.u32 1.1754944e-38, %v962_v54  ;;  %vm961_vm0 = vcmp.eq.f32.partialorder %v960_v57, 8.507059e+37 }
 0x827   :  { %v939_v12 = vmul.f32 %v2256_v45, %v938_v48 }
 0x829   :  { %v940_v50 = vadd.f32 %v2256_v45, %v939_v12  ;;  %v2201_v12 = vld [vmem:[%s2879_s2 + $0x1] ss:$0 sm:$0xff] }
 0x82a   :  { %v2258_v49 = vpop.eup %2257 }
 0x82b   :  { %v952_v51 = vmul.f32 %v2258_v49, %v935_v46  ;;  %v944_v55 = vsel %vm943_vm11, %v2256_v45, %v940_v50  ;;  %vm957_vm12 = vweird.f32 %v2258_v49 }
 0x82c   :  { %v949_v60 = vsel %vm946_vm13, %v948_v58, %v944_v55  ;;  %vm958_vm15 = vmor %vm956_vm14, %vm957_vm12  ;;  %v2700_v58 = vld [vmem:[%s2847_s13 + $0x1] ss:$0 sm:$0xff] }
 0x82d   :  { %v953_v53 = vsub.f32 1.0, %v952_v51  ;;  %v966_v0 = vmul.f32 %v949_v60, %v922_v29  ;;  %v2179_v29 = vld [vmem:[%s2846_s10 + $0x10] sm:$0xff] }
 0x82e   :  { %1182 = vmatpush.bf16.msra.mxu3 %v2179_v29 }
 0x82f   :  { %v954_v56 = vmul.f32 %v2258_v49, %v953_v53 }
 0x831   :  { %v955_v59 = vadd.f32 %v2258_v49, %v954_v56 }
 0x833   :  { %v959_v62 = vsel %vm958_vm15, %v2258_v49, %v955_v59 }
 0x834   :  { %v964_v63 = vsel %vm961_vm0, %v963_v61, %v959_v62  ;;  %v2212_v61 = vld [vmem:[%s2881_s26 + $0x1] ss:$0 sm:$0xff] }
 0x835   :  { %v967_v1 = vmul.f32 %v964_v63, %v924_v35  ;;  %v2213_v62 = vld [vmem:[%s2848_s11 + $0x1] ss:$0 sm:$0xff] }
 0x837   :  { %v984_v2 = vpack.c.bf16 %v967_v1, %v966_v0 }
 0x839   :  { %1045 = vmatmul.bf16.vlgmr.msrb.gmra.mxu1 %v984_v2 }
 0x8b6   :  { %v1046_v4 = vpop.f32.mrf.mxu1 }
 0x8b7   :  { %v1047_v5 = vadd.f32 %v2210_v3, %v1046_v4 }
 0x8b9   :  { %v2653_v6 = vadd.f32 %v1047_v5, %v2592_v39 }
 0x8bb   :  { %v1057_v7 = vsel %vm238_vm4, %v2653_v6, 0.0 }
 0x8bc   :  { %1058 = vadd.xlane.f32.xlu1 %v1057_v7 }
 0x8be   :  { %v1048_v8 = vpop.f32.mrf.mxu1 }
 0x8bf   :  { %v1049_v9 = vadd.f32 %v2210_v3, %v1048_v8 }
 0x8c1   :  { %v2658_v10 = vadd.f32 %v1049_v9, %v2597_v42 }
 0x8c3   :  { %v1060_v11 = vsel %vm242_vm5, %v2658_v10, 0.0 }
 0x8c4   :  { %1061 = vadd.xlane.f32.xlu1 %v1060_v11 }
 0x92f   :  { %v1059_v13 = vpop.xlane.xlu1 %1058 }
 0x930   :  { %v1063_v14 = vmul.f32 %v1059_v13, %v2469_v43 }
 0x932   :  { %v1065_v15 = vsub.f32 %v2653_v6, %v1063_v14 }
 0x934   :  { %v1067_v39 = vmul.f32 %v1065_v15, %v1065_v15 }
 0x936   :  { %v1069_v16 = vsel %vm238_vm4, %v1067_v39, 0.0 }
 0x937   :  { %1070 = vadd.xlane.f32.xlu1 %v1069_v16  ;;  %v1062_v17 = vpop.xlane.xlu1 %1061 }
 0x938   :  { %v1064_v19 = vmul.f32 %v1062_v17, %v2469_v43 }
 0x93a   :  { %v1066_v20 = vsub.f32 %v2658_v10, %v1064_v19 }
 0x93c   :  { %v1068_v42 = vmul.f32 %v1066_v20, %v1066_v20 }
 0x93e   :  { %v1072_v21 = vsel %vm242_vm5, %v1068_v42, 0.0 }
 0x93f   :  { %1073 = vadd.xlane.f32.xlu1 %v1072_v21 }
 0x9aa   :  { %v1071_v25 = vpop.xlane.xlu1 %1070 }
 0x9ab   :  { %v1075_v26 = vmul.f32 %v1071_v25, %v2469_v43 }
 0x9ad   :  { %v1077_v27 = vadd.f32 1e-05, %v1075_v26 }
 0x9af   :  { %2259 = vrsqrt.f32 %v1077_v27  ;;  %vm1085_vm6 = vweird.f32 %v1077_v27 }
 0x9b2   :  { %v1074_v31 = vpop.xlane.xlu1 %1073 }
 0x9b3   :  { %v1076_v32 = vmul.f32 %v1074_v31, %v2469_v43 }
 0x9b5   :  { %v2260_v33 = vpop.eup %2259  ;;  %v1078_v34 = vadd.f32 1e-05, %v1076_v32 }
 0x9b6   :  { %v1080_v35 = vmul.f32 %v2260_v33, %v1077_v27  ;;  %vm1086_vm3 = vweird.f32 %v2260_v33 }
 0x9b7   :  { %2261 = vrsqrt.f32 %v1078_v34  ;;  %vm1087_vm11 = vmor %vm1085_vm6, %vm1086_vm3  ;;  %vm1095_vm13 = vweird.f32 %v1078_v34 }
 0x9b8   :  { %v1081_v36 = vmul.f32 %v2260_v33, %v1080_v35 }
 0x9ba   :  { %v1082_v37 = vmul.f32 0.5, %v1081_v36 }
 0x9bc   :  { %v1083_v38 = vsub.f32 1.5, %v1082_v37 }
 0x9bd   :  { %v2262_v40 = vpop.eup %2261 }
 0x9be   :  { %v1084_v41 = vmul.f32 %v2260_v33, %v1083_v38  ;;  %v1090_v44 = vmul.f32 %v2262_v40, %v1078_v34  ;;  %vm1096_vm12 = vweird.f32 %v2262_v40 }
 0x9bf   :  { %vm1097_vm14 = vmor %vm1095_vm13, %vm1096_vm12 }
 0x9c0   :  { %v1091_v45 = vmul.f32 %v2262_v40, %v1090_v44  ;;  %v1088_v46 = vsel %vm1087_vm11, %v2260_v33, %v1084_v41 }
 0x9c1   :  { %v1099_v49 = vmul.f32 %v1088_v46, %v1065_v15 }
 0x9c2   :  { %v1092_v47 = vmul.f32 0.5, %v1091_v45 }
 0x9c3   :  { %v1104_v52 = vmul.f32 %v2201_v12, %v1099_v49 }
 0x9c4   :  { %v1093_v48 = vsub.f32 1.5, %v1092_v47 }
 0x9c5   :  { %v1109_v55 = vadd.f32 %v2202_v18, %v1104_v52 }
 0x9c6   :  { %v1094_v50 = vmul.f32 %v2262_v40, %v1093_v48 }
 0x9c8   :  { %v1098_v51 = vsel %vm1097_vm14, %v2262_v40, %v1094_v50 }
 0x9c9   :  { %v1100_v53 = vmul.f32 %v1098_v51, %v1066_v20 }
 0x9cb   :  { %v1105_v54 = vmul.f32 %v2201_v12, %v1100_v53 }
 0x9cd   :  { %v1110_v56 = vadd.f32 %v2202_v18, %v1105_v54 }
 0x9cf   :  { %v1116_v57 = vpack.c.bf16 %v1110_v56, %v1109_v55 }
 0x9d1   :  { %2018 = vmatmul.msk.bf16.vlgmr.msrb.gmra.mxu2 %vm238_vm4, %v1116_v57  ;;  %2032 = vmatmul.msk.bf16.vlgmr.msra.gmra.mxu3 %vm238_vm4, %v1116_v57 }
 0x9d2   :  { %2046 = vmatmul.msk.bf16.vlgmr.msra.gmra.mxu0 %vm238_vm4, %v1116_v57 }
 0xa4f   :  { %v1220_v59 = vpop.f32.mrf.mxu0 }
 0xa50   :  { %v2703_v60 = vadd.f32 %v2700_v58, %v1220_v59 }
 0xa52   :  { %2053 = vmatpush.msk.msrb.mxu3 %vm232_vm2, %v2703_v60  ;;  %v1449_v45 = vrot.slane %v2703_v60, 5 }
 0xa54   :  { %v1146_v63 = vpop.f32.mrf.mxu2  ;;  %v1184_v0 = vpop.f32.mrf.mxu3 }
 0xa55   :  { %v1147_v1 = vadd.f32 %v2212_v61, %v1146_v63  ;;  %v1185_v2 = vadd.f32 %v2213_v62, %v1184_v0 }
 0xa57   :  { %v1151_v3 = vmul.f32 0.25, %v1147_v1  ;;  %1296 = vrot.lane.b32.xlu1 %v1185_v2, %s2294_s3  ;;  %2051 = vmatpush.xpose.msk.msra.mxu2 %vm469_vm7, %v1185_v2  ;;  %v1410_v9 = vrot.slane %v1185_v2, 5  ;;  %v1222_v25 = vpop.f32.mrf.mxu0 }
 0xa58   :  { %v1223_v41 = vadd.f32 %v2700_v58, %v1222_v25  ;;  %v2183_v58 = vld [vmem:[%s2849_s14 + $0x10] sm:$0xff]  ;;  %v2214_v25 = vld [vmem:[%s2850_s15 + $0x1] ss:$0 sm:$0xff] }
 0xa59   :  { %1294 = vrot.lane.b32.xlu2 %v1151_v3, %s2294_s3  ;;  %v1406_v14 = vrot.slane %v1151_v3, 5 }
 0xa5a   :  { %2052 = vmatmul.msk.f32.vlgmr.msra.gmra.mxu2 %vm469_vm7, %v1151_v3  ;;  %v1450_v44 = vrot.slane %v1223_v41, 5 }
 0xa5c   :  { %v1148_v4 = vpop.f32.mrf.mxu2  ;;  %v1186_v5 = vpop.f32.mrf.mxu3  ;;  %v1451_v46 = vsel %vm648_vm8, %v1449_v45, %v1450_v44 }
 0xa5d   :  { %v1149_v7 = vadd.f32 %v2212_v61, %v1148_v4  ;;  %v1187_v8 = vadd.f32 %v2213_v62, %v1186_v5 }
 0xa5f   :  { %v1152_v11 = vmul.f32 0.25, %v1149_v7  ;;  %v1411_v13 = vrot.slane %v1187_v8, 5 }
 0xa61   :  { %v1407_v15 = vrot.slane %v1152_v11, 5  ;;  %v1412_v39 = vsel %vm648_vm8, %v1410_v9, %v1411_v13  ;;  %v2184_v9 = vld [vmem:[%s2849_s14 + $0x18] sm:$0xff] }
 0xa62   :  { %1480 = vrot.lane.b32.xlu0 %v1412_v39, %s2294_s3  ;;  %2069 = vmatpush.xpose.msk.msra.mxu1 %vm469_vm7, %v1412_v39 }
 0xa63   :  { %v1408_v16 = vsel %vm648_vm8, %v1406_v14, %v1407_v15  ;;  %1377 = vmatpush.bf16.msra.mxu3 %v2184_v9 }
 0xa64   :  { %1478 = vrot.lane.b32.xlu1 %v1408_v16, %s2294_s3 }
 0xa65   :  { %2070 = vmatmul.msk.f32.vlgmr.msra.gmra.mxu1 %vm469_vm7, %v1408_v16 }
 0xab3   :  { %v1295_v19 = vpop.permute.xlu2 %1294 }
 0xac9   :  { %v1297_v17 = vpop.permute.xlu1 %1296 }
 0xaca   :  { %2055 = vmatpush.xpose.msk.msrb.mxu0 %vm469_vm7, %v1297_v17 }
 0xacd   :  { %2056 = vmatmul.msk.f32.vlgmr.msrb.gmra.mxu0 %vm469_vm7, %v1295_v19 }
 0xace   :  { %1399 = vmatpush.bf16.msra.mxu0 %v2183_v58 }
 0xad2   :  { %1571 = vmatpush.bf16.msrb.mxu0 %v2183_v58 }
 0xad4   :  { %v1481_v20 = vpop.permute.xlu0 %1480 }
 0xad5   :  { %2073 = vmatpush.xpose.msk.msrb.mxu1 %vm469_vm7, %v1481_v20 }
 0xad6   :  { %v1479_v42 = vpop.permute.xlu1 %1478 }
 0xad8   :  { %2074 = vmatmul.msk.f32.vlgmr.msrb.gmra.mxu1 %vm469_vm7, %v1479_v42 }
 0xadd   :  { %v1253_v21 = vpop.f32.mrf.mxu2 }
 0xade   :  { %v1256_v22 = vsel %vm496_vm9, %v1253_v21, -inf }
 0xadf   :  { %1257 = vmax.xlane.f32.xlu2 %v1256_v22 }
 0xae2   :  { %v1434_v23 = vpop.f32.mrf.mxu1 }
 0xae3   :  { %v1437_v24 = vsel %vm496_vm9, %v1434_v23, -inf }
 0xae4   :  { %1438 = vmax.xlane.f32.xlu1 %v1437_v24 }
 0xb4a   :  { %v1319_v26 = vpop.f32.mrf.mxu0 }
 0xb4b   :  { %v1322_v27 = vsel %vm496_vm9, %v1319_v26, -inf }
 0xb4c   :  { %1323 = vmax.xlane.f32.xlu0 %v1322_v27 }
 0xb52   :  { %v1258_v28 = vpop.xlane.xlu2 %1257 }
 0xb53   :  { %v1259_v29 = vsub.f32 %v1253_v21, %v1258_v28 }
 0xb55   :  { %v1260_v30 = vmul.f32 1.442695, %v1259_v29  ;;  %v1503_v31 = vpop.f32.mrf.mxu1 }
 0xb56   :  { %v1506_v32 = vsel %vm496_vm9, %v1503_v31, -inf }
 0xb57   :  { %2263 = vpow2.f32 %v1260_v30  ;;  %1507 = vmax.xlane.f32.xlu0 %v1506_v32  ;;  %v1439_v33 = vpop.xlane.xlu1 %1438 }
 0xb58   :  { %v1440_v34 = vsub.f32 %v1434_v23, %v1439_v33 }
 0xb5a   :  { %v1441_v35 = vmul.f32 1.442695, %v1440_v34 }
 0xb5c   :  { %2265 = vpow2.f32 %v1441_v35 }
 0xb5d   :  { %v2264_v36 = vpop.eup %2263 }
 0xb5e   :  { %v1262_v37 = vsel %vm496_vm9, %v2264_v36, 0.0 }
 0xb5f   :  { %1263 = vadd.xlane.f32.xlu1 %v1262_v37 }
 0xb62   :  { %v2266_v38 = vpop.eup %2265 }
 0xb63   :  { %v1443_v40 = vsel %vm496_vm9, %v2266_v38, 0.0 }
 0xb64   :  { %1444 = vadd.xlane.f32.xlu0 %v1443_v40 }
 0xb78   :  { %1517 = vrot.lane.b32.xlu0 %v1451_v46, %s2294_s3 }
 0xbbf   :  { %v1324_v47 = vpop.xlane.xlu0 %1323 }
 0xbc0   :  { %v1325_v48 = vsub.f32 %v1319_v26, %v1324_v47 }
 0xbc2   :  { %v1326_v12 = vmul.f32 1.442695, %v1325_v48 }
 0xbc4   :  { %2267 = vpow2.f32 %v1326_v12 }
 0xbca   :  { %v2268_v49 = vpop.eup %2267  ;;  %v1508_v50 = vpop.xlane.xlu0 %1507 }
 0xbcb   :  { %v1509_v51 = vsub.f32 %v1503_v31, %v1508_v50  ;;  %v1328_v18 = vsel %vm496_vm9, %v2268_v49, 0.0  ;;  %v2185_v50 = vld [vmem:[%s2854_s18 + $0x10] sm:$0xff] }
 0xbcc   :  { %1329 = vadd.xlane.f32.xlu2 %v1328_v18 }
 0xbcd   :  { %v1510_v52 = vmul.f32 1.442695, %v1509_v51 }
 0xbcf   :  { %2269 = vpow2.f32 %v1510_v52 }
 0xbd2   :  { %v1264_v53 = vpop.xlane.xlu1 %1263 }
 0xbd3   :  { %2271 = vrcp.f32 %v1264_v53 }
 0xbd5   :  { %v2270_v54 = vpop.eup %2269 }
 0xbd6   :  { %v1512_v55 = vsel %vm496_vm9, %v2270_v54, 0.0 }
 0xbd7   :  { %1513 = vadd.xlane.f32.xlu1 %v1512_v55  ;;  %v1445_v61 = vpop.xlane.xlu0 %1444 }
 0xbd9   :  { %v2272_v56 = vpop.eup %2271 }
 0xbda   :  { %v1266_v57 = vmul.f32 %v2272_v56, %v2264_v36 }
 0xbdc   :  { %2054 = vmatmul.msk.f32.vlgmr.msrb.gmra.mxu3 %vm508_vm10, %v1266_v57 }
 0xbdd   :  { %1555 = vmatpush.bf16.msrb.mxu3 %v2184_v9 }
 0xbe4   :  { %1333 = vrot.lane.b32.xlu2 %v2703_v60, %s2294_s3 }
 0xbea   :  { %v1518_v1 = vpop.permute.xlu0 %1517 }
 0xc3f   :  { %v1330_v59 = vpop.xlane.xlu2 %1329 }
 0xc40   :  { %2273 = vrcp.f32 %v1330_v59 }
 0xc41   :  { %2275 = vrcp.f32 %v1445_v61 }
 0xc46   :  { %v2274_v62 = vpop.eup %2273 }
 0xc47   :  { %v1332_v63 = vmul.f32 %v2274_v62, %v2268_v49  ;;  %v1334_v0 = vpop.permute.xlu2 %1333  ;;  %v2276_v2 = vpop.eup %2275 }
 0xc48   :  { %2057 = vmatpush.msk.msrb.mxu2 %vm232_vm2, %v1334_v0  ;;  %v1447_v3 = vmul.f32 %v2276_v2, %v2266_v38 }
 0xc49   :  { %2058 = vmatmul.msk.f32.vlgmr.msrb.gmra.mxu2 %vm508_vm10, %v1332_v63 }
 0xc4a   :  { %2071 = vmatpush.msk.msra.mxu2 %vm232_vm2, %v1451_v46  ;;  %v1514_v60 = vpop.xlane.xlu1 %1513 }
 0xc4b   :  { %2277 = vrcp.f32 %v1514_v60  ;;  %v2215_v60 = vld [vmem:[%s2851_s16 + $0x1] ss:$0 sm:$0xff] }
 0xc4c   :  { %2075 = vmatpush.msk.msrb.mxu2 %vm232_vm2, %v1518_v1 }
 0xc51   :  { %2072 = vmatmul.msk.f32.vlgmr.msra.gmra.mxu2 %vm508_vm10, %v1447_v3  ;;  %v2278_v4 = vpop.eup %2277 }
 0xc52   :  { %v1516_v5 = vmul.f32 %v2278_v4, %v2270_v54 }
 0xc59   :  { %2076 = vmatmul.msk.f32.vlgmr.msrb.gmra.mxu2 %vm508_vm10, %v1516_v5  ;;  %v2216_v5 = vld [vmem:[%s2852_s17 + $0x1] ss:$0 sm:$0xff] }
 0xc5f   :  { %v1290_v7 = vpop.f32.mrf.mxu3 }
 0xc60   :  { %v1293_v8 = vpack.c.bf16 %v1290_v7, %v1290_v7 }
 0xc62   :  { %2068 = vmatmul.msk.bf16.vlgmr.msra.gmra.mxu0 %vm469_vm7, %v1293_v8 }
 0xccc   :  { %v1357_v11 = vpop.f32.mrf.mxu2 }
 0xccd   :  { %v1360_v13 = vpack.c.bf16 %v1357_v11, %v1357_v11 }
 0xccf   :  { %2063 = vmatmul.msk.bf16.vlgmr.msra.gmra.mxu3 %vm469_vm7, %v1360_v13 }
 0xcd4   :  { %v1474_v14 = vpop.f32.mrf.mxu2 }
 0xcd5   :  { %v1477_v15 = vpack.c.bf16 %v1474_v14, %v1474_v14 }
 0xcd7   :  { %2078 = vmatmul.msk.bf16.vlgmr.msrb.gmra.mxu0 %vm469_vm7, %v1477_v15  ;;  %v2194_v15 = vld [vmem:[%s2856_s20 + $0x78] sm:$0xff] }
 0xcd8   :  { %1801 = vmatpush.bf16.msra.mxu2 %v2194_v15 }
 0xcdc   :  { %v1541_v39 = vpop.f32.mrf.mxu2 }
 0xcdd   :  { %v1544_v16 = vpack.c.bf16 %v1541_v39, %v1541_v39  ;;  %v2193_v39 = vld [vmem:[%s2856_s20 + $0x70] sm:$0xff] }
 0xcde   :  { %1802 = vmatpush.bf16.msra.mxu2 %v2193_v39 }
 0xcdf   :  { %v1401_v17 = vpop.f32.mrf.mxu0  ;;  %2077 = vmatmul.msk.bf16.vlgmr.msrb.gmra.mxu3 %vm469_vm7, %v1544_v16  ;;  %v2192_v16 = vld [vmem:[%s2856_s20 + $0x68] sm:$0xff] }
 0xce2   :  { %1803 = vmatpush.bf16.msra.mxu2 %v2192_v16 }
 0xce7   :  { %v1403_v19 = vpop.f32.mrf.mxu0 }
 0xce8   :  { %v2217_v19 = vld [vmem:[%s2853_s19 + $0x1] ss:$0 sm:$0xff] }
 0xd52   :  { %v1379_v20 = vpop.f32.mrf.mxu3 }
 0xd53   :  { %v1402_v26 = vadd.f32 %v1401_v17, %v1379_v20  ;;  %v2191_v17 = vld [vmem:[%s2856_s20 + $0x60] sm:$0xff]  ;;  %v2190_v20 = vld [vmem:[%s2856_s20 + $0x58] sm:$0xff] }
 0xd54   :  { %v1573_v42 = vpop.f32.mrf.mxu0  ;;  %1804 = vmatpush.bf16.msra.mxu2 %v2191_v17  ;;  %v2219_v17 = vld [vmem:[%s2857_s22] ss:$0 sm:$0xff] }
 0xd58   :  { %1805 = vmatpush.bf16.msra.mxu2 %v2190_v20 }
 0xd5a   :  { %v1381_v21 = vpop.f32.mrf.mxu3 }
 0xd5c   :  { %v1575_v22 = vpop.f32.mrf.mxu0 }
 0xd5d   :  { %v2189_v22 = vld [vmem:[%s2856_s20 + $0x50] sm:$0xff] }
 0xd5e   :  { %1806 = vmatpush.bf16.msra.mxu2 %v2189_v22 }
 0xd62   :  { %v1557_v23 = vpop.f32.mrf.mxu3 }
 0xd63   :  { %v1574_v24 = vadd.f32 %v1573_v42, %v1557_v23 }
 0xd65   :  { %v1578_v27 = vrot.slane %v1574_v24, 3 }
 0xd67   :  { %v1580_v28 = vsel %vm232_vm2, %v1402_v26, %v1578_v27  ;;  %v1587_v32 = vadd.f32 %v2214_v25, %v1578_v27 }
 0xd68   :  { %v1586_v29 = vadd.f32 %v2214_v25, %v1580_v28  ;;  %v2188_v25 = vld [vmem:[%s2856_s20 + $0x48] sm:$0xff]  ;;  %v2187_v28 = vld [vmem:[%s2856_s20 + $0x40] sm:$0xff] }
 0xd69   :  { %v1589_v34 = vadd.f32 %v1587_v32, %v2658_v10  ;;  %v2186_v10 = vld [vmem:[%s2854_s18 + $0x18] sm:$0xff]  ;;  %1807 = vmatpush.bf16.msra.mxu2 %v2188_v25 }
 0xd6a   :  { %v1559_v30 = vpop.f32.mrf.mxu3  ;;  %v2763_v31 = vadd.f32 %v1586_v29, %v2653_v6  ;;  %1680 = vmatpush.bf16.msra.mxu1 %v2186_v10 }
 0xd6b   :  { %v1597_v35 = vsel %vm242_vm5, %v1589_v34, 0.0 }
 0xd6c   :  { %v1594_v33 = vsel %vm238_vm4, %v2763_v31, 0.0 }
 0xd6d   :  { %1595 = vadd.xlane.f32.xlu1 %v1594_v33  ;;  %1808 = vmatpush.bf16.msra.mxu2 %v2187_v28 }
 0xd6e   :  { %1681 = vmatpush.bf16.msra.mxu1 %v2185_v50 }
 0xd75   :  { %1598 = vadd.xlane.f32.xlu1 %v1597_v35 }
 0xde0   :  { %v1596_v36 = vpop.xlane.xlu1 %1595 }
 0xde1   :  { %v1600_v37 = vmul.f32 %v1596_v36, %v2469_v43 }
 0xde3   :  { %v1602_v38 = vsub.f32 %v2763_v31, %v1600_v37 }
 0xde5   :  { %v1604_v40 = vmul.f32 %v1602_v38, %v1602_v38 }
 0xde7   :  { %v1606_v41 = vsel %vm238_vm4, %v1604_v40, 0.0 }
 0xde8   :  { %1607 = vadd.xlane.f32.xlu2 %v1606_v41  ;;  %v1599_v6 = vpop.xlane.xlu1 %1598 }
 0xde9   :  { %v1601_v44 = vmul.f32 %v1599_v6, %v2469_v43 }
 0xdeb   :  { %v1603_v45 = vsub.f32 %v1589_v34, %v1601_v44 }
 0xded   :  { %v1605_v46 = vmul.f32 %v1603_v45, %v1603_v45 }
 0xdef   :  { %v1609_v47 = vsel %vm242_vm5, %v1605_v46, 0.0 }
 0xdf0   :  { %1610 = vadd.xlane.f32.xlu0 %v1609_v47 }
 0xe5b   :  { %v1608_v48 = vpop.xlane.xlu2 %1607 }
 0xe5c   :  { %v1612_v12 = vmul.f32 %v1608_v48, %v2469_v43 }
 0xe5e   :  { %v1614_v49 = vadd.f32 1e-05, %v1612_v12 }
 0xe60   :  { %2279 = vrsqrt.f32 %v1614_v49  ;;  %vm1622_vm7 = vweird.f32 %v1614_v49 }
 0xe63   :  { %v1611_v51 = vpop.xlane.xlu0 %1610 }
 0xe64   :  { %v1613_v18 = vmul.f32 %v1611_v51, %v2469_v43 }
 0xe66   :  { %v2280_v52 = vpop.eup %2279  ;;  %v1615_v53 = vadd.f32 1e-05, %v1613_v18 }
 0xe67   :  { %v1617_v54 = vmul.f32 %v2280_v52, %v1614_v49  ;;  %vm1623_vm2 = vweird.f32 %v2280_v52 }
 0xe68   :  { %2281 = vrsqrt.f32 %v1615_v53  ;;  %vm1624_vm8 = vmor %vm1622_vm7, %vm1623_vm2  ;;  %vm1632_vm10 = vweird.f32 %v1615_v53 }
 0xe69   :  { %v1618_v55 = vmul.f32 %v2280_v52, %v1617_v54 }
 0xe6b   :  { %v1619_v56 = vmul.f32 0.5, %v1618_v55 }
 0xe6d   :  { %v1620_v57 = vsub.f32 1.5, %v1619_v56 }
 0xe6e   :  { %v2282_v58 = vpop.eup %2281 }
 0xe6f   :  { %v1621_v59 = vmul.f32 %v2280_v52, %v1620_v57  ;;  %v1627_v61 = vmul.f32 %v2282_v58, %v1615_v53  ;;  %vm1633_vm9 = vweird.f32 %v2282_v58 }
 0xe70   :  { %vm1634_vm15 = vmor %vm1632_vm10, %vm1633_vm9 }
 0xe71   :  { %v1628_v62 = vmul.f32 %v2282_v58, %v1627_v61  ;;  %v1625_v63 = vsel %vm1624_vm8, %v2280_v52, %v1621_v59 }
 0xe72   :  { %v1636_v2 = vmul.f32 %v1625_v63, %v1602_v38 }
 0xe73   :  { %v1629_v0 = vmul.f32 0.5, %v1628_v62 }
 0xe74   :  { %v1641_v7 = vmul.f32 %v2215_v60, %v1636_v2 }
 0xe75   :  { %v1630_v1 = vsub.f32 1.5, %v1629_v0 }
 0xe76   :  { %v1646_v11 = vadd.f32 %v2216_v5, %v1641_v7 }
 0xe77   :  { %v1631_v3 = vmul.f32 %v2282_v58, %v1630_v1 }
 0xe79   :  { %v1635_v4 = vsel %vm1634_vm15, %v2282_v58, %v1631_v3  ;;  %v2218_v58 = vld [vmem:[%s2855_s21 + $0x1] ss:$0 sm:$0xff] }
 0xe7a   :  { %v1637_v8 = vmul.f32 %v1635_v4, %v1603_v45 }
 0xe7c   :  { %v1642_v9 = vmul.f32 %v2215_v60, %v1637_v8 }
 0xe7e   :  { %v1647_v13 = vadd.f32 %v2216_v5, %v1642_v9 }
 0xe80   :  { %v1653_v14 = vpack.c.bf16 %v1647_v13, %v1646_v11 }
 0xe82   :  { %2095 = vmatmul.msk.bf16.vlgmr.msra.gmra.mxu1 %vm238_vm4, %v1653_v14 }
 0xeff   :  { %v1683_v42 = vpop.f32.mrf.mxu1 }
 0xf00   :  { %v1684_v21 = vadd.f32 %v2217_v19, %v1683_v42 }
 0xf02   :  { %v2096_v23 = vmul.f32 -1.702, %v1684_v21 }
 0xf04   :  { %v1692_v24 = vmul.f32 1.442695, %v2096_v23 }
 0xf06   :  { %2283 = vpow2.f32 %v1692_v24 }
 0xf07   :  { %v1685_v26 = vpop.f32.mrf.mxu1 }
 0xf08   :  { %v1686_v27 = vadd.f32 %v2217_v19, %v1685_v26 }
 0xf0a   :  { %v2097_v29 = vmul.f32 -1.702, %v1686_v27 }
 0xf0c   :  { %v2284_v30 = vpop.eup %2283  ;;  %v1694_v32 = vmul.f32 1.442695, %v2097_v29 }
 0xf0d   :  { %v1696_v33 = vadd.f32 1.0, %v2284_v30 }
 0xf0e   :  { %2285 = vpow2.f32 %v1694_v32 }
 0xf0f   :  { %2287 = vrcp.f32 %v1696_v33  ;;  %v1709_v45 = vand.u32 2147483648, %v1696_v33  ;;  %vm1703_vm0 = vweird.f32 %v1696_v33  ;;  %v1707_v46 = vand.u32 2147483647, %v1696_v33 }
 0xf11   :  { %v1710_v50 = vor.u32 1.1754944e-38, %v1709_v45  ;;  %vm1708_vm11 = vcmp.eq.f32.partialorder %v1707_v46, 8.507059e+37 }
 0xf14   :  { %v2286_v34 = vpop.eup %2285 }
 0xf15   :  { %v2288_v35 = vpop.eup %2287  ;;  %v1697_v36 = vadd.f32 1.0, %v2286_v34 }
 0xf16   :  { %v1699_v37 = vmul.f32 %v2288_v35, %v1696_v33  ;;  %vm1704_vm4 = vweird.f32 %v2288_v35 }
 0xf17   :  { %2289 = vrcp.f32 %v1697_v36  ;;  %vm1705_vm3 = vmor %vm1703_vm0, %vm1704_vm4  ;;  %v1724_v10 = vand.u32 2147483648, %v1697_v36  ;;  %v1722_v49 = vand.u32 2147483647, %v1697_v36  ;;  %vm1718_vm12 = vweird.f32 %v1697_v36 }
 0xf18   :  { %v1700_v38 = vsub.f32 1.0, %v1699_v37 }
 0xf19   :  { %v1725_v52 = vor.u32 1.1754944e-38, %v1724_v10  ;;  %vm1723_vm14 = vcmp.eq.f32.partialorder %v1722_v49, 8.507059e+37 }
 0xf1a   :  { %v1701_v40 = vmul.f32 %v2288_v35, %v1700_v38 }
 0xf1c   :  { %v1702_v6 = vadd.f32 %v2288_v35, %v1701_v40 }
 0xf1d   :  { %v2290_v41 = vpop.eup %2289 }
 0xf1e   :  { %v1714_v44 = vmul.f32 %v2290_v41, %v1697_v36  ;;  %v1706_v48 = vsel %vm1705_vm3, %v2288_v35, %v1702_v6  ;;  %vm1719_vm6 = vweird.f32 %v2290_v41 }
 0xf1f   :  { %v1711_v18 = vsel %vm1708_vm11, %v1710_v50, %v1706_v48  ;;  %vm1720_vm13 = vmor %vm1718_vm12, %vm1719_vm6 }
 0xf20   :  { %v1715_v47 = vsub.f32 1.0, %v1714_v44  ;;  %v1728_v55 = vmul.f32 %v1711_v18, %v1684_v21 }
 0xf22   :  { %v1716_v12 = vmul.f32 %v2290_v41, %v1715_v47 }
 0xf24   :  { %v1717_v51 = vadd.f32 %v2290_v41, %v1716_v12 }
 0xf26   :  { %v1721_v53 = vsel %vm1720_vm13, %v2290_v41, %v1717_v51 }
 0xf27   :  { %v1726_v54 = vsel %vm1723_vm14, %v1725_v52, %v1721_v53 }
 0xf28   :  { %v1729_v56 = vmul.f32 %v1726_v54, %v1686_v27 }
 0xf2a   :  { %v1747_v57 = vpack.c.bf16 %v1729_v56, %v1728_v55 }
 0xf2c   :  { %1809 = vmatmul.bf16.vlgmr.msra.gmra.mxu2 %v1747_v57 }
 0xfaf   :  { %v1810_v59 = vpop.f32.mrf.mxu2 }
 0xfb0   :  { %v1811_v61 = vadd.f32 %v2218_v58, %v1810_v59 }
 0xfb2   :  { %v1814_v62 = vadd.f32 %v1811_v61, %v2763_v31 }
 0xfb4   :  { %v1816_v63 = vrot.slane %v1814_v62, 4 }
 0xfb6   :  { %v1818_v0 = vsel %vm230_vm1, %v1814_v62, %v1816_v63 }
 0xfb7   :  { %v1812_v1 = vpop.f32.mrf.mxu2  ;;  %v1821_v60 = vsel %vm242_vm5, %v1818_v0, 0.0 }
 0xfb8   :  { %1822 = vadd.xlane.f32.xlu1 %v1821_v60 }
0x102b   :  { %v1823_v2 = vpop.xlane.xlu1 %1822 }
0x102c   :  { %v1824_v3 = vmul.f32 %v1823_v2, %v2469_v43 }
0x102e   :  { %v1825_v4 = vsub.f32 %v1818_v0, %v1824_v3 }
0x1030   :  { %v1826_v5 = vmul.f32 %v1825_v4, %v1825_v4 }
0x1032   :  { %v1827_v7 = vsel %vm242_vm5, %v1826_v5, 0.0 }
0x1033   :  { %1828 = vadd.xlane.f32.xlu1 %v1827_v7 }
0x10a6   :  { %v1829_v8 = vpop.xlane.xlu1 %1828 }
0x10a7   :  { %v1830_v9 = vmul.f32 %v1829_v8, %v2469_v43  ;;  %v2220_v43 = vld [vmem:[%s2858_s23] ss:$0 sm:$0xff] }
0x10a9   :  { %v1831_v11 = vadd.f32 1e-05, %v1830_v9 }
0x10ab   :  { %2291 = vrsqrt.f32 %v1831_v11  ;;  %vm1838_vm2 = vweird.f32 %v1831_v11 }
0x10b1   :  { %v2292_v31 = vpop.eup %2291 }
0x10b2   :  { %v1833_v13 = vmul.f32 %v2292_v31, %v1831_v11  ;;  %vm1839_vm1 = vweird.f32 %v2292_v31 }
0x10b3   :  { %vm1840_vm7 = vmor %vm1838_vm2, %vm1839_vm1 }
0x10b4   :  { %v1834_v14 = vmul.f32 %v2292_v31, %v1833_v13 }
0x10b6   :  { %v1835_v15 = vmul.f32 0.5, %v1834_v14 }
0x10b8   :  { %v1836_v39 = vsub.f32 1.5, %v1835_v15 }
0x10ba   :  { %v1837_v16 = vmul.f32 %v2292_v31, %v1836_v39 }
0x10bc   :  { %v1841_v19 = vsel %vm1840_vm7, %v2292_v31, %v1837_v16 }
0x10bd   :  { %v1842_v20 = vmul.f32 %v1841_v19, %v1825_v4 }
0x10bf   :  { %v1846_v42 = vmul.f32 %v2219_v17, %v1842_v20 }
0x10c1   :  { %v1850_v21 = vadd.f32 %v2220_v43, %v1846_v42 }
0x10c3   :  { %1851 = vst.msk [vmem:[%s2859_s24] sm:$0x3] %vm242_vm5, %v1850_v21 }

</bundles_post_ra>
